<compile_context>
chip_gen: v6e
topology: v6e:2x2x1
jax: 0.10.0
libtpu: 0.0.40
codegen_flags: <defaults>
</compile_context>

<pallas_src>
import math

import jax
import jax.numpy as jnp
from jax.experimental import pallas as pl

# Full f32 matmul precision for the pure-JAX reference (and the kernel dots),
# so the correctness check is not polluted by bf16 default-precision paths.
jax.config.update("jax_default_matmul_precision", "highest")

# Small shapes consistent with the module's forward (hidden divisible by heads,
# classifier input = 3 * hidden).
BATCH = 2
SEQ = 8
HIDDEN = 64
NUM_HEADS = 4
HEAD_SIZE = HIDDEN // NUM_HEADS
MID = 32
TASKS = 2
VOCAB = 100
BN_EPS = 1e-5
G = 2 * BATCH   # two co-attention directions stacked over the batch axis


# --------------------------------------------------------------------------
# Fused kernel: embedding gather + both co-attention directions (CLS row only)
# + both task classifier heads (BatchNorm pre-folded into W1/b1).
# --------------------------------------------------------------------------
def _fused_forward_kernel(ids_ref, table_ref, wkvq_ref, bkvq_ref,
                          hm_ref, hmt_ref, w1_ref, b1_ref, w2_ref, b2_ref,
                          out_ref):
    f32 = jnp.float32

    # ids in CONTEXT order: rows [0,B) = target ids, rows [B,2B) = source ids.
    ids_ctx = ids_ref[...]                                               # (G, S) int32
    # Query-order ids (source first): used for the key-mask bias and the CLS
    # queries (the torch module masks the keys with the *query* sequence mask).
    ids_q = jnp.concatenate([ids_ctx[BATCH:], ids_ctx[:BATCH]], axis=0)  # (G, S)
    bias = jnp.where(ids_q == 0, f32(-10000.0), f32(0.0))                # (G, S)

    # ---- embedding gather fused in-kernel (exact one-hot matmul lookup) ----
    table = table_ref[...]                                               # (V, H)
    iota_v3 = jax.lax.broadcasted_iota(jnp.int32, (G, SEQ, VOCAB), 2)
    onehot_ctx = (ids_ctx[:, :, None] == iota_v3).astype(f32).reshape(G * SEQ, VOCAB)
    ctx_flat = jnp.dot(onehot_ctx, table, preferred_element_type=f32)    # (G*S, H)

    iota_v2 = jax.lax.broadcasted_iota(jnp.int32, (G, VOCAB), 1)
    onehot_q = (ids_q[:, 0:1] == iota_v2).astype(f32)                    # (G, V)
    qcls = jnp.dot(onehot_q, table, preferred_element_type=f32)          # (G, H)

    # ---- packed [K | V | Q] projection: K/V output is lane-dense (N = 128) ----
    kv = (jnp.dot(ctx_flat, wkvq_ref[:, :2 * HIDDEN], preferred_element_type=f32)
          + bkvq_ref[:, :2 * HIDDEN])                                    # (G*S, 2H)
    q = (jnp.dot(qcls, wkvq_ref[:, 2 * HIDDEN:], preferred_element_type=f32)
         + bkvq_ref[:, 2 * HIDDEN:])                                     # (G, H)
    k = kv[:, :HIDDEN].reshape(G, SEQ, HIDDEN)
    v = kv[:, HIDDEN:].reshape(G, SEQ, HIDDEN)

    # ---- per-head scores for the single CLS query row ----
    # scores[g,s,h] = (1/sqrt(HS)) * sum_{d in head h} q[g,d]*k[g,s,d] + bias[g,s]
    prod = q[:, None, :] * k                                             # (G, S, H)
    scores = jnp.dot(prod.reshape(G * SEQ, HIDDEN), hm_ref[...],
                     preferred_element_type=f32).reshape(G, SEQ, NUM_HEADS)
    scores = scores * (1.0 / math.sqrt(HEAD_SIZE)) + bias[:, :, None]

    # Softmax over keys (axis=1); attention dropout is identity at inference.
    scores = scores - jnp.max(scores, axis=1, keepdims=True)
    p = jnp.exp(scores)
    probs = p / jnp.sum(p, axis=1, keepdims=True)                        # (G, S, NH)

    # out[g,d] = sum_s probs[g,s,head(d)] * v[g,s,d]   (== torch head concat)
    probs_full = jnp.dot(probs.reshape(G * SEQ, NUM_HEADS), hmt_ref[...],
                         preferred_element_type=f32).reshape(G, SEQ, HIDDEN)
    att = jnp.sum(probs_full * v, axis=1)                                # (G, H)

    # ---- fused classifier heads (BN folded into w1/b1; dropout = identity) ----
    s_cls = att[:BATCH, :]                                               # (B, H)
    t_cls = att[BATCH:, :]                                               # (B, H)
    a_cls = jnp.abs(s_cls - t_cls)
    h = (jnp.dot(s_cls, w1_ref[0:HIDDEN, :], preferred_element_type=f32)
         + jnp.dot(t_cls, w1_ref[HIDDEN:2 * HIDDEN, :], preferred_element_type=f32)
         + jnp.dot(a_cls, w1_ref[2 * HIDDEN:3 * HIDDEN, :], preferred_element_type=f32)
         + b1_ref[...])
    h = jnp.maximum(h, 0.0)                                              # ReLU
    out_ref[...] = (jnp.dot(h, w2_ref[...], preferred_element_type=f32)
                    + b2_ref[...]).astype(out_ref.dtype)


def fused_forward(ids_ctx, table, wkvq, bkvq, hm, hmt, w1, b1, w2, b2):
    # Single-invocation kernel: no grid -> whole arrays are copied once into
    # VMEM (total footprint ~0.2 MiB), no double-buffering / pipeline prologue.
    return pl.pallas_call(
        _fused_forward_kernel,
        out_shape=jax.ShapeDtypeStruct((BATCH, TASKS * 2), jnp.float32),
    )(ids_ctx, table, wkvq, bkvq, hm, hmt, w1, b1, w2, b2)


# --------------------------------------------------------------------------
# Parameter construction (deterministic, in-script) + host-side folding
# --------------------------------------------------------------------------
def init_params(key):
    ks = jax.random.split(key, 16)
    scale = 0.02
    coatt = (
        scale * jax.random.normal(ks[0], (HIDDEN, HIDDEN), jnp.float32),  # Wq
        scale * jax.random.normal(ks[1], (1, HIDDEN), jnp.float32),       # bq
        scale * jax.random.normal(ks[2], (HIDDEN, HIDDEN), jnp.float32),  # Wk
        scale * jax.random.normal(ks[3], (1, HIDDEN), jnp.float32),       # bk
        scale * jax.random.normal(ks[4], (HIDDEN, HIDDEN), jnp.float32),  # Wv
        scale * jax.random.normal(ks[5], (1, HIDDEN), jnp.float32),       # bv
    )
    classifiers = []
    for t in range(TASKS):
        kt = jax.random.split(ks[6 + t], 4)
        classifiers.append((
            scale * jax.random.normal(kt[0], (3 * HIDDEN, MID), jnp.float32),  # W1
            scale * jax.random.normal(kt[1], (1, MID), jnp.float32),           # b1
            jnp.ones((1, MID), jnp.float32),                                   # BN gamma
            jnp.zeros((1, MID), jnp.float32),                                  # BN beta
            jnp.zeros((1, MID), jnp.float32),                                  # BN running_mean
            jnp.ones((1, MID), jnp.float32),                                   # BN running_var
            scale * jax.random.normal(kt[2], (MID, 2), jnp.float32),           # W2
            scale * jax.random.normal(kt[3], (1, 2), jnp.float32),             # b2
        ))
    embedding_table = scale * jax.random.normal(ks[10], (VOCAB, HIDDEN), jnp.float32)
    return coatt, classifiers, embedding_table


def fold_classifiers(classifier_params):
    """Fold eval-mode BN into W1/b1 and fuse both task heads into one set."""
    w1_cols, b1_cols, b2_cols = [], [], []
    w2_all = jnp.zeros((TASKS * MID, TASKS * 2), jnp.float32)
    for t, (w1, b1, gamma, beta, mean, var, w2, b2) in enumerate(classifier_params):
        bn_scale = gamma / jnp.sqrt(var + BN_EPS)               # (1, MID)
        w1_cols.append(w1 * bn_scale)                            # broadcast over rows
        b1_cols.append((b1 - mean) * bn_scale + beta)
        w2_all = w2_all.at[t * MID:(t + 1) * MID, t * 2:(t + 1) * 2].set(w2)
        b2_cols.append(b2)
    return (jnp.concatenate(w1_cols, axis=1),    # (3H, TASKS*MID)
            jnp.concatenate(b1_cols, axis=1),    # (1, TASKS*MID)
            w2_all,                              # (TASKS*MID, TASKS*2)
            jnp.concatenate(b2_cols, axis=1))    # (1, TASKS*2)


def prepare_params(coatt_params, classifier_params, embedding_table):
    """Host-side packing: [K|V|Q] weight, biases, head maps, folded classifiers."""
    wq, bq, wk, bk, wv, bv = coatt_params
    wkvq = jnp.concatenate([wk, wv, wq], axis=1)     # (H, 3H): K|V lane-dense, Q at lane 128
    bkvq = jnp.concatenate([bk, bv, bq], axis=1)     # (1, 3H)
    d = jnp.arange(HIDDEN)
    hm = (d[:, None] // HEAD_SIZE
          == jnp.arange(NUM_HEADS)[None, :]).astype(jnp.float32)   # (H, NH)
    hmt = jnp.transpose(hm)                                        # (NH, H)
    w1, b1, w2, b2 = fold_classifiers(classifier_params)
    return (embedding_table, wkvq, bkvq, hm, hmt, w1, b1, w2, b2)


# --------------------------------------------------------------------------
# Full forward: wrapper only concatenates the two id arrays (context order);
# everything else happens inside the single fused Pallas kernel.
# --------------------------------------------------------------------------
@jax.jit
def model_forward(source_input_ids, target_input_ids, kernel_params):
    # context order: rows [0,B) context = target (source query),
    #                rows [B,2B) context = source (target query).
    ids_ctx = jnp.concatenate([target_input_ids, source_input_ids],
                              axis=0).astype(jnp.int32)                 # (G, S)
    logits = fused_forward(ids_ctx, *kernel_params)                      # (B, TASKS*2)
    return [logits[:, t * 2:(t + 1) * 2] for t in range(TASKS)]


# --------------------------------------------------------------------------
# Pure-JAX reference (mirrors the torch module) for a correctness check
# --------------------------------------------------------------------------
def reference_forward(source_ids, target_ids, coatt_params, classifier_params,
                      embedding_table):
    wq, bq, wk, bk, wv, bv = coatt_params
    src_mask = (source_ids != 0).astype(jnp.float32)
    tgt_mask = (target_ids != 0).astype(jnp.float32)
    src_emb = embedding_table[source_ids]
    tgt_emb = embedding_table[target_ids]

    def co_att(ctx, qry, mask):
        q = qry @ wq + bq
        k = ctx @ wk + bk
        v = ctx @ wv + bv

        def split(x):
            return x.reshape(BATCH, SEQ, NUM_HEADS, HEAD_SIZE).transpose(0, 2, 1, 3)

        qh, kh, vh = split(q), split(k), split(v)
        scores = jnp.einsum('bhqd,bhkd->bhqk', qh, kh) / math.sqrt(HEAD_SIZE)
        scores = scores + ((1.0 - mask) * -10000.0)[:, None, None, :]
        probs = jax.nn.softmax(scores, axis=-1)
        out = jnp.einsum('bhqk,bhkd->bhqd', probs, vh)
        return out.transpose(0, 2, 1, 3).reshape(BATCH, SEQ, HIDDEN)

    s_cls = co_att(tgt_emb, src_emb, src_mask)[:, 0, :]
    t_cls = co_att(src_emb, tgt_emb, tgt_mask)[:, 0, :]
    feat = jnp.concatenate([s_cls, t_cls, jnp.abs(s_cls - t_cls)], axis=-1)
    outs = []
    for (w1, b1, gamma, beta, mean, var, w2, b2) in classifier_params:
        h = feat @ w1 + b1
        h = (h - mean) / jnp.sqrt(var + BN_EPS) * gamma + beta
        h = jnp.maximum(h, 0.0)
        outs.append(h @ w2 + b2)
    return outs


if __name__ == "__main__":
    root = jax.random.PRNGKey(0)
    k_params, k_data = jax.random.split(root)

    coatt_params, classifier_params, embedding_table = init_params(k_params)
    kernel_params = prepare_params(coatt_params, classifier_params, embedding_table)

    k_src, k_tgt = jax.random.split(k_data)
    source_ids = jax.random.randint(k_src, (BATCH, SEQ), 1, VOCAB, dtype=jnp.int32)
    target_ids = jax.random.randint(k_tgt, (BATCH, SEQ), 1, VOCAB, dtype=jnp.int32)
    # introduce padding (zeros) so the attention-mask path is exercised
    source_ids = source_ids.at[:, -2:].set(0)
    target_ids = target_ids.at[:, -1:].set(0)

    outs = model_forward(source_ids, target_ids, kernel_params)
    outs = jax.block_until_ready(outs)

    refs = reference_forward(source_ids, target_ids, coatt_params,
                             classifier_params, embedding_table)
    for o, r in zip(outs, refs):
        assert o.shape == (BATCH, 2)
        assert bool(jnp.all(jnp.isfinite(o)))
        assert bool(jnp.allclose(o, r, atol=1e-5, rtol=1e-4)), (o, r)
    print("KERNEL_OK")
</pallas_src>

<mosaic_0001>
module attributes {stable_mosaic.version = 11 : i64} {
  func.func @_fused_forward_kernel(%arg0: memref<4x8xi32, #tpu.memory_space<vmem>>, %arg1: memref<100x64xf32, #tpu.memory_space<vmem>>, %arg2: memref<64x192xf32, #tpu.memory_space<vmem>>, %arg3: memref<1x192xf32, #tpu.memory_space<vmem>>, %arg4: memref<64x4xf32, #tpu.memory_space<vmem>>, %arg5: memref<4x64xf32, #tpu.memory_space<vmem>>, %arg6: memref<192x64xf32, #tpu.memory_space<vmem>>, %arg7: memref<1x64xf32, #tpu.memory_space<vmem>>, %arg8: memref<64x4xf32, #tpu.memory_space<vmem>>, %arg9: memref<1x4xf32, #tpu.memory_space<vmem>>, %arg10: memref<2x4xf32, #tpu.memory_space<vmem>>) attributes {dimension_semantics = [], scalar_prefetch = 0 : i64, scratch_operands = 0 : i64, tpu.core_type = #tpu.core_type<tc>} {
    %c0 = arith.constant 0 : index
    %c0_0 = arith.constant 0 : index
    %0 = vector.load %arg0[%c0, %c0_0] : memref<4x8xi32, #tpu.memory_space<vmem>>, vector<4x8xi32>
    %1 = vector.extract_strided_slice %0 {offsets = [2, 0], sizes = [2, 8], strides = [1, 1]} : vector<4x8xi32> to vector<2x8xi32>
    %2 = vector.extract_strided_slice %0 {offsets = [0, 0], sizes = [2, 8], strides = [1, 1]} : vector<4x8xi32> to vector<2x8xi32>
    %3 = tpu.concatenate %1, %2 in 0 : vector<2x8xi32>, vector<2x8xi32> -> vector<4x8xi32>
    %c0_i32 = arith.constant 0 : i32
    %4 = vector.broadcast %c0_i32 : i32 to vector<4x8xi32>
    %5 = arith.cmpi eq, %3, %4 : vector<4x8xi32>
    %cst = arith.constant -1.000000e+04 : f32
    %cst_1 = arith.constant 0.000000e+00 : f32
    %6 = vector.broadcast %cst : f32 to vector<4x8xf32>
    %7 = vector.broadcast %cst_1 : f32 to vector<4x8xf32>
    %8 = arith.select %5, %6, %7 : vector<4x8xi1>, vector<4x8xf32>
    %c0_2 = arith.constant 0 : index
    %c0_3 = arith.constant 0 : index
    %9 = vector.load %arg1[%c0_2, %c0_3] : memref<100x64xf32, #tpu.memory_space<vmem>>, vector<100x64xf32>
    %10 = tpu.iota {dimensions = array<i32: 2>} : vector<4x8x100xi32>
    %11 = vector.shape_cast %0 : vector<4x8xi32> to vector<4x8x1xi32>
    %12 = vector.broadcast %11 : vector<4x8x1xi32> to vector<4x8x100xi32>
    %13 = arith.cmpi eq, %12, %10 : vector<4x8x100xi32>
    %14 = arith.extui %13 : vector<4x8x100xi1> to vector<4x8x100xi32>
    %15 = arith.sitofp %14 : vector<4x8x100xi32> to vector<4x8x100xf32>
    %16 = vector.shape_cast %15 : vector<4x8x100xf32> to vector<32x100xf32>
    %cst_4 = arith.constant dense<0.000000e+00> : vector<32x64xf32>
    %17 = tpu.matmul %16, %9, %cst_4 {dimension_numbers = #tpu.dot_dimension_numbers<[1], [0], [0], [1], [0, 0, 1, 1], [], []>, precision = #tpu.contract_precision<fp32>} : vector<32x100xf32>, vector<100x64xf32>, vector<32x64xf32> -> vector<32x64xf32>
    %18 = tpu.iota {dimensions = array<i32: 1>} : vector<4x100xi32>
    %19 = vector.extract_strided_slice %3 {offsets = [0, 0], sizes = [4, 1], strides = [1, 1]} : vector<4x8xi32> to vector<4x1xi32>
    %20 = vector.broadcast %19 : vector<4x1xi32> to vector<4x100xi32>
    %21 = arith.cmpi eq, %20, %18 : vector<4x100xi32>
    %22 = arith.extui %21 : vector<4x100xi1> to vector<4x100xi32>
    %23 = arith.sitofp %22 : vector<4x100xi32> to vector<4x100xf32>
    %cst_5 = arith.constant dense<0.000000e+00> : vector<4x64xf32>
    %24 = tpu.matmul %23, %9, %cst_5 {dimension_numbers = #tpu.dot_dimension_numbers<[1], [0], [0], [1], [0, 0, 1, 1], [], []>, precision = #tpu.contract_precision<fp32>} : vector<4x100xf32>, vector<100x64xf32>, vector<4x64xf32> -> vector<4x64xf32>
    %c0_6 = arith.constant 0 : index
    %c0_7 = arith.constant 0 : index
    %25 = vector.load %arg2[%c0_6, %c0_7] : memref<64x192xf32, #tpu.memory_space<vmem>>, vector<64x128xf32>
    %cst_8 = arith.constant dense<0.000000e+00> : vector<32x128xf32>
    %26 = tpu.matmul %17, %25, %cst_8 {dimension_numbers = #tpu.dot_dimension_numbers<[1], [0], [0], [1], [0, 0, 1, 1], [], []>, precision = #tpu.contract_precision<fp32>} : vector<32x64xf32>, vector<64x128xf32>, vector<32x128xf32> -> vector<32x128xf32>
    %c0_9 = arith.constant 0 : index
    %c0_10 = arith.constant 0 : index
    %27 = vector.load %arg3[%c0_9, %c0_10] : memref<1x192xf32, #tpu.memory_space<vmem>>, vector<1x128xf32>
    %28 = vector.broadcast %27 : vector<1x128xf32> to vector<32x128xf32>
    %29 = arith.addf %26, %28 : vector<32x128xf32>
    %c0_11 = arith.constant 0 : index
    %c128 = arith.constant 128 : index
    %30 = vector.load %arg2[%c0_11, %c128] : memref<64x192xf32, #tpu.memory_space<vmem>>, vector<64x64xf32>
    %cst_12 = arith.constant dense<0.000000e+00> : vector<4x64xf32>
    %31 = tpu.matmul %24, %30, %cst_12 {dimension_numbers = #tpu.dot_dimension_numbers<[1], [0], [0], [1], [0, 0, 1, 1], [], []>, precision = #tpu.contract_precision<fp32>} : vector<4x64xf32>, vector<64x64xf32>, vector<4x64xf32> -> vector<4x64xf32>
    %c0_13 = arith.constant 0 : index
    %c128_14 = arith.constant 128 : index
    %32 = vector.load %arg3[%c0_13, %c128_14] : memref<1x192xf32, #tpu.memory_space<vmem>>, vector<1x64xf32>
    %33 = vector.broadcast %32 : vector<1x64xf32> to vector<4x64xf32>
    %34 = arith.addf %31, %33 : vector<4x64xf32>
    %35 = vector.extract_strided_slice %29 {offsets = [0, 0], sizes = [32, 64], strides = [1, 1]} : vector<32x128xf32> to vector<32x64xf32>
    %36 = vector.shape_cast %35 : vector<32x64xf32> to vector<4x8x64xf32>
    %37 = vector.extract_strided_slice %29 {offsets = [0, 64], sizes = [32, 64], strides = [1, 1]} : vector<32x128xf32> to vector<32x64xf32>
    %38 = vector.shape_cast %37 : vector<32x64xf32> to vector<4x8x64xf32>
    %39 = vector.shape_cast %34 : vector<4x64xf32> to vector<4x1x64xf32>
    %40 = vector.broadcast %39 : vector<4x1x64xf32> to vector<4x8x64xf32>
    %41 = arith.mulf %40, %36 : vector<4x8x64xf32>
    %42 = vector.shape_cast %41 : vector<4x8x64xf32> to vector<32x64xf32>
    %c0_15 = arith.constant 0 : index
    %c0_16 = arith.constant 0 : index
    %43 = vector.load %arg4[%c0_15, %c0_16] : memref<64x4xf32, #tpu.memory_space<vmem>>, vector<64x4xf32>
    %cst_17 = arith.constant dense<0.000000e+00> : vector<32x4xf32>
    %44 = tpu.matmul %42, %43, %cst_17 {dimension_numbers = #tpu.dot_dimension_numbers<[1], [0], [0], [1], [0, 0, 1, 1], [], []>, precision = #tpu.contract_precision<fp32>} : vector<32x64xf32>, vector<64x4xf32>, vector<32x4xf32> -> vector<32x4xf32>
    %45 = vector.shape_cast %44 : vector<32x4xf32> to vector<4x8x4xf32>
    %cst_18 = arith.constant 2.500000e-01 : f32
    %46 = vector.broadcast %cst_18 : f32 to vector<4x8x4xf32>
    %47 = arith.mulf %45, %46 : vector<4x8x4xf32>
    %48 = vector.shape_cast %8 : vector<4x8xf32> to vector<4x8x1xf32>
    %49 = vector.broadcast %48 : vector<4x8x1xf32> to vector<4x8x4xf32>
    %50 = arith.addf %47, %49 : vector<4x8x4xf32>
    %cst_19 = arith.constant dense<0xFF800000> : vector<4x4xf32>
    %51 = vector.multi_reduction <maximumf>, %50, %cst_19 [1] : vector<4x8x4xf32> to vector<4x4xf32>
    %52 = vector.shape_cast %51 : vector<4x4xf32> to vector<4x1x4xf32>
    %53 = vector.broadcast %52 : vector<4x1x4xf32> to vector<4x8x4xf32>
    %54 = arith.subf %50, %53 : vector<4x8x4xf32>
    %55 = math.exp %54 : vector<4x8x4xf32>
    %cst_20 = arith.constant dense<0.000000e+00> : vector<4x4xf32>
    %56 = vector.multi_reduction <add>, %55, %cst_20 [1] : vector<4x8x4xf32> to vector<4x4xf32>
    %57 = vector.shape_cast %56 : vector<4x4xf32> to vector<4x1x4xf32>
    %58 = vector.broadcast %57 : vector<4x1x4xf32> to vector<4x8x4xf32>
    %59 = arith.divf %55, %58 : vector<4x8x4xf32>
    %60 = vector.shape_cast %59 : vector<4x8x4xf32> to vector<32x4xf32>
    %c0_21 = arith.constant 0 : index
    %c0_22 = arith.constant 0 : index
    %61 = vector.load %arg5[%c0_21, %c0_22] : memref<4x64xf32, #tpu.memory_space<vmem>>, vector<4x64xf32>
    %cst_23 = arith.constant dense<0.000000e+00> : vector<32x64xf32>
    %62 = tpu.matmul %60, %61, %cst_23 {dimension_numbers = #tpu.dot_dimension_numbers<[1], [0], [0], [1], [0, 0, 1, 1], [], []>, precision = #tpu.contract_precision<fp32>} : vector<32x4xf32>, vector<4x64xf32>, vector<32x64xf32> -> vector<32x64xf32>
    %63 = vector.shape_cast %62 : vector<32x64xf32> to vector<4x8x64xf32>
    %64 = arith.mulf %63, %38 : vector<4x8x64xf32>
    %cst_24 = arith.constant dense<0.000000e+00> : vector<4x64xf32>
    %65 = vector.multi_reduction <add>, %64, %cst_24 [1] : vector<4x8x64xf32> to vector<4x64xf32>
    %66 = vector.extract_strided_slice %65 {offsets = [0, 0], sizes = [2, 64], strides = [1, 1]} : vector<4x64xf32> to vector<2x64xf32>
    %67 = vector.extract_strided_slice %65 {offsets = [2, 0], sizes = [2, 64], strides = [1, 1]} : vector<4x64xf32> to vector<2x64xf32>
    %68 = arith.subf %66, %67 : vector<2x64xf32>
    %69 = math.absf %68 : vector<2x64xf32>
    %c0_25 = arith.constant 0 : index
    %c0_26 = arith.constant 0 : index
    %70 = vector.load %arg6[%c0_25, %c0_26] : memref<192x64xf32, #tpu.memory_space<vmem>>, vector<64x64xf32>
    %cst_27 = arith.constant dense<0.000000e+00> : vector<2x64xf32>
    %71 = tpu.matmul %66, %70, %cst_27 {dimension_numbers = #tpu.dot_dimension_numbers<[1], [0], [0], [1], [0, 0, 1, 1], [], []>, precision = #tpu.contract_precision<fp32>} : vector<2x64xf32>, vector<64x64xf32>, vector<2x64xf32> -> vector<2x64xf32>
    %c64 = arith.constant 64 : index
    %c0_28 = arith.constant 0 : index
    %72 = vector.load %arg6[%c64, %c0_28] : memref<192x64xf32, #tpu.memory_space<vmem>>, vector<64x64xf32>
    %cst_29 = arith.constant dense<0.000000e+00> : vector<2x64xf32>
    %73 = tpu.matmul %67, %72, %cst_29 {dimension_numbers = #tpu.dot_dimension_numbers<[1], [0], [0], [1], [0, 0, 1, 1], [], []>, precision = #tpu.contract_precision<fp32>} : vector<2x64xf32>, vector<64x64xf32>, vector<2x64xf32> -> vector<2x64xf32>
    %74 = arith.addf %71, %73 : vector<2x64xf32>
    %c128_30 = arith.constant 128 : index
    %c0_31 = arith.constant 0 : index
    %75 = vector.load %arg6[%c128_30, %c0_31] : memref<192x64xf32, #tpu.memory_space<vmem>>, vector<64x64xf32>
    %cst_32 = arith.constant dense<0.000000e+00> : vector<2x64xf32>
    %76 = tpu.matmul %69, %75, %cst_32 {dimension_numbers = #tpu.dot_dimension_numbers<[1], [0], [0], [1], [0, 0, 1, 1], [], []>, precision = #tpu.contract_precision<fp32>} : vector<2x64xf32>, vector<64x64xf32>, vector<2x64xf32> -> vector<2x64xf32>
    %77 = arith.addf %74, %76 : vector<2x64xf32>
    %c0_33 = arith.constant 0 : index
    %c0_34 = arith.constant 0 : index
    %78 = vector.load %arg7[%c0_33, %c0_34] : memref<1x64xf32, #tpu.memory_space<vmem>>, vector<1x64xf32>
    %79 = vector.broadcast %78 : vector<1x64xf32> to vector<2x64xf32>
    %80 = arith.addf %77, %79 : vector<2x64xf32>
    %cst_35 = arith.constant 0.000000e+00 : f32
    %81 = vector.broadcast %cst_35 : f32 to vector<2x64xf32>
    %82 = arith.maximumf %80, %81 : vector<2x64xf32>
    %c0_36 = arith.constant 0 : index
    %c0_37 = arith.constant 0 : index
    %83 = vector.load %arg8[%c0_36, %c0_37] : memref<64x4xf32, #tpu.memory_space<vmem>>, vector<64x4xf32>
    %cst_38 = arith.constant dense<0.000000e+00> : vector<2x4xf32>
    %84 = tpu.matmul %82, %83, %cst_38 {dimension_numbers = #tpu.dot_dimension_numbers<[1], [0], [0], [1], [0, 0, 1, 1], [], []>, precision = #tpu.contract_precision<fp32>} : vector<2x64xf32>, vector<64x4xf32>, vector<2x4xf32> -> vector<2x4xf32>
    %c0_39 = arith.constant 0 : index
    %c0_40 = arith.constant 0 : index
    %85 = vector.load %arg9[%c0_39, %c0_40] : memref<1x4xf32, #tpu.memory_space<vmem>>, vector<1x4xf32>
    %86 = vector.broadcast %85 : vector<1x4xf32> to vector<2x4xf32>
    %87 = arith.addf %84, %86 : vector<2x4xf32>
    %c0_41 = arith.constant 0 : index
    %c0_42 = arith.constant 0 : index
    %88 = vector.load %arg10[%c0_41, %c0_42] : memref<2x4xf32, #tpu.memory_space<vmem>>, vector<2x4xf32>
    tpu.vector_store %arg10[%c0_41, %c0_42], %87 {strides = array<i32>} : memref<2x4xf32, #tpu.memory_space<vmem>>, vector<2x4xf32>,
    return
  }
}

</mosaic_0001>

<bundles_post_ra>
// kernel: model_forward.1
= control target key start
LH: loop header
LB: loop body
LE: loop exit
PB: predicated region body
PF: predicated region fallthrough
CT: control target
= control target key end

     0   :  { %v55_v0 = vlaneseq  ;;  %vm38_vm0 = vcmask 1041408   ;;  %v8342_v2 = vmov 0   ;;  %vm110_vm1 = vcmask 1043456   ;;  %s8345_s22 = smov 64   ;;  %s10638_s0 = inlined_call_operand.vmem [shape: s32[4,8], index: 0, kind: input, shape index: {}]   ;;  %s10639_s1 = inlined_call_operand.vmem [shape: f32[100,64], index: 1, kind: input, shape index: {}]   ;;  %s10640_s2 = inlined_call_operand.vmem [shape: f32[64,192], index: 2, kind: input, shape index: {}]   ;;  %s10641_s4 = inlined_call_operand.vmem [shape: f32[64,4], index: 4, kind: input, shape index: {}]   ;;  %s10642_s3 = inlined_call_operand.vmem [shape: f32[1,192], index: 3, kind: input, shape index: {}]   ;;  %s10643_s5 = inlined_call_operand.vmem [shape: f32[4,64], index: 5, kind: input, shape index: {}]   ;;  %s10644_s6 = inlined_call_operand.vmem [shape: f32[192,64], index: 6, kind: input, shape index: {}]   ;;  %s10645_s8 = inlined_call_operand.vmem [shape: f32[64,4], index: 8, kind: input, shape index: {}]   ;;  %s10646_s7 = inlined_call_operand.vmem [shape: f32[1,64], index: 7, kind: input, shape index: {}]   ;;  %s10647_s9 = inlined_call_operand.vmem [shape: f32[1,4], index: 9, kind: input, shape index: {}]   ;;  %s10648_s10 = inlined_call_operand.vmem [shape: f32[2,4], index: 10, kind: output, shape index: {}]  }
   0x1   :  { %v35_v1 = vld [vmem:[%s10638_s0] sm:$0xf]  ;;  %8325 = vset.pattern.permute.xlu0 %v8342_v2  ;;  %v53_v4 = vld [vmem:[%s10639_s1 + $0x58] sm:$0xff]  ;;  %v52_v9 = vld [vmem:[%s10639_s1 + $0x50] sm:$0xff]  ;;  %vm97_vm2 = vcmask 818176   ;;  %vm8344_vm8 = vmmov 0  }
   0x2   :  { %v54_v3 = vld [vmem:[%s10639_s1 + $0x60] sm:$0xf]  ;;  %v8412_v5 = vshrl.u32 %v55_v0, 7  ;;  %v36_v6 = vrot.slane %v35_v1, 2  ;;  %v37_v7 = vrot.slane %v35_v1, 6  ;;  %v51_v10 = vld [vmem:[%s10639_s1 + $0x48] sm:$0xff] }
   0x3   :  { %v112_v8 = vsel %vm110_vm1, %v54_v3, 0  ;;  %v8423_v12 = vand.u32 4294901760, %v53_v4  ;;  %v8425_v13 = vand.u32 4294901760, %v52_v9  ;;  %v8427_v14 = vand.u32 4294901760, %v51_v10  ;;  %v50_v22 = vld [vmem:[%s10639_s1 + $0x40] sm:$0xff]  ;;  %v49_v23 = vld [vmem:[%s10639_s1 + $0x38] sm:$0xff] }
   0x4   :  { %10666 = vst [vmem:[#allocation2_spill] sm:$0xff] %v8412_v5  ;;  %v8421_v11 = vand.u32 4294901760, %v112_v8  ;;  %v8430_v15 = vsub.s32 0, %v8412_v5  ;;  %v10650_v16 = vsub.s32 2, %v8412_v5  ;;  %v10651_v17 = vsub.s32 1, %v8412_v5  ;;  %v48_v27 = vld [vmem:[%s10639_s1 + $0x30] sm:$0xff] }
   0x5   :  { %v10649_v18 = vsub.s32 3, %v8412_v5  ;;  %v8439_v20 = vsub.f32 %v53_v4, %v8423_v12  ;;  %v8442_v21 = vsub.f32 %v52_v9, %v8425_v13  ;;  %v8455_v26 = vsel %vm38_vm0, %v36_v6, %v37_v7  ;;  %v47_v32 = vld [vmem:[%s10639_s1 + $0x28] sm:$0xff]  ;;  %v46_v45 = vld [vmem:[%s10639_s1 + $0x20] sm:$0xff]  ;;  %v45_v46 = vld [vmem:[%s10639_s1 + $0x18] sm:$0xff] }
   0x6   :  { %10667 = vst [vmem:[#allocation3_spill] sm:$0xff] %v8430_v15  ;;  %v8436_v19 = vsub.f32 %v112_v8, %v8421_v11  ;;  %7072 = vmatprep.subr.mxu0 %v8421_v11  ;;  %v60_v24 = vrot.slane %v35_v1, %v8430_v15  ;;  %v74_v25 = vrot.slane %v35_v1, %v10650_v16  ;;  %10668 = vst [vmem:[#allocation4_spill] sm:$0xff] %v8455_v26  ;;  %v44_v47 = vld [vmem:[%s10639_s1 + $0x10] sm:$0xff]  ;;  %v43_v62 = vld [vmem:[%s10639_s1 + $0x8] sm:$0xff]  ;;  %vm1471_vm9 = vcmask 523264  }
   0x7   :  { %7073 = vmatpush3.msra.mxu0 %v8421_v11  ;;  %v67_v28 = vrot.slane %v35_v1, %v10651_v17  ;;  %v8467_v30 = vand.u32 4294901760, %v8439_v20  ;;  %v8470_v31 = vand.u32 4294901760, %v8442_v21  ;;  %v81_v33 = vrot.slane %v35_v1, %v10649_v18  ;;  %v42_v4 = vld [vmem:[%s10639_s1] sm:$0xff] }
   0x8   :  { %v8464_v29 = vand.u32 4294901760, %v8436_v19  ;;  %7074 = vmatprep.subr.mxu0 %v8423_v12  ;;  %62 = vbcast.lane.b32.xlu0 %v60_v24, 256  ;;  %v8479_v34 = vsub.f32 %v51_v10, %v8427_v14  ;;  %v8481_v35 = vand.u32 4294901760, %v50_v22  ;;  %v8483_v36 = vand.u32 4294901760, %v49_v23 }
   0x9   :  { %76 = vbcast.lane.b32.xlu1 %v74_v25, 256  ;;  %v249_v38 = vsub.f32 %v8439_v20, %v8467_v30  ;;  %v256_v39 = vsub.f32 %v8442_v21, %v8470_v31  ;;  %7075 = vmatpush3.msra.mxu0 %v8423_v12  ;;  %v8492_v40 = vand.u32 4294901760, %v48_v27  ;;  %v8504_v44 = vand.u32 4294901760, %v47_v32 }
   0xa   :  { %v242_v37 = vsub.f32 %v8436_v19, %v8464_v29  ;;  %v8495_v41 = vand.u32 4294901760, %v8479_v34  ;;  %v8498_v42 = vsub.f32 %v50_v22, %v8481_v35  ;;  %v8501_v43 = vsub.f32 %v49_v23, %v8483_v36  ;;  %7076 = vmatprep.subr.mxu0 %v8425_v13 }
   0xb   :  { %v8517_v49 = vand.u32 4294901760, %v249_v38  ;;  %v8519_v50 = vand.u32 4294901760, %v256_v39  ;;  %v8522_v51 = vsub.f32 %v48_v27, %v8492_v40  ;;  %7077 = vmatpush3.msra.mxu0 %v8425_v13  ;;  %v8534_v55 = vsub.f32 %v47_v32, %v8504_v44 }
   0xc   :  { %v8515_v48 = vand.u32 4294901760, %v242_v37  ;;  %69 = vbcast.lane.b32.xlu0 %v67_v28, 256  ;;  %v263_v52 = vsub.f32 %v8479_v34, %v8495_v41  ;;  %v8528_v53 = vand.u32 4294901760, %v8498_v42  ;;  %v8531_v54 = vand.u32 4294901760, %v8501_v43  ;;  %7078 = vmatprep.subr.mxu0 %v8427_v14 }
   0xd   :  { %83 = vbcast.lane.b32.xlu1 %v81_v33, 256  ;;  %v8538_v56 = vand.u32 4294901760, %v8522_v51  ;;  %v8541_v57 = vand.u32 4294901760, %v46_v45  ;;  %v8543_v58 = vand.u32 4294901760, %v45_v46  ;;  %v8545_v59 = vand.u32 4294901760, %v44_v47  ;;  %7079 = vmatpush3.msra.mxu0 %v8427_v14 }
   0xe   :  { %7104 = vmatprep.subr.mxu1 %v8515_v48  ;;  %v8548_v60 = vand.u32 4294901760, %v263_v52  ;;  %v270_v61 = vsub.f32 %v8498_v42, %v8528_v53  ;;  %v277_v63 = vsub.f32 %v8501_v43, %v8531_v54  ;;  %v8560_v1 = vand.u32 4294901760, %v8534_v55  ;;  %7080 = vmatprep.subr.mxu0 %v8481_v35 }
   0xf   :  { %7105 = vmatpush3.msra.mxu1 %v8515_v48  ;;  %v8563_v2 = vsub.f32 %v46_v45, %v8541_v57  ;;  %v8567_v3 = vsub.f32 %v45_v46, %v8543_v58  ;;  %v284_v6 = vsub.f32 %v8522_v51, %v8538_v56  ;;  %7081 = vmatpush3.msra.mxu0 %v8481_v35  ;;  %v8586_v10 = vand.u32 4294901760, %v43_v62 }
  0x10   :  { %7106 = vmatprep.subr.mxu1 %v8517_v49  ;;  %846 = vperm.xlu0 %8325, %v8455_v26   ;;  %v8577_v7 = vand.u32 4294901760, %v270_v61  ;;  %v8584_v9 = vsub.f32 %v44_v47, %v8545_v59  ;;  %v8590_v22 = vand.u32 4294901760, %v42_v4  ;;  %v8593_v23 = vand.u32 4294901760, %v277_v63 }
  0x11   :  { %7107 = vmatpush3.msra.mxu1 %v8517_v49  ;;  %v8580_v8 = vand.u32 4294901760, %v8563_v2  ;;  %7082 = vmatprep.subr.mxu0 %v8483_v36  ;;  %v291_v24 = vsub.f32 %v8534_v55, %v8560_v1  ;;  %v8598_v25 = vand.u32 4294901760, %v8567_v3  ;;  %v8602_v27 = vsub.f32 %v43_v62, %v8586_v10 }
  0x12   :  { %7108 = vmatprep.subr.mxu1 %v8519_v50  ;;  %7083 = vmatpush3.msra.mxu0 %v8483_v36  ;;  %v8607_v28 = vand.u32 4294901760, %v284_v6  ;;  %v8612_v33 = vand.u32 4294901760, %v8584_v9  ;;  %v8616_v37 = vsub.f32 %v42_v4, %v8590_v22  ;;  %vm3476_vm11 = vcmask 31744  }
  0x13   :  { %7109 = vmatpush3.msra.mxu1 %v8519_v50  ;;  %7084 = vmatprep.subr.mxu0 %v8492_v40  ;;  %v298_v32 = vsub.f32 %v8563_v2, %v8580_v8  ;;  %v8621_v38 = vand.u32 4294901760, %v291_v24  ;;  %v305_v39 = vsub.f32 %v8567_v3, %v8598_v25  ;;  %v8626_v45 = vand.u32 4294901760, %v8602_v27 }
  0x14   :  { %7110 = vmatprep.subr.mxu1 %v8548_v60  ;;  %10669 = vst [vmem:[#allocation5_spill] sm:$0xff] %v8607_v28  ;;  %7085 = vmatpush3.msra.mxu0 %v8492_v40  ;;  %v312_v47 = vsub.f32 %v8584_v9, %v8612_v33  ;;  %v8637_v52 = vand.u32 4294901760, %v8616_v37  ;;  %vm4214_vm12 = vcmask 1041409   ;;  %vm6412_vm13 = vcmask 25600  }
  0x15   :  { %7111 = vmatpush3.msra.mxu1 %v8548_v60  ;;  %7086 = vmatprep.subr.mxu0 %v8504_v44  ;;  %10670 = vst [vmem:[#allocation6_spill] sm:$0xff] %v8621_v38  ;;  %v8632_v46 = vand.u32 4294901760, %v298_v32  ;;  %v8643_v61 = vand.u32 4294901760, %v305_v39  ;;  %v319_v62 = vsub.f32 %v8602_v27, %v8626_v45  ;;  %v8676_v32 = vand.u32 127, %v55_v0 }
  0x16   :  { %7112 = vmatprep.subr.mxu1 %v8577_v7  ;;  %7087 = vmatpush3.msra.mxu0 %v8504_v44  ;;  %v8651_v63 = vand.u32 4294901760, %v312_v47  ;;  %v326_v4 = vsub.f32 %v8616_v37, %v8637_v52 }
  0x17   :  { %7113 = vmatpush3.msra.mxu1 %v8577_v7  ;;  %7088 = vmatprep.subr.mxu0 %v8541_v57  ;;  %10671 = vst [vmem:[#allocation7_spill] sm:$0xff] %v8632_v46  ;;  %10672 = vst [vmem:[#allocation8_spill] sm:$0xff] %v8643_v61  ;;  %v8659_v6 = vand.u32 4294901760, %v319_v62  ;;  %v10659_v62 = vmov 0.0  }
  0x18   :  { %7114 = vmatprep.subr.mxu1 %v8593_v23  ;;  %7089 = vmatpush3.msra.mxu0 %v8541_v57  ;;  %10673 = vst [vmem:[#allocation9_spill] sm:$0xff] %v8651_v63  ;;  %v8665_v24 = vand.u32 4294901760, %v326_v4 }
  0x19   :  { %7115 = vmatpush3.msra.mxu1 %v8593_v23  ;;  %7090 = vmatprep.subr.mxu0 %v8543_v58  ;;  %10674 = vst [vmem:[#allocation10_spill] sm:$0xff] %v8659_v6 }
  0x1a   :  { %7116 = vmatprep.subr.mxu1 %v8607_v28  ;;  %7091 = vmatpush3.msra.mxu0 %v8543_v58  ;;  %10675 = vst [vmem:[#allocation11_spill] sm:$0xff] %v8665_v24 }
  0x1b   :  { %7117 = vmatpush3.msra.mxu1 %v8607_v28  ;;  %7092 = vmatprep.subr.mxu0 %v8545_v59 }
  0x1c   :  { %7118 = vmatprep.subr.mxu1 %v8621_v38  ;;  %7093 = vmatpush3.msra.mxu0 %v8545_v59 }
  0x1d   :  { %7119 = vmatpush3.msra.mxu1 %v8621_v38  ;;  %7094 = vmatprep.subr.mxu0 %v8586_v10 }
  0x1e   :  { %7120 = vmatprep.subr.mxu1 %v8632_v46  ;;  %7095 = vmatpush3.msra.mxu0 %v8586_v10 }
  0x1f   :  { %7121 = vmatpush3.msra.mxu1 %v8632_v46  ;;  %7096 = vmatprep.subr.mxu0 %v8590_v22 }
  0x20   :  { %7122 = vmatprep.subr.mxu1 %v8643_v61  ;;  %7097 = vmatpush3.msra.mxu0 %v8590_v22 }
  0x21   :  { %7123 = vmatpush3.msra.mxu1 %v8643_v61  ;;  %7136 = vmatprep.subr.mxu0 %v8436_v19 }
  0x22   :  { %7124 = vmatprep.subr.mxu1 %v8651_v63 }
  0x23   :  { %7125 = vmatpush3.msra.mxu1 %v8651_v63 }
  0x24   :  { %7126 = vmatprep.subr.mxu1 %v8659_v6 }
  0x25   :  { %7127 = vmatpush3.msra.mxu1 %v8659_v6 }
  0x26   :  { %7128 = vmatprep.subr.mxu1 %v8665_v24 }
  0x27   :  { %7129 = vmatpush3.msra.mxu1 %v8665_v24 }
  0x28   :  { %7168 = vmatprep.subr.mxu1 %v8421_v11 }
  0x7a   :  { %v63_v39 = vpop.permute.xlu0 %62 }
  0x7b   :  { %v77_v47 = vpop.permute.xlu1 %76  ;;  %vm85_vm3 = vcmp.eq.s32.totalorder %v63_v39, %v8676_v32 }
  0x7c   :  { %vm87_vm4 = vcmp.eq.s32.totalorder %v77_v47, %v8676_v32  ;;  %v8681_v4 = vsel %vm85_vm3, 1.0, %v10659_v62 }
  0x7d   :  { %v8684_v18 = vsel %vm87_vm4, 1.0, %v10659_v62  ;;  %7130 = vmatprep.mubr.msk.f32.mxu1 %vm97_vm2, %v8681_v4  ;;  %v99_v16 = vsel %vm97_vm2, %v8681_v4, 0 }
  0x7e   :  { %v105_v0 = vsel %vm97_vm2, %v8684_v18, 0  ;;  %v70_v39 = vpop.permute.xlu0 %69  ;;  %v193_v5 = vsub.f32 %v99_v16, %v99_v16 }
  0x7f   :  { %v8692_v17 = vsub.f32 %v105_v0, %v105_v0  ;;  %v84_v47 = vpop.permute.xlu1 %83  ;;  %vm86_vm5 = vcmp.eq.s32.totalorder %v70_v39, %v8676_v32 }
  0x80   :  { %vm88_vm6 = vcmp.eq.s32.totalorder %v84_v47, %v8676_v32  ;;  %v8697_v15 = vsel %vm86_vm5, 1.0, %v10659_v62  ;;  %v194_v24 = vand.u32 4294901760, %v193_v5 }
  0x81   :  { %v8700_v26 = vsel %vm88_vm6, 1.0, %v10659_v62  ;;  %v102_v6 = vsel %vm97_vm2, %v8697_v15, 0  ;;  %7131 = vmatmul.mubr.msk.f32.vlgmr.msra.gmra.mxu1 %vm97_vm2, %v8697_v15  ;;  %v214_v62 = vand.u32 4294901760, %v8692_v17 }
  0x82   :  { %v108_v16 = vsel %vm97_vm2, %v8700_v26, 0  ;;  %v8708_v0 = vsub.f32 %v102_v6, %v102_v6  ;;  %7169 = vmatpush3.msra.mxu1 %v8421_v11  ;;  %7133 = vmatprep.mubr.msk.f32.mxu1 %vm97_vm2, %v8684_v18  ;;  %v195_v47 = vsub.f32 %v193_v5, %v194_v24 }
  0x83   :  { %v8711_v39 = vsub.f32 %v108_v16, %v108_v16  ;;  %7170 = vmatprep.subr.mxu1 %v8423_v12  ;;  %v215_v46 = vsub.f32 %v8692_v17, %v214_v62 }
  0x84   :  { %7171 = vmatpush3.msra.mxu1 %v8423_v12  ;;  %v196_v63 = vand.u32 4294901760, %v195_v47  ;;  %v204_v61 = vand.u32 4294901760, %v8708_v0 }
  0x85   :  { %v224_v6 = vand.u32 4294901760, %v8711_v39  ;;  %7172 = vmatprep.subr.mxu1 %v8425_v13  ;;  %7134 = vmatmul.mubr.msk.f32.gmra.mxu1 %vm97_vm2, %v8700_v26  ;;  %v216_v28 = vand.u32 4294901760, %v215_v46 }
  0x86   :  { %7173 = vmatpush3.msra.mxu1 %v8425_v13  ;;  %7098 = vmatprep.mubr.f32.mxu0 %v196_v63  ;;  %v205_v16 = vsub.f32 %v8708_v0, %v204_v61 }
  0x87   :  { %7174 = vmatprep.subr.mxu1 %v8427_v14  ;;  %7194 = vmatprep.mubr.f32.mxu1 %v194_v24  ;;  %v225_v47 = vsub.f32 %v8711_v39, %v224_v6 }
  0x88   :  { %7175 = vmatpush3.msra.mxu1 %v8427_v14  ;;  %v206_v38 = vand.u32 4294901760, %v205_v16 }
  0x89   :  { %7176 = vmatprep.subr.mxu1 %v8481_v35  ;;  %v226_v63 = vand.u32 4294901760, %v225_v47 }
  0x8a   :  { %7177 = vmatpush3.msra.mxu1 %v8481_v35  ;;  %7099 = vmatmul.mubr.f32.vlgmr.msra.gmra.mxu0 %v206_v38  ;;  %v10683_v38 = vld [vmem:[#allocation11_spill] sm:$0xff] }
  0x8b   :  { %7137 = vmatpush3.msra.mxu0 %v8436_v19  ;;  %7178 = vmatprep.subr.mxu1 %v8483_v36 }
  0x8c   :  { %7138 = vmatprep.subr.mxu0 %v8439_v20  ;;  %7179 = vmatpush3.msra.mxu1 %v8483_v36 }
  0x8d   :  { %7139 = vmatpush3.msra.mxu0 %v8439_v20  ;;  %7180 = vmatprep.subr.mxu1 %v8492_v40 }
  0x8e   :  { %7101 = vmatprep.mubr.f32.mxu0 %v216_v28  ;;  %7140 = vmatprep.subr.mxu0 %v8442_v21 }
  0x8f   :  { %7181 = vmatpush3.msra.mxu1 %v8492_v40  ;;  %7102 = vmatmul.mubr.f32.gmra.mxu0 %v226_v63 }
  0x90   :  { %7141 = vmatpush3.msra.mxu0 %v8442_v21  ;;  %7182 = vmatprep.subr.mxu1 %v8504_v44 }
  0x91   :  { %7142 = vmatprep.subr.mxu0 %v8479_v34  ;;  %7162 = vmatprep.mubr.f32.mxu0 %v193_v5  ;;  %v10676_v5 = vmov 0.0  }
  0x92   :  { %7183 = vmatpush3.msra.mxu1 %v8504_v44  ;;  %7143 = vmatpush3.msra.mxu0 %v8479_v34 }
  0x93   :  { %7184 = vmatprep.subr.mxu1 %v8541_v57  ;;  %7144 = vmatprep.subr.mxu0 %v8498_v42 }
  0x94   :  { %7185 = vmatpush3.msra.mxu1 %v8541_v57  ;;  %7145 = vmatpush3.msra.mxu0 %v8498_v42 }
  0x95   :  { %7186 = vmatprep.subr.mxu1 %v8543_v58  ;;  %7146 = vmatprep.subr.mxu0 %v8501_v43 }
  0x96   :  { %7187 = vmatpush3.msra.mxu1 %v8543_v58  ;;  %7147 = vmatpush3.msra.mxu0 %v8501_v43 }
  0x97   :  { %7188 = vmatprep.subr.mxu1 %v8545_v59  ;;  %7148 = vmatprep.subr.mxu0 %v8522_v51 }
  0x98   :  { %7189 = vmatpush3.msra.mxu1 %v8545_v59  ;;  %7149 = vmatpush3.msra.mxu0 %v8522_v51 }
  0x99   :  { %7190 = vmatprep.subr.mxu1 %v8586_v10  ;;  %7150 = vmatprep.subr.mxu0 %v8534_v55 }
  0x9a   :  { %7191 = vmatpush3.msra.mxu1 %v8586_v10  ;;  %7151 = vmatpush3.msra.mxu0 %v8534_v55 }
  0x9b   :  { %7192 = vmatprep.subr.mxu1 %v8590_v22  ;;  %7152 = vmatprep.subr.mxu0 %v8563_v2 }
  0x9c   :  { %7193 = vmatpush3.msra.mxu1 %v8590_v22  ;;  %7153 = vmatpush3.msra.mxu0 %v8563_v2 }
  0x9d   :  { %7195 = vmatmul.mubr.f32.vlgmr.msra.gmra.mxu1 %v204_v61  ;;  %7232 = vmatprep.subr.mxu1 %v8421_v11 }
  0x9e   :  { %7154 = vmatprep.subr.mxu0 %v8567_v3  ;;  %7197 = vmatprep.mubr.f32.mxu1 %v214_v62 }
  0x9f   :  { %7233 = vmatpush3.msra.mxu1 %v8421_v11  ;;  %7155 = vmatpush3.msra.mxu0 %v8567_v3 }
  0xa0   :  { %7234 = vmatprep.subr.mxu1 %v8423_v12  ;;  %7156 = vmatprep.subr.mxu0 %v8584_v9 }
  0xa1   :  { %7235 = vmatpush3.msra.mxu1 %v8423_v12  ;;  %7157 = vmatpush3.msra.mxu0 %v8584_v9 }
  0xa2   :  { %7198 = vmatmul.mubr.f32.gmra.mxu1 %v224_v6  ;;  %7236 = vmatprep.subr.mxu1 %v8425_v13 }
  0xa3   :  { %7158 = vmatprep.subr.mxu0 %v8602_v27  ;;  %7237 = vmatpush3.msra.mxu1 %v8425_v13 }
  0xa4   :  { %7258 = vmatprep.mubr.msk.f32.mxu1 %vm97_vm2, %v8681_v4  ;;  %7159 = vmatpush3.msra.mxu0 %v8602_v27 }
  0xa5   :  { %7238 = vmatprep.subr.mxu1 %v8427_v14  ;;  %7160 = vmatprep.subr.mxu0 %v8616_v37 }
  0xa6   :  { %7239 = vmatpush3.msra.mxu1 %v8427_v14  ;;  %7161 = vmatpush3.msra.mxu0 %v8616_v37 }
  0xa7   :  { %7240 = vmatprep.subr.mxu1 %v8481_v35  ;;  %7163 = vmatmul.mubr.f32.vlgmr.msra.gmra.mxu0 %v8708_v0 }
  0xa8   :  { %7200 = vmatprep.subr.mxu0 %v8464_v29  ;;  %7241 = vmatpush3.msra.mxu1 %v8481_v35 }
  0xa9   :  { %7165 = vmatprep.mubr.f32.mxu0 %v8692_v17  ;;  %7201 = vmatpush3.msra.mxu0 %v8464_v29  ;;  %v847_v17 = vpop.permute.xlu0 %846 }
  0xaa   :  { %7242 = vmatprep.subr.mxu1 %v8483_v36  ;;  %7202 = vmatprep.subr.mxu0 %v8467_v30  ;;  %vm848_vm7 = vcmp.eq.s32.totalorder %v847_v17, %v8676_v32 }
  0xab   :  { %7243 = vmatpush3.msra.mxu1 %v8483_v36  ;;  %7203 = vmatpush3.msra.mxu0 %v8467_v30 }
  0xac   :  { %7244 = vmatprep.subr.mxu1 %v8492_v40  ;;  %7166 = vmatmul.mubr.f32.gmra.mxu0 %v8711_v39 }
  0xad   :  { %7204 = vmatprep.subr.mxu0 %v8470_v31  ;;  %7245 = vmatpush3.msra.mxu1 %v8492_v40 }
  0xae   :  { %7205 = vmatpush3.msra.mxu0 %v8470_v31  ;;  %7226 = vmatprep.mubr.msk.f32.mxu0 %vm97_vm2, %v8681_v4 }
  0xaf   :  { %7246 = vmatprep.subr.mxu1 %v8504_v44  ;;  %7206 = vmatprep.subr.mxu0 %v8495_v41 }
  0xb0   :  { %7247 = vmatpush3.msra.mxu1 %v8504_v44  ;;  %7207 = vmatpush3.msra.mxu0 %v8495_v41 }
  0xb1   :  { %7248 = vmatprep.subr.mxu1 %v8541_v57  ;;  %7208 = vmatprep.subr.mxu0 %v8528_v53 }
  0xb2   :  { %7249 = vmatpush3.msra.mxu1 %v8541_v57  ;;  %7209 = vmatpush3.msra.mxu0 %v8528_v53 }
  0xb3   :  { %7250 = vmatprep.subr.mxu1 %v8543_v58  ;;  %7210 = vmatprep.subr.mxu0 %v8531_v54 }
  0xb4   :  { %7251 = vmatpush3.msra.mxu1 %v8543_v58  ;;  %7211 = vmatpush3.msra.mxu0 %v8531_v54 }
  0xb5   :  { %7252 = vmatprep.subr.mxu1 %v8545_v59  ;;  %7212 = vmatprep.subr.mxu0 %v8538_v56 }
  0xb6   :  { %7253 = vmatpush3.msra.mxu1 %v8545_v59  ;;  %7213 = vmatpush3.msra.mxu0 %v8538_v56 }
  0xb7   :  { %7254 = vmatprep.subr.mxu1 %v8586_v10  ;;  %7214 = vmatprep.subr.mxu0 %v8560_v1 }
  0xb8   :  { %7255 = vmatpush3.msra.mxu1 %v8586_v10  ;;  %7215 = vmatpush3.msra.mxu0 %v8560_v1 }
  0xb9   :  { %7256 = vmatprep.subr.mxu1 %v8590_v22  ;;  %7216 = vmatprep.subr.mxu0 %v8580_v8 }
  0xba   :  { %7257 = vmatpush3.msra.mxu1 %v8590_v22  ;;  %7217 = vmatpush3.msra.mxu0 %v8580_v8 }
  0xbb   :  { %7259 = vmatmul.mubr.msk.f32.vlgmr.msra.gmra.mxu1 %vm97_vm2, %v8697_v15  ;;  %7293 = vmatprep.subr.mxu1 %v10676_v5 }
  0xbc   :  { %7218 = vmatprep.subr.mxu0 %v8598_v25  ;;  %7261 = vmatprep.mubr.msk.f32.mxu1 %vm97_vm2, %v8684_v18 }
  0xbd   :  { %7294 = vmatpush3.msra.mxu1 %v8515_v48  ;;  %7219 = vmatpush3.msra.mxu0 %v8598_v25  ;;  %v10678_v48 = vld [vmem:[#allocation6_spill] sm:$0xff] }
  0xbe   :  { %7295 = vmatprep.subr.mxu1 %v10676_v5  ;;  %7220 = vmatprep.subr.mxu0 %v8612_v33 }
  0xbf   :  { %7296 = vmatpush3.msra.mxu1 %v8517_v49  ;;  %7221 = vmatpush3.msra.mxu0 %v8612_v33 }
  0xc0   :  { %7262 = vmatmul.mubr.msk.f32.gmra.mxu1 %vm97_vm2, %v8700_v26  ;;  %7297 = vmatprep.subr.mxu1 %v10676_v5 }
  0xc1   :  { %7222 = vmatprep.subr.mxu0 %v8626_v45  ;;  %7298 = vmatpush3.msra.mxu1 %v8519_v50  ;;  %v10680_v50 = vld [vmem:[#allocation8_spill] sm:$0xff] }
  0xc2   :  { %7223 = vmatpush3.msra.mxu0 %v8626_v45  ;;  %7299 = vmatprep.subr.mxu1 %v10676_v5 }
  0xc3   :  { %7224 = vmatprep.subr.mxu0 %v8637_v52  ;;  %7300 = vmatpush3.msra.mxu1 %v8548_v60 }
  0xc4   :  { %7225 = vmatpush3.msra.mxu0 %v8637_v52  ;;  %7301 = vmatprep.subr.mxu1 %v10676_v5 }
  0xc5   :  { %7227 = vmatmul.mubr.msk.f32.vlgmr.msra.gmra.mxu0 %vm97_vm2, %v8697_v15  ;;  %7264 = vmatprep.subr.mxu0 %v10676_v5  ;;  %v10677_v15 = vld [vmem:[#allocation5_spill] sm:$0xff] }
  0xc6   :  { %7302 = vmatpush3.msra.mxu1 %v8577_v7  ;;  %7229 = vmatprep.mubr.msk.f32.mxu0 %vm97_vm2, %v8684_v18  ;;  %v8867_v18 = vsel %vm848_vm7, 1.0, %v10676_v5  ;;  %v10681_v7 = vld [vmem:[#allocation9_spill] sm:$0xff] }
  0xc7   :  { %7265 = vmatpush3.msra.mxu0 %v8421_v11  ;;  %7303 = vmatprep.subr.mxu1 %v10676_v5  ;;  %v852_v49 = vsel %vm97_vm2, %v8867_v18, 0 }
  0xc8   :  { %7266 = vmatprep.subr.mxu0 %v10676_v5  ;;  %7304 = vmatpush3.msra.mxu1 %v8593_v23  ;;  %v8883_v60 = vsub.f32 %v852_v49, %v852_v49  ;;  %v10682_v23 = vld [vmem:[#allocation10_spill] sm:$0xff] }
  0xc9   :  { %7267 = vmatpush3.msra.mxu0 %v8423_v12  ;;  %7305 = vmatprep.subr.mxu1 %v10676_v5 }
  0xca   :  { %7230 = vmatmul.mubr.msk.f32.gmra.mxu0 %vm97_vm2, %v8700_v26  ;;  %7268 = vmatprep.subr.mxu0 %v10676_v5  ;;  %v10679_v26 = vld [vmem:[#allocation7_spill] sm:$0xff]  ;;  %v934_v28 = vand.u32 4294901760, %v8883_v60 }
  0xcb   :  { %7306 = vmatpush3.msra.mxu1 %v10677_v15  ;;  %7269 = vmatpush3.msra.mxu0 %v8425_v13 }
  0xcc   :  { %7307 = vmatprep.subr.mxu1 %v10676_v5  ;;  %7270 = vmatprep.subr.mxu0 %v10676_v5  ;;  %v935_v46 = vsub.f32 %v8883_v60, %v934_v28 }
  0xcd   :  { %7308 = vmatpush3.msra.mxu1 %v10678_v48  ;;  %7271 = vmatpush3.msra.mxu0 %v8427_v14 }
  0xce   :  { %7309 = vmatprep.subr.mxu1 %v10676_v5  ;;  %7272 = vmatprep.subr.mxu0 %v10676_v5  ;;  %v936_v61 = vand.u32 4294901760, %v935_v46 }
  0xcf   :  { %7310 = vmatpush3.msra.mxu1 %v10679_v26  ;;  %7273 = vmatpush3.msra.mxu0 %v8481_v35 }
  0xd0   :  { %7311 = vmatprep.subr.mxu1 %v10676_v5  ;;  %7274 = vmatprep.subr.mxu0 %v10676_v5 }
  0xd1   :  { %7312 = vmatpush3.msra.mxu1 %v10680_v50  ;;  %7275 = vmatpush3.msra.mxu0 %v8483_v36 }
  0xd2   :  { %7313 = vmatprep.subr.mxu1 %v10676_v5  ;;  %7276 = vmatprep.subr.mxu0 %v10676_v5 }
  0xd3   :  { %7314 = vmatpush3.msra.mxu1 %v10681_v7  ;;  %7277 = vmatpush3.msra.mxu0 %v8492_v40 }
  0xd4   :  { %7315 = vmatprep.subr.mxu1 %v10676_v5  ;;  %7278 = vmatprep.subr.mxu0 %v10676_v5 }
  0xd5   :  { %7316 = vmatpush3.msra.mxu1 %v10682_v23  ;;  %7279 = vmatpush3.msra.mxu0 %v8504_v44 }
  0xd6   :  { %7317 = vmatprep.subr.mxu1 %v10676_v5  ;;  %7280 = vmatprep.subr.mxu0 %v10676_v5 }
  0xd7   :  { %7318 = vmatpush3.msra.mxu1 %v10683_v38  ;;  %7319 = vmatprep.mubr.msk.f32.mxu1 %vm8344_vm8, %v10676_v5 }
  0xd8   :  { %7281 = vmatpush3.msra.mxu0 %v8541_v57  ;;  %7320 = vmatmul.mubr.msk.f32.vlgmr.msra.gmra.mxu1 %vm97_vm2, %v8867_v18 }
  0xd9   :  { %7351 = vmatprep.subr.mxu1 %v10676_v5  ;;  %7282 = vmatprep.subr.mxu0 %v10676_v5 }
  0xda   :  { %7352 = vmatpush3.msra.mxu1 %v8421_v11  ;;  %7283 = vmatpush3.msra.mxu0 %v8543_v58 }
  0xdb   :  { %7353 = vmatprep.subr.mxu1 %v10676_v5  ;;  %7284 = vmatprep.subr.mxu0 %v10676_v5 }
  0xdc   :  { %7354 = vmatpush3.msra.mxu1 %v8423_v12  ;;  %7285 = vmatpush3.msra.mxu0 %v8545_v59 }
  0xdd   :  { %7355 = vmatprep.subr.mxu1 %v10676_v5  ;;  %7286 = vmatprep.subr.mxu0 %v10676_v5 }
  0xde   :  { %7356 = vmatpush3.msra.mxu1 %v8425_v13  ;;  %7287 = vmatpush3.msra.mxu0 %v8586_v10 }
  0xdf   :  { %7357 = vmatprep.subr.mxu1 %v10676_v5  ;;  %7288 = vmatprep.subr.mxu0 %v10676_v5 }
  0xe0   :  { %7358 = vmatpush3.msra.mxu1 %v8427_v14  ;;  %7289 = vmatpush3.msra.mxu0 %v8590_v22 }
  0xe1   :  { %7290 = vmatprep.mubr.msk.f32.mxu0 %vm8344_vm8, %v10676_v5  ;;  %7359 = vmatprep.subr.mxu1 %v10676_v5 }
  0xe2   :  { %7291 = vmatmul.mubr.f32.vlgmr.msra.gmra.mxu0 %v936_v61  ;;  %7322 = vmatprep.subr.mxu0 %v10676_v5 }
  0xe3   :  { %7360 = vmatpush3.msra.mxu1 %v8481_v35  ;;  %7323 = vmatpush3.msra.mxu0 %v8436_v19 }
  0xe4   :  { %7361 = vmatprep.subr.mxu1 %v10676_v5  ;;  %7324 = vmatprep.subr.mxu0 %v10676_v5 }
  0xe5   :  { %7362 = vmatpush3.msra.mxu1 %v8483_v36  ;;  %7325 = vmatpush3.msra.mxu0 %v8439_v20  ;;  %v1460_v20 = vld [vmem:[%s10640_s2 + $0x40] sm:$0xff] }
  0xe6   :  { %7363 = vmatprep.subr.mxu1 %v10676_v5  ;;  %7326 = vmatprep.subr.mxu0 %v10676_v5 }
  0xe7   :  { %7364 = vmatpush3.msra.mxu1 %v8492_v40  ;;  %7327 = vmatpush3.msra.mxu0 %v8442_v21 }
  0xe8   :  { %7365 = vmatprep.subr.mxu1 %v10676_v5  ;;  %7328 = vmatprep.subr.mxu0 %v10676_v5 }
  0xe9   :  { %7366 = vmatpush3.msra.mxu1 %v8504_v44  ;;  %7329 = vmatpush3.msra.mxu0 %v8479_v34 }
  0xea   :  { %7367 = vmatprep.subr.mxu1 %v10676_v5  ;;  %7330 = vmatprep.subr.mxu0 %v10676_v5 }
  0xeb   :  { %7368 = vmatpush3.msra.mxu1 %v8541_v57  ;;  %7331 = vmatpush3.msra.mxu0 %v8498_v42 }
  0xec   :  { %7369 = vmatprep.subr.mxu1 %v10676_v5  ;;  %7332 = vmatprep.subr.mxu0 %v10676_v5 }
  0xed   :  { %7370 = vmatpush3.msra.mxu1 %v8543_v58  ;;  %7333 = vmatpush3.msra.mxu0 %v8501_v43 }
  0xee   :  { %7371 = vmatprep.subr.mxu1 %v10676_v5  ;;  %7334 = vmatprep.subr.mxu0 %v10676_v5 }
  0xef   :  { %7372 = vmatpush3.msra.mxu1 %v8545_v59  ;;  %7335 = vmatpush3.msra.mxu0 %v8522_v51 }
  0xf0   :  { %7373 = vmatprep.subr.mxu1 %v10676_v5  ;;  %7336 = vmatprep.subr.mxu0 %v10676_v5 }
  0xf1   :  { %7374 = vmatpush3.msra.mxu1 %v8586_v10  ;;  %7337 = vmatpush3.msra.mxu0 %v8534_v55 }
  0xf2   :  { %7375 = vmatprep.subr.mxu1 %v10676_v5  ;;  %7338 = vmatprep.subr.mxu0 %v10676_v5 }
  0xf3   :  { %7376 = vmatpush3.msra.mxu1 %v8590_v22  ;;  %7377 = vmatprep.mubr.msk.f32.mxu1 %vm8344_vm8, %v10676_v5 }
  0xf4   :  { %7339 = vmatpush3.msra.mxu0 %v8563_v2  ;;  %7378 = vmatmul.mubr.f32.vlgmr.msra.gmra.mxu1 %v934_v28 }
  0xf5   :  { %7409 = vmatprep.subr.mxu1 %v10676_v5  ;;  %7340 = vmatprep.subr.mxu0 %v10676_v5 }
  0xf6   :  { %7410 = vmatpush3.msra.mxu1 %v8421_v11  ;;  %7341 = vmatpush3.msra.mxu0 %v8567_v3  ;;  %v1463_v11 = vld [vmem:[%s10640_s2 + $0x70] sm:$0xff] }
  0xf7   :  { %7411 = vmatprep.subr.mxu1 %v10676_v5  ;;  %7342 = vmatprep.subr.mxu0 %v10676_v5 }
  0xf8   :  { %7412 = vmatpush3.msra.mxu1 %v8423_v12  ;;  %7343 = vmatpush3.msra.mxu0 %v8584_v9  ;;  %v1462_v12 = vld [vmem:[%s10640_s2 + $0x60] sm:$0xff] }
  0xf9   :  { %7413 = vmatprep.subr.mxu1 %v10676_v5  ;;  %7344 = vmatprep.subr.mxu0 %v10676_v5  ;;  %v8997_v19 = vand.u32 4294901760, %v1462_v12 }
  0xfa   :  { %7414 = vmatpush3.msra.mxu1 %v8425_v13  ;;  %7345 = vmatpush3.msra.mxu0 %v8602_v27  ;;  %v8988_v13 = vand.u32 4294901760, %v1463_v11 }
  0xfb   :  { %7415 = vmatprep.subr.mxu1 %v10676_v5  ;;  %7346 = vmatprep.subr.mxu0 %v10676_v5  ;;  %v9019_v34 = vsub.f32 %v1462_v12, %v8997_v19 }
  0xfc   :  { %7416 = vmatpush3.msra.mxu1 %v8427_v14  ;;  %7347 = vmatpush3.msra.mxu0 %v8616_v37  ;;  %v1461_v14 = vld [vmem:[%s10640_s2 + $0x50] sm:$0xff]  ;;  %v9007_v21 = vsub.f32 %v1463_v11, %v8988_v13 }
  0xfd   :  { %7348 = vmatprep.mubr.msk.f32.mxu0 %vm8344_vm8, %v10676_v5  ;;  %7417 = vmatprep.subr.mxu1 %v10676_v5  ;;  %v9046_v43 = vand.u32 4294901760, %v9019_v34 }
  0xfe   :  { %7349 = vmatmul.mubr.f32.vlgmr.msra.gmra.mxu0 %v8883_v60  ;;  %7380 = vmatprep.subr.mxu0 %v10676_v5 }
  0xff   :  { %7418 = vmatpush3.msra.mxu1 %v8481_v35  ;;  %7381 = vmatpush3.msra.mxu0 %v8464_v29  ;;  %v9009_v29 = vand.u32 4294901760, %v1461_v14  ;;  %v9021_v35 = vand.u32 4294901760, %v1460_v20 }
 0x100   :  { %7419 = vmatprep.subr.mxu1 %v10676_v5  ;;  %7382 = vmatprep.subr.mxu0 %v10676_v5 }
 0x101   :  { %7420 = vmatpush3.msra.mxu1 %v8483_v36  ;;  %7383 = vmatpush3.msra.mxu0 %v8467_v30  ;;  %v1459_v30 = vld [vmem:[%s10640_s2 + $0x30] sm:$0xff]  ;;  %v9031_v36 = vand.u32 4294901760, %v9007_v21 }
 0x102   :  { %7421 = vmatprep.subr.mxu1 %v10676_v5  ;;  %7384 = vmatprep.subr.mxu0 %v10676_v5  ;;  %v9036_v42 = vand.u32 4294901760, %v1459_v30 }
 0x103   :  { %7422 = vmatpush3.msra.mxu1 %v8492_v40  ;;  %7385 = vmatpush3.msra.mxu0 %v8470_v31  ;;  %v1458_v31 = vld [vmem:[%s10640_s2 + $0x20] sm:$0xff]  ;;  %v9034_v40 = vsub.f32 %v1461_v14, %v9009_v29  ;;  %v1617_v55 = vsub.f32 %v9007_v21, %v9031_v36 }
 0x104   :  { %7423 = vmatprep.subr.mxu1 %v10676_v5  ;;  %7386 = vmatprep.subr.mxu0 %v10676_v5  ;;  %v9051_v51 = vand.u32 4294901760, %v1458_v31  ;;  %v9066_v2 = vsub.f32 %v1459_v30, %v9036_v42 }
 0x105   :  { %7424 = vmatpush3.msra.mxu1 %v8504_v44  ;;  %7387 = vmatpush3.msra.mxu0 %v8495_v41  ;;  %v1457_v41 = vld [vmem:[%s10640_s2 + $0x10] sm:$0xff]  ;;  %v9049_v44 = vsub.f32 %v1460_v20, %v9021_v35 }
 0x106   :  { %7425 = vmatprep.subr.mxu1 %v10676_v5  ;;  %7388 = vmatprep.subr.mxu0 %v10676_v5  ;;  %v9080_v9 = vsub.f32 %v1458_v31, %v9051_v51  ;;  %v9091_v37 = vand.u32 4294901760, %v9066_v2 }
 0x107   :  { %7426 = vmatpush3.msra.mxu1 %v8541_v57  ;;  %7389 = vmatpush3.msra.mxu0 %v8528_v53  ;;  %v1456_v53 = vld [vmem:[%s10640_s2] sm:$0xff]  ;;  %v9063_v57 = vand.u32 4294901760, %v9034_v40  ;;  %v9077_v3 = vand.u32 4294901760, %v9049_v44 }
 0x108   :  { %7427 = vmatprep.subr.mxu1 %v10676_v5  ;;  %7390 = vmatprep.subr.mxu0 %v10676_v5  ;;  %v9082_v27 = vand.u32 4294901760, %v1456_v53  ;;  %v9105_v32 = vand.u32 4294901760, %v9080_v9 }
 0x109   :  { %7428 = vmatpush3.msra.mxu1 %v8543_v58  ;;  %7391 = vmatpush3.msra.mxu0 %v8531_v54  ;;  %v9068_v58 = vand.u32 4294901760, %v1457_v41  ;;  %v1624_v54 = vsub.f32 %v9019_v34, %v9046_v43 }
 0x10a   :  { %7429 = vmatprep.subr.mxu1 %v10676_v5  ;;  %7392 = vmatprep.subr.mxu0 %v10676_v5  ;;  %v9108_v62 = vsub.f32 %v1456_v53, %v9082_v27  ;;  %v1652_v39 = vsub.f32 %v9080_v9, %v9105_v32 }
 0x10b   :  { %7430 = vmatpush3.msra.mxu1 %v8545_v59  ;;  %7393 = vmatpush3.msra.mxu0 %v8538_v56  ;;  %v1618_v56 = vand.u32 4294901760, %v1617_v55  ;;  %v1631_v59 = vsub.f32 %v9034_v40, %v9063_v57  ;;  %v9094_v24 = vsub.f32 %v1457_v41, %v9068_v58 }
 0x10c   :  { %7431 = vmatprep.subr.mxu1 %v10676_v5  ;;  %7394 = vmatprep.subr.mxu0 %v10676_v5 }
 0x10d   :  { %7432 = vmatpush3.msra.mxu1 %v8586_v10  ;;  %7395 = vmatpush3.msra.mxu0 %v8560_v1  ;;  %v1625_v1 = vand.u32 4294901760, %v1624_v54  ;;  %v1638_v10 = vsub.f32 %v9049_v44, %v9077_v3  ;;  %v9117_v4 = vand.u32 4294901760, %v9094_v24 }
 0x10e   :  { %7433 = vmatprep.subr.mxu1 %v10676_v5  ;;  %7396 = vmatprep.subr.mxu0 %v10676_v5 }
 0x10f   :  { %7434 = vmatpush3.msra.mxu1 %v8590_v22  ;;  %7435 = vmatprep.mubr.msk.f32.mxu1 %vm8344_vm8, %v10676_v5  ;;  %v1645_v22 = vsub.f32 %v9066_v2, %v9091_v37  ;;  %v1639_v0 = vand.u32 4294901760, %v1638_v10  ;;  %v1659_v16 = vsub.f32 %v9094_v24, %v9117_v4 }
 0x110   :  { %7397 = vmatpush3.msra.mxu0 %v8580_v8  ;;  %7436 = vmatmul.mubr.msk.f32.vlgmr.msra.gmra.mxu1 %vm97_vm2, %v8867_v18  ;;  %v1632_v8 = vand.u32 4294901760, %v1631_v59 }
 0x111   :  { %7398 = vmatprep.subr.mxu0 %v10676_v5  ;;  %7406 = vmatprep.mubr.msk.f32.mxu0 %vm8344_vm8, %v10676_v5  ;;  %v1646_v6 = vand.u32 4294901760, %v1645_v22 }
 0x112   :  { %7399 = vmatpush3.msra.mxu0 %v8598_v25  ;;  %7460 = vmatprep.subr.mxu1 %v1618_v56  ;;  %v9124_v25 = vand.u32 4294901760, %v9108_v62 }
 0x113   :  { %7400 = vmatprep.subr.mxu0 %v10676_v5  ;;  %7461 = vmatpush3.msra.mxu1 %v1618_v56 }
 0x114   :  { %7401 = vmatpush3.msra.mxu0 %v8612_v33  ;;  %7462 = vmatprep.subr.mxu1 %v1625_v1  ;;  %v1653_v33 = vand.u32 4294901760, %v1652_v39  ;;  %v1666_v47 = vsub.f32 %v9108_v62, %v9124_v25 }
 0x115   :  { %7402 = vmatprep.subr.mxu0 %v10676_v5  ;;  %7463 = vmatpush3.msra.mxu1 %v1625_v1 }
 0x116   :  { %7403 = vmatpush3.msra.mxu0 %v8626_v45  ;;  %7464 = vmatprep.subr.mxu1 %v1632_v8  ;;  %v1660_v45 = vand.u32 4294901760, %v1659_v16 }
 0x117   :  { %7404 = vmatprep.subr.mxu0 %v10676_v5  ;;  %7465 = vmatpush3.msra.mxu1 %v1632_v8 }
 0x118   :  { %7405 = vmatpush3.msra.mxu0 %v8637_v52  ;;  %7466 = vmatprep.subr.mxu1 %v1639_v0  ;;  %v1667_v52 = vand.u32 4294901760, %v1666_v47 }
 0x119   :  { %7407 = vmatmul.mubr.msk.f32.vlgmr.msra.gmra.mxu0 %vm97_vm2, %v8867_v18  ;;  %7467 = vmatpush3.msra.mxu1 %v1639_v0 }
 0x11a   :  { %7438 = vmatprep.subr.mxu0 %v8988_v13  ;;  %7468 = vmatprep.subr.mxu1 %v1646_v6 }
 0x11b   :  { %7439 = vmatpush3.msra.mxu0 %v8988_v13  ;;  %7469 = vmatpush3.msra.mxu1 %v1646_v6 }
 0x11c   :  { %7440 = vmatprep.subr.mxu0 %v8997_v19  ;;  %7470 = vmatprep.subr.mxu1 %v1653_v33 }
 0x11d   :  { %7441 = vmatpush3.msra.mxu0 %v8997_v19  ;;  %7471 = vmatpush3.msra.mxu1 %v1653_v33 }
 0x11e   :  { %7442 = vmatprep.subr.mxu0 %v9009_v29  ;;  %7472 = vmatprep.subr.mxu1 %v1660_v45 }
 0x11f   :  { %7443 = vmatpush3.msra.mxu0 %v9009_v29  ;;  %7473 = vmatpush3.msra.mxu1 %v1660_v45 }
 0x120   :  { %7444 = vmatprep.subr.mxu0 %v9021_v35  ;;  %7474 = vmatprep.subr.mxu1 %v1667_v52 }
 0x121   :  { %7445 = vmatpush3.msra.mxu0 %v9021_v35  ;;  %7475 = vmatpush3.msra.mxu1 %v1667_v52 }
 0x122   :  { %7446 = vmatprep.subr.mxu0 %v9036_v42  ;;  %7504 = vmatprep.subr.mxu1 %v8988_v13 }
 0x123   :  { %7447 = vmatpush3.msra.mxu0 %v9036_v42 }
 0x124   :  { %7448 = vmatprep.subr.mxu0 %v9051_v51 }
 0x125   :  { %7449 = vmatpush3.msra.mxu0 %v9051_v51 }
 0x126   :  { %7450 = vmatprep.subr.mxu0 %v9068_v58 }
 0x127   :  { %7451 = vmatpush3.msra.mxu0 %v9068_v58 }
 0x128   :  { %7452 = vmatprep.subr.mxu0 %v9082_v27 }
 0x129   :  { %7453 = vmatpush3.msra.mxu0 %v9082_v27 }
 0x12a   :  { %7482 = vmatprep.subr.mxu0 %v9007_v21 }
 0x141   :  { %v7132_v63 = vpop.f32.mrf.mxu1 }
 0x143   :  { %v364_v17 = vpop.f32.mrf.mxu1 }
 0x145   :  { %v7135_v18 = vpop.f32.mrf.mxu1 }
 0x147   :  { %v376_v26 = vpop.f32.mrf.mxu1 }
 0x14a   :  { %v7100_v15 = vpop.f32.mrf.mxu0 }
 0x14b   :  { %v371_v46 = vadd.f32 %v7132_v63, %v7100_v15 }
 0x14c   :  { %v198_v48 = vpop.f32.mrf.mxu0 }
 0x14d   :  { %v365_v11 = vadd.f32 %v364_v17, %v198_v48 }
 0x14f   :  { %v7103_v49 = vpop.f32.mrf.mxu0 }
 0x150   :  { %v383_v31 = vadd.f32 %v7135_v18, %v7103_v49 }
 0x151   :  { %v218_v60 = vpop.f32.mrf.mxu0 }
 0x152   :  { %v377_v55 = vadd.f32 %v376_v26, %v218_v60 }
 0x15d   :  { %v7196_v50 = vpop.f32.mrf.mxu1 }
 0x15f   :  { %v587_v23 = vpop.f32.mrf.mxu1 }
 0x162   :  { %v7199_v38 = vpop.f32.mrf.mxu1 }
 0x164   :  { %v603_v12 = vpop.f32.mrf.mxu1 }
 0x167   :  { %v7164_v7 = vpop.f32.mrf.mxu0 }
 0x168   :  { %v488_v14 = vadd.f32 %v7164_v7, %v371_v46 }
 0x169   :  { %v480_v28 = vpop.f32.mrf.mxu0 }
 0x16a   :  { %v481_v20 = vadd.f32 %v480_v28, %v365_v11  ;;  %v596_v53 = vadd.f32 %v7196_v50, %v488_v14 }
 0x16c   :  { %v7167_v61 = vpop.f32.mrf.mxu0  ;;  %v588_v10 = vadd.f32 %v587_v23, %v481_v20 }
 0x16d   :  { %v502_v54 = vadd.f32 %v7167_v61, %v383_v31 }
 0x16e   :  { %v494_v41 = vpop.f32.mrf.mxu0 }
 0x16f   :  { %v495_v8 = vadd.f32 %v494_v41, %v377_v55  ;;  %v612_v6 = vadd.f32 %v7199_v38, %v502_v54 }
 0x171   :  { %v604_v17 = vadd.f32 %v603_v12, %v495_v8 }
 0x17b   :  { %v7260_v30 = vpop.f32.mrf.mxu1 }
 0x17d   :  { %v823_v59 = vpop.f32.mrf.mxu1 }
 0x180   :  { %v7263_v16 = vpop.f32.mrf.mxu1 }
 0x182   :  { %v835_v60 = vpop.f32.mrf.mxu1 }
 0x185   :  { %v7228_v56 = vpop.f32.mrf.mxu0 }
 0x186   :  { %v728_v1 = vadd.f32 %v7228_v56, %v596_v53 }
 0x187   :  { %v721_v22 = vpop.f32.mrf.mxu0 }
 0x188   :  { %v830_v0 = vadd.f32 %v7260_v30, %v728_v1  ;;  %v722_v39 = vadd.f32 %v721_v22, %v588_v10 }
 0x18a   :  { %v1476_v33 = vsel %vm1471_vm9, %v830_v0, 0  ;;  %v824_v47 = vadd.f32 %v823_v59, %v722_v39  ;;  %v7231_v45 = vpop.f32.mrf.mxu0  ;;  %v2156_v0 = vld [vmem:[%s10640_s2 + $0x68] sm:$0xff] }
 0x18b   :  { %v9155_v52 = vand.u32 4294901760, %v1476_v33  ;;  %v740_v63 = vadd.f32 %v7231_v45, %v612_v6 }
 0x18c   :  { %v1473_v15 = vsel %vm1471_vm9, %v824_v47, 0  ;;  %v733_v18 = vpop.f32.mrf.mxu0  ;;  %v2151_v47 = vld [vmem:[%s10640_s2 + $0x18] sm:$0xff] }
 0x18d   :  { %v9159_v48 = vsub.f32 %v1476_v33, %v9155_v52  ;;  %v9161_v26 = vand.u32 4294901760, %v1473_v15  ;;  %v842_v49 = vadd.f32 %v7263_v16, %v740_v63  ;;  %v734_v50 = vadd.f32 %v733_v18, %v604_v17 }
 0x18f   :  { %v1558_v7 = vsub.f32 %v1473_v15, %v9161_v26  ;;  %v1482_v23 = vsel %vm1471_vm9, %v842_v49, 0  ;;  %v836_v28 = vadd.f32 %v835_v60, %v734_v50  ;;  %7476 = vmatprep.mubr.f32.mxu1 %v9161_v26  ;;  %v1569_v38 = vand.u32 4294901760, %v9159_v48 }
 0x190   :  { %v9167_v46 = vand.u32 4294901760, %v1482_v23  ;;  %7477 = vmatmul.mubr.f32.vlgmr.msra.gmra.mxu1 %v9155_v52  ;;  %v9300_v15 = vand.u32 4294901760, %v2151_v47 }
 0x191   :  { %v1479_v61 = vsel %vm1471_vm9, %v836_v28, 0  ;;  %7505 = vmatpush3.msra.mxu1 %v8988_v13  ;;  %v1559_v11 = vand.u32 4294901760, %v1558_v7  ;;  %v1570_v20 = vsub.f32 %v9159_v48, %v1569_v38 }
 0x192   :  { %v9173_v12 = vsub.f32 %v1482_v23, %v9167_v46  ;;  %v9175_v14 = vand.u32 4294901760, %v1479_v61  ;;  %7506 = vmatprep.subr.mxu1 %v8997_v19  ;;  %v9326_v23 = vsub.f32 %v2151_v47, %v9300_v15  ;;  %v2761_v47 = vld [vmem:[%s10641_s4 + $0x38] sm:$0xff] }
 0x193   :  { %7507 = vmatpush3.msra.mxu1 %v8997_v19  ;;  %v1560_v30 = vsub.f32 %v1558_v7, %v1559_v11  ;;  %v1571_v55 = vand.u32 4294901760, %v1570_v20 }
 0x194   :  { %v9181_v31 = vsub.f32 %v1479_v61, %v9175_v14  ;;  %7479 = vmatprep.mubr.f32.mxu1 %v9175_v14  ;;  %7508 = vmatprep.subr.mxu1 %v9009_v29  ;;  %v1589_v41 = vand.u32 4294901760, %v9173_v12 }
 0x195   :  { %7480 = vmatmul.mubr.f32.gmra.mxu1 %v9167_v46  ;;  %v1561_v53 = vand.u32 4294901760, %v1560_v30 }
 0x196   :  { %7509 = vmatpush3.msra.mxu1 %v9009_v29  ;;  %7520 = vmatprep.mubr.f32.mxu1 %v1559_v11  ;;  %v1579_v54 = vand.u32 4294901760, %v9181_v31  ;;  %v1590_v1 = vsub.f32 %v9173_v12, %v1589_v41  ;;  %v2312_v11 = vand.u32 4294901760, %v9326_v23 }
 0x197   :  { %7510 = vmatprep.subr.mxu1 %v9021_v35  ;;  %7454 = vmatprep.mubr.f32.mxu0 %v1561_v53 }
 0x198   :  { %v9190_v56 = vpop.f32.mrf.mxu1  ;;  %7511 = vmatpush3.msra.mxu1 %v9021_v35  ;;  %7455 = vmatmul.mubr.f32.vlgmr.msra.gmra.mxu0 %v1571_v55  ;;  %v1580_v59 = vsub.f32 %v9181_v31, %v1579_v54  ;;  %v1591_v22 = vand.u32 4294901760, %v1590_v1 }
 0x199   :  { %7512 = vmatprep.subr.mxu1 %v9036_v42  ;;  %7483 = vmatpush3.msra.mxu0 %v9007_v21 }
 0x19a   :  { %v7321_v10 = vpop.f32.mrf.mxu1  ;;  %7513 = vmatpush3.msra.mxu1 %v9036_v42  ;;  %7484 = vmatprep.subr.mxu0 %v9019_v34  ;;  %v1581_v8 = vand.u32 4294901760, %v1580_v59 }
 0x19b   :  { %7514 = vmatprep.subr.mxu1 %v9051_v51  ;;  %7485 = vmatpush3.msra.mxu0 %v9019_v34  ;;  %v2157_v34 = vld [vmem:[%s10640_s2 + $0x78] sm:$0xff] }
 0x19c   :  { %7515 = vmatpush3.msra.mxu1 %v9051_v51  ;;  %7457 = vmatprep.mubr.f32.mxu0 %v1581_v8 }
 0x19d   :  { %7486 = vmatprep.subr.mxu0 %v9034_v40  ;;  %7516 = vmatprep.subr.mxu1 %v9068_v58 }
 0x19e   :  { %7458 = vmatmul.mubr.f32.gmra.mxu0 %v1591_v22  ;;  %7517 = vmatpush3.msra.mxu1 %v9068_v58 }
 0x19f   :  { %7487 = vmatpush3.msra.mxu0 %v9034_v40  ;;  %7498 = vmatprep.mubr.f32.mxu0 %v1558_v7 }
 0x1a0   :  { %7488 = vmatprep.subr.mxu0 %v9049_v44  ;;  %7518 = vmatprep.subr.mxu1 %v9082_v27 }
 0x1a1   :  { %7489 = vmatpush3.msra.mxu0 %v9049_v44  ;;  %7519 = vmatpush3.msra.mxu1 %v9082_v27  ;;  %v9221_v44 = vand.u32 4294901760, %v2157_v34 }
 0x1a2   :  { %v9210_v21 = vpop.f32.mrf.mxu0  ;;  %7490 = vmatprep.subr.mxu0 %v9066_v2  ;;  %7521 = vmatmul.mubr.f32.vlgmr.msra.gmra.mxu1 %v1569_v38 }
 0x1a3   :  { %7548 = vmatprep.subr.mxu1 %v8988_v13  ;;  %7491 = vmatpush3.msra.mxu0 %v9066_v2  ;;  %v9234_v2 = vand.u32 4294901760, %v2156_v0  ;;  %v1075_v55 = vadd.f32 %v9190_v56, %v9210_v21 }
 0x1a4   :  { %7523 = vmatprep.mubr.f32.mxu1 %v1579_v54  ;;  %7549 = vmatpush3.msra.mxu1 %v8988_v13  ;;  %v7292_v40 = vpop.f32.mrf.mxu0  ;;  %v2155_v13 = vld [vmem:[%s10640_s2 + $0x58] sm:$0xff] }
 0x1a5   :  { %7492 = vmatprep.subr.mxu0 %v9080_v9  ;;  %7550 = vmatprep.subr.mxu1 %v8997_v19  ;;  %v9246_v39 = vand.u32 4294901760, %v2155_v13 }
 0x1a6   :  { %7493 = vmatpush3.msra.mxu0 %v9080_v9  ;;  %7551 = vmatpush3.msra.mxu1 %v8997_v19  ;;  %v9239_v9 = vsub.f32 %v2157_v34, %v9221_v44  ;;  %v2154_v19 = vld [vmem:[%s10640_s2 + $0x48] sm:$0xff] }
 0x1a7   :  { %7494 = vmatprep.subr.mxu0 %v9094_v24  ;;  %7524 = vmatmul.mubr.f32.gmra.mxu1 %v1589_v41  ;;  %v9258_v6 = vand.u32 4294901760, %v2154_v19  ;;  %v9269_v16 = vsub.f32 %v2155_v13, %v9246_v39 }
 0x1a8   :  { %7552 = vmatprep.subr.mxu1 %v9009_v29  ;;  %7495 = vmatpush3.msra.mxu0 %v9094_v24  ;;  %v9256_v24 = vsub.f32 %v2156_v0, %v9234_v2 }
 0x1a9   :  { %7553 = vmatpush3.msra.mxu1 %v9009_v29  ;;  %7564 = vmatprep.mubr.f32.mxu1 %v9161_v26  ;;  %v2153_v29 = vld [vmem:[%s10640_s2 + $0x38] sm:$0xff] }
 0x1aa   :  { %7496 = vmatprep.subr.mxu0 %v9108_v62  ;;  %7554 = vmatprep.subr.mxu1 %v9021_v35  ;;  %v9271_v33 = vand.u32 4294901760, %v2153_v29 }
 0x1ab   :  { %7497 = vmatpush3.msra.mxu0 %v9108_v62  ;;  %7555 = vmatpush3.msra.mxu1 %v9021_v35  ;;  %v2270_v62 = vand.u32 4294901760, %v9239_v9  ;;  %v2152_v35 = vld [vmem:[%s10640_s2 + $0x28] sm:$0xff] }
 0x1ac   :  { %7499 = vmatmul.mubr.f32.vlgmr.msra.gmra.mxu0 %v9159_v48  ;;  %7526 = vmatprep.subr.mxu0 %v9031_v36  ;;  %v9284_v45 = vand.u32 4294901760, %v2152_v35  ;;  %v9298_v17 = vsub.f32 %v2153_v29, %v9271_v33  ;;  %v10686_v29 = vld [vmem:[#allocation2_spill] sm:$0xff] }
 0x1ad   :  { %7556 = vmatprep.subr.mxu1 %v9036_v42  ;;  %7501 = vmatprep.mubr.f32.mxu0 %v9181_v31  ;;  %v2271_v63 = vsub.f32 %v9239_v9, %v2270_v62  ;;  %v2313_v31 = vsub.f32 %v9326_v23, %v2312_v11 }
 0x1ae   :  { %7527 = vmatpush3.msra.mxu0 %v9031_v36  ;;  %7557 = vmatpush3.msra.mxu1 %v9036_v42  ;;  %v2277_v36 = vand.u32 4294901760, %v9256_v24  ;;  %v9282_v42 = vsub.f32 %v2154_v19, %v9258_v6  ;;  %v9313_v49 = vsub.f32 %v2152_v35, %v9284_v45  ;;  %v2298_v7 = vand.u32 4294901760, %v9298_v17 }
 0x1af   :  { %7528 = vmatprep.subr.mxu0 %v9046_v43  ;;  %7558 = vmatprep.subr.mxu1 %v9051_v51  ;;  %v2314_v53 = vand.u32 4294901760, %v2313_v31 }
 0x1b0   :  { %7529 = vmatpush3.msra.mxu0 %v9046_v43  ;;  %7559 = vmatpush3.msra.mxu1 %v9051_v51  ;;  %v2150_v43 = vld [vmem:[%s10640_s2 + $0x8] sm:$0xff]  ;;  %v2284_v51 = vand.u32 4294901760, %v9269_v16  ;;  %v2291_v48 = vand.u32 4294901760, %v9282_v42  ;;  %v2305_v28 = vand.u32 4294901760, %v9313_v49  ;;  %v2299_v61 = vsub.f32 %v9298_v17, %v2298_v7 }
 0x1b1   :  { %7502 = vmatmul.mubr.f32.gmra.mxu0 %v9173_v12  ;;  %7530 = vmatprep.subr.mxu0 %v9063_v57  ;;  %v9315_v50 = vand.u32 4294901760, %v2150_v43 }
 0x1b2   :  { %7560 = vmatprep.subr.mxu1 %v9068_v58  ;;  %7531 = vmatpush3.msra.mxu0 %v9063_v57  ;;  %v2278_v57 = vsub.f32 %v9256_v24, %v2277_v36  ;;  %v2285_v60 = vsub.f32 %v9269_v16, %v2284_v51  ;;  %v2306_v12 = vsub.f32 %v9313_v49, %v2305_v28 }
 0x1b3   :  { %7542 = vmatprep.mubr.f32.mxu0 %v9161_v26  ;;  %7561 = vmatpush3.msra.mxu1 %v9068_v58  ;;  %v2272_v58 = vand.u32 4294901760, %v2271_v63  ;;  %v9337_v38 = vsub.f32 %v2150_v43, %v9315_v50  ;;  %v2759_v43 = vld [vmem:[%s10641_s4 + $0x28] sm:$0xff] }
 0x1b4   :  { %7532 = vmatprep.subr.mxu0 %v9077_v3  ;;  %7562 = vmatprep.subr.mxu1 %v9082_v27  ;;  %v9306_v18 = vpop.f32.mrf.mxu1 }
 0x1b5   :  { %7533 = vmatpush3.msra.mxu0 %v9077_v3  ;;  %7563 = vmatpush3.msra.mxu1 %v9082_v27  ;;  %v2279_v3 = vand.u32 4294901760, %v2278_v57  ;;  %v2292_v27 = vsub.f32 %v9282_v42, %v2291_v48  ;;  %v2319_v20 = vand.u32 4294901760, %v9337_v38 }
 0x1b6   :  { %7534 = vmatprep.subr.mxu0 %v9091_v37  ;;  %7565 = vmatmul.mubr.f32.vlgmr.msra.gmra.mxu1 %v9155_v52  ;;  %v7379_v26 = vpop.f32.mrf.mxu1 }
 0x1b7   :  { %7535 = vmatpush3.msra.mxu0 %v9091_v37  ;;  %7567 = vmatprep.mubr.f32.mxu1 %v9175_v14  ;;  %v2286_v37 = vand.u32 4294901760, %v2285_v60 }
 0x1b8   :  { %7536 = vmatprep.subr.mxu0 %v9105_v32  ;;  %7589 = vmatprep.subr.mxu1 %v10676_v5 }
 0x1b9   :  { %7537 = vmatpush3.msra.mxu0 %v9105_v32  ;;  %7590 = vmatpush3.msra.mxu1 %v2272_v58  ;;  %v2293_v32 = vand.u32 4294901760, %v2292_v27  ;;  %v2757_v58 = vld [vmem:[%s10641_s4 + $0x18] sm:$0xff]  ;;  %v2756_v27 = vld [vmem:[%s10641_s4 + $0x10] sm:$0xff] }
 0x1ba   :  { %7538 = vmatprep.subr.mxu0 %v9117_v4  ;;  %7568 = vmatmul.mubr.f32.gmra.mxu1 %v9167_v46 }
 0x1bb   :  { %7539 = vmatpush3.msra.mxu0 %v9117_v4  ;;  %7591 = vmatprep.subr.mxu1 %v10676_v5  ;;  %v2300_v4 = vand.u32 4294901760, %v2299_v61 }
 0x1bc   :  { %7540 = vmatprep.subr.mxu0 %v9124_v25  ;;  %7592 = vmatpush3.msra.mxu1 %v2279_v3  ;;  %v9543_v3 = vand.u32 4294901760, %v2757_v58 }
 0x1bd   :  { %7541 = vmatpush3.msra.mxu0 %v9124_v25  ;;  %7593 = vmatprep.subr.mxu1 %v10676_v5  ;;  %v2307_v25 = vand.u32 4294901760, %v2306_v12 }
 0x1be   :  { %7543 = vmatmul.mubr.f32.vlgmr.msra.gmra.mxu0 %v9155_v52  ;;  %v1172_v30 = vpop.f32.mrf.mxu0  ;;  %7594 = vmatpush3.msra.mxu1 %v2286_v37  ;;  %v2320_v52 = vsub.f32 %v9337_v38, %v2319_v20  ;;  %v9551_v37 = vand.u32 4294901760, %v2756_v27 }
 0x1bf   :  { %7545 = vmatprep.mubr.f32.mxu0 %v9175_v14  ;;  %7595 = vmatprep.subr.mxu1 %v10676_v5  ;;  %v1173_v59 = vadd.f32 %v1172_v30, %v1075_v55 }
 0x1c0   :  { %v7350_v41 = vpop.f32.mrf.mxu0  ;;  %7596 = vmatpush3.msra.mxu1 %v2293_v32  ;;  %7570 = vmatprep.subr.mxu0 %v10676_v5  ;;  %v2321_v14 = vand.u32 4294901760, %v2320_v52  ;;  %v2755_v32 = vld [vmem:[%s10641_s4 + $0x8] sm:$0xff] }
 0x1c1   :  { %7597 = vmatprep.subr.mxu1 %v10676_v5  ;;  %7571 = vmatpush3.msra.mxu0 %v9221_v44  ;;  %v1259_v1 = vadd.f32 %v9306_v18, %v1173_v59  ;;  %v2758_v18 = vld [vmem:[%s10641_s4 + $0x20] sm:$0xff]  ;;  %v9566_v30 = vand.u32 4294901760, %v2755_v32 }
 0x1c2   :  { %7546 = vmatmul.mubr.f32.gmra.mxu0 %v9167_v46  ;;  %7598 = vmatpush3.msra.mxu1 %v2300_v4  ;;  %v2754_v41 = vld [vmem:[%s10641_s4] sm:$0xff] }
 0x1c3   :  { %7572 = vmatprep.subr.mxu0 %v10676_v5  ;;  %7599 = vmatprep.subr.mxu1 %v10676_v5  ;;  %v9582_v52 = vsub.f32 %v2755_v32, %v9566_v30 }
 0x1c4   :  { %7573 = vmatpush3.msra.mxu0 %v9234_v2  ;;  %7600 = vmatpush3.msra.mxu1 %v2307_v25 }
 0x1c5   :  { %7574 = vmatprep.subr.mxu0 %v10676_v5  ;;  %7601 = vmatprep.subr.mxu1 %v10676_v5 }
 0x1c6   :  { %7575 = vmatpush3.msra.mxu0 %v9246_v39  ;;  %7602 = vmatpush3.msra.mxu1 %v2314_v53  ;;  %v9584_v53 = vand.u32 4294901760, %v2754_v41 }
 0x1c7   :  { %7576 = vmatprep.subr.mxu0 %v10676_v5  ;;  %7603 = vmatprep.subr.mxu1 %v10676_v5 }
 0x1c8   :  { %7577 = vmatpush3.msra.mxu0 %v9258_v6  ;;  %7604 = vmatpush3.msra.mxu1 %v2321_v14  ;;  %v9596_v59 = vsub.f32 %v2754_v41, %v9584_v53 }
 0x1c9   :  { %7578 = vmatprep.subr.mxu0 %v10676_v5  ;;  %7605 = vmatprep.mubr.msk.f32.mxu1 %vm8344_vm8, %v10676_v5 }
 0x1ca   :  { %7627 = vmatprep.subr.mxu1 %v10676_v5  ;;  %7579 = vmatpush3.msra.mxu0 %v9271_v33 }
 0x1cb   :  { %7580 = vmatprep.subr.mxu0 %v10676_v5  ;;  %7586 = vmatprep.mubr.msk.f32.mxu0 %vm8344_vm8, %v10676_v5 }
 0x1cc   :  { %7581 = vmatpush3.msra.mxu0 %v9284_v45 }
 0x1cd   :  { %7582 = vmatprep.subr.mxu0 %v10676_v5 }
 0x1ce   :  { %7583 = vmatpush3.msra.mxu0 %v9300_v15 }
 0x1cf   :  { %7584 = vmatprep.subr.mxu0 %v10676_v5 }
 0x1d0   :  { %v1452_v46 = vpop.f32.mrf.mxu1  ;;  %7585 = vmatpush3.msra.mxu0 %v9315_v50 }
 0x1d1   :  { %7608 = vmatprep.subr.mxu0 %v10676_v5 }
 0x1d2   :  { %v7437_v54 = vpop.f32.mrf.mxu1 }
 0x1d3   :  { %v9593_v54 = vand.u32 4294901760, %v9582_v52 }
 0x1d9   :  { %v1368_v10 = vpop.f32.mrf.mxu0 }
 0x1da   :  { %v1369_v8 = vadd.f32 %v1368_v10, %v1259_v1 }
 0x1db   :  { %v7408_v22 = vpop.f32.mrf.mxu0 }
 0x1dc   :  { %v1453_v34 = vadd.f32 %v1452_v46, %v1369_v8  ;;  %v2949_v8 = vsub.f32 %v9582_v52, %v9593_v54  ;;  %v9603_v22 = vand.u32 4294901760, %v9596_v59 }
 0x1de   :  { %v2166_v40 = vsel %vm1471_vm9, %v1453_v34, 0  ;;  %v2950_v34 = vand.u32 4294901760, %v2949_v8 }
 0x1df   :  { %v9395_v0 = vand.u32 4294901760, %v2166_v40 }
 0x1e1   :  { %v2242_v13 = vsub.f32 %v2166_v40, %v9395_v0  ;;  %7606 = vmatmul.mubr.f32.vlgmr.msra.gmra.mxu1 %v9395_v0  ;;  %v2956_v40 = vsub.f32 %v9596_v59, %v9603_v22 }
 0x1e2   :  { %7628 = vmatpush3.msra.mxu1 %v9221_v44  ;;  %7643 = vmatprep.mubr.msk.f32.mxu1 %vm8344_vm8, %v10676_v5 }
 0x1e3   :  { %v2243_v56 = vand.u32 4294901760, %v2242_v13  ;;  %7629 = vmatprep.subr.mxu1 %v10676_v5 }
 0x1e4   :  { %7630 = vmatpush3.msra.mxu1 %v9234_v2 }
 0x1e5   :  { %v2244_v21 = vsub.f32 %v2242_v13, %v2243_v56  ;;  %7631 = vmatprep.subr.mxu1 %v10676_v5 }
 0x1e6   :  { %7632 = vmatpush3.msra.mxu1 %v9246_v39 }
 0x1e7   :  { %v2245_v19 = vand.u32 4294901760, %v2244_v21  ;;  %7633 = vmatprep.subr.mxu1 %v10676_v5 }
 0x1e8   :  { %7634 = vmatpush3.msra.mxu1 %v9258_v6 }
 0x1e9   :  { %7635 = vmatprep.subr.mxu1 %v10676_v5  ;;  %7587 = vmatmul.mubr.f32.vlgmr.msra.gmra.mxu0 %v2245_v19 }
 0x1ea   :  { %7609 = vmatpush3.msra.mxu0 %v9239_v9  ;;  %7636 = vmatpush3.msra.mxu1 %v9271_v33  ;;  %v10685_v9 = vld [vmem:[#allocation3_spill] sm:$0xff] }
 0x1eb   :  { %7610 = vmatprep.subr.mxu0 %v10676_v5  ;;  %7637 = vmatprep.subr.mxu1 %v10676_v5 }
 0x1ec   :  { %7611 = vmatpush3.msra.mxu0 %v9256_v24  ;;  %7638 = vmatpush3.msra.mxu1 %v9284_v45  ;;  %v10687_v24 = vsub.s32 1, %v10686_v29 }
 0x1ed   :  { %7612 = vmatprep.subr.mxu0 %v10676_v5  ;;  %7639 = vmatprep.subr.mxu1 %v10676_v5 }
 0x1ee   :  { %7613 = vmatpush3.msra.mxu0 %v9269_v16  ;;  %7640 = vmatpush3.msra.mxu1 %v9300_v15  ;;  %v10689_v16 = vsub.s32 3, %v10686_v29 }
 0x1ef   :  { %7614 = vmatprep.subr.mxu0 %v10676_v5  ;;  %7641 = vmatprep.subr.mxu1 %v10676_v5 }
 0x1f0   :  { %7615 = vmatpush3.msra.mxu0 %v9282_v42  ;;  %7642 = vmatpush3.msra.mxu1 %v9315_v50  ;;  %v2760_v42 = vld [vmem:[%s10641_s4 + $0x30] sm:$0xff] }
 0x1f1   :  { %7616 = vmatprep.subr.mxu0 %v10676_v5  ;;  %7644 = vmatmul.mubr.f32.vlgmr.msra.gmra.mxu1 %v2243_v56  ;;  %v9499_v63 = vand.u32 4294901760, %v2760_v42 }
 0x1f2   :  { %7665 = vmatprep.subr.mxu1 %v10676_v5  ;;  %7617 = vmatpush3.msra.mxu0 %v9298_v17 }
 0x1f3   :  { %7666 = vmatpush3.msra.mxu1 %v9221_v44  ;;  %7618 = vmatprep.subr.mxu0 %v10676_v5  ;;  %v10684_v44 = vld [vmem:[#allocation4_spill] sm:$0xff]  ;;  %v9510_v17 = vsub.f32 %v2760_v42, %v9499_v63 }
 0x1f4   :  { %7667 = vmatprep.subr.mxu1 %v10676_v5  ;;  %7619 = vmatpush3.msra.mxu0 %v9313_v49  ;;  %vm40_vm10 = vcmp.eq.s32.totalorder %v10684_v44, 0 }
 0x1f5   :  { %7668 = vmatpush3.msra.mxu1 %v9234_v2  ;;  %7620 = vmatprep.subr.mxu0 %v10676_v5  ;;  %v41_v2 = vsel %vm40_vm10, -10000.0, %v10676_v5 }
 0x1f6   :  { %7669 = vmatprep.subr.mxu1 %v10676_v5  ;;  %7621 = vmatpush3.msra.mxu0 %v9326_v23 }
 0x1f7   :  { %7670 = vmatpush3.msra.mxu1 %v9246_v39  ;;  %7622 = vmatprep.subr.mxu0 %v10676_v5  ;;  %v3447_v39 = vrot.slane %v41_v2, %v10685_v9 }
 0x1f8   :  { %7671 = vmatprep.subr.mxu1 %v10676_v5  ;;  %7623 = vmatpush3.msra.mxu0 %v9337_v38 }
 0x1f9   :  { %7624 = vmatprep.mubr.msk.f32.mxu0 %vm8344_vm8, %v10676_v5  ;;  %7672 = vmatpush3.msra.mxu1 %v9258_v6  ;;  %v3454_v6 = vrot.slane %v41_v2, %v10687_v24 }
 0x1fa   :  { %7625 = vmatmul.mubr.f32.vlgmr.msra.gmra.mxu0 %v2242_v13  ;;  %7646 = vmatprep.subr.mxu0 %v10676_v5 }
 0x1fb   :  { %7673 = vmatprep.subr.mxu1 %v10676_v5  ;;  %7647 = vmatpush3.msra.mxu0 %v2270_v62  ;;  %v10688_v62 = vsub.s32 2, %v10686_v29 }
 0x1fc   :  { %7674 = vmatpush3.msra.mxu1 %v9271_v33  ;;  %7648 = vmatprep.subr.mxu0 %v10676_v5  ;;  %v3468_v33 = vrot.slane %v41_v2, %v10689_v16 }
 0x1fd   :  { %7675 = vmatprep.subr.mxu1 %v10676_v5  ;;  %7649 = vmatpush3.msra.mxu0 %v2277_v36  ;;  %v3461_v35 = vrot.slane %v41_v2, %v10688_v62  ;;  %v9491_v36 = vand.u32 4294901760, %v2761_v47 }
 0x1fe   :  { %7676 = vmatpush3.msra.mxu1 %v9284_v45  ;;  %7650 = vmatprep.subr.mxu0 %v10676_v5 }
 0x1ff   :  { %7677 = vmatprep.subr.mxu1 %v10676_v5  ;;  %7651 = vmatpush3.msra.mxu0 %v2284_v51  ;;  %v9497_v45 = vsub.f32 %v2761_v47, %v9491_v36  ;;  %v6438_v47 = vld [vmem:[%s10642_s3] ss:$0 sm:$0xff] }
 0x200   :  { %7678 = vmatpush3.msra.mxu1 %v9300_v15  ;;  %7652 = vmatprep.subr.mxu0 %v10676_v5  ;;  %v9512_v15 = vand.u32 4294901760, %v2759_v43 }
 0x201   :  { %7679 = vmatprep.subr.mxu1 %v10676_v5  ;;  %7653 = vmatpush3.msra.mxu0 %v2291_v48  ;;  %v9507_v51 = vand.u32 4294901760, %v9497_v45  ;;  %v9522_v48 = vand.u32 4294901760, %v9510_v17 }
 0x202   :  { %7680 = vmatpush3.msra.mxu1 %v9315_v50  ;;  %7681 = vmatprep.mubr.msk.f32.mxu1 %vm8344_vm8, %v10676_v5  ;;  %v9525_v49 = vsub.f32 %v2759_v43, %v9512_v15  ;;  %v9527_v50 = vand.u32 4294901760, %v2758_v18 }
 0x203   :  { %7654 = vmatprep.subr.mxu0 %v10676_v5  ;;  %7682 = vmatmul.mubr.f32.vlgmr.msra.gmra.mxu1 %v9395_v0  ;;  %v2907_v57 = vsub.f32 %v9497_v45, %v9507_v51  ;;  %v2914_v60 = vsub.f32 %v9510_v17, %v9522_v48 }
 0x204   :  { %7655 = vmatpush3.msra.mxu0 %v2298_v7  ;;  %7662 = vmatprep.mubr.msk.f32.mxu0 %vm8344_vm8, %v10676_v5  ;;  %v9537_v7 = vand.u32 4294901760, %v9525_v49  ;;  %v9541_v23 = vsub.f32 %v2758_v18, %v9527_v50 }
 0x205   :  { %7656 = vmatprep.subr.mxu0 %v10676_v5  ;;  %3449 = vbcast.lane.b32.xlu1 %v3447_v39, 256  ;;  %v2908_v26 = vand.u32 4294901760, %v2907_v57 }
 0x206   :  { %7657 = vmatpush3.msra.mxu0 %v2305_v28  ;;  %3463 = vbcast.lane.b32.xlu0 %v3461_v35, 256  ;;  %v2915_v28 = vand.u32 4294901760, %v2914_v60  ;;  %v2921_v38 = vsub.f32 %v9525_v49, %v9537_v7  ;;  %v9554_v61 = vand.u32 4294901760, %v9541_v23 }
 0x207   :  { %7658 = vmatprep.subr.mxu0 %v10676_v5  ;;  %7706 = vmatprep.subr.mxu1 %v2908_v26 }
 0x208   :  { %7659 = vmatpush3.msra.mxu0 %v2312_v11  ;;  %7707 = vmatpush3.msra.mxu1 %v2908_v26  ;;  %v9557_v11 = vsub.f32 %v2757_v58, %v9543_v3  ;;  %v2922_v12 = vand.u32 4294901760, %v2921_v38  ;;  %v2928_v4 = vsub.f32 %v9541_v23, %v9554_v61 }
 0x209   :  { %7660 = vmatprep.subr.mxu0 %v10676_v5  ;;  %3456 = vbcast.lane.b32.xlu1 %v3454_v6, 256 }
 0x20a   :  { %7661 = vmatpush3.msra.mxu0 %v2319_v20  ;;  %7708 = vmatprep.subr.mxu1 %v2915_v28  ;;  %v9564_v20 = vsub.f32 %v2756_v27, %v9551_v37  ;;  %v9572_v31 = vand.u32 4294901760, %v9557_v11  ;;  %v2929_v14 = vand.u32 4294901760, %v2928_v4 }
 0x20b   :  { %7663 = vmatmul.mubr.f32.vlgmr.msra.gmra.mxu0 %v9395_v0  ;;  %7684 = vmatprep.subr.mxu0 %v9491_v36  ;;  %v2957_v0 = vand.u32 4294901760, %v2956_v40 }
 0x20c   :  { %7685 = vmatpush3.msra.mxu0 %v9491_v36  ;;  %7709 = vmatpush3.msra.mxu1 %v2915_v28  ;;  %v9579_v25 = vand.u32 4294901760, %v9564_v20  ;;  %v2935_v46 = vsub.f32 %v9557_v11, %v9572_v31 }
 0x20d   :  { %3470 = vbcast.lane.b32.xlu1 %v3468_v33, 256  ;;  %7686 = vmatprep.subr.mxu0 %v9499_v63 }
 0x20e   :  { %7687 = vmatpush3.msra.mxu0 %v9499_v63  ;;  %7710 = vmatprep.subr.mxu1 %v2922_v12  ;;  %v2942_v55 = vsub.f32 %v9564_v20, %v9579_v25  ;;  %v2936_v1 = vand.u32 4294901760, %v2935_v46 }
 0x20f   :  { %7688 = vmatprep.subr.mxu0 %v9512_v15  ;;  %7711 = vmatpush3.msra.mxu1 %v2922_v12 }
 0x210   :  { %7689 = vmatpush3.msra.mxu0 %v9512_v15  ;;  %7712 = vmatprep.subr.mxu1 %v2929_v14  ;;  %v2943_v10 = vand.u32 4294901760, %v2942_v55 }
 0x211   :  { %7690 = vmatprep.subr.mxu0 %v9527_v50  ;;  %7713 = vmatpush3.msra.mxu1 %v2929_v14 }
 0x212   :  { %7691 = vmatpush3.msra.mxu0 %v9527_v50  ;;  %7714 = vmatprep.subr.mxu1 %v2936_v1 }
 0x213   :  { %7692 = vmatprep.subr.mxu0 %v9543_v3  ;;  %7715 = vmatpush3.msra.mxu1 %v2936_v1 }
 0x214   :  { %7693 = vmatpush3.msra.mxu0 %v9543_v3  ;;  %7716 = vmatprep.subr.mxu1 %v2943_v10 }
 0x215   :  { %7694 = vmatprep.subr.mxu0 %v9551_v37  ;;  %7717 = vmatpush3.msra.mxu1 %v2943_v10 }
 0x216   :  { %7695 = vmatpush3.msra.mxu0 %v9551_v37  ;;  %7718 = vmatprep.subr.mxu1 %v2950_v34 }
 0x217   :  { %7696 = vmatprep.subr.mxu0 %v9566_v30  ;;  %7719 = vmatpush3.msra.mxu1 %v2950_v34 }
 0x218   :  { %7697 = vmatpush3.msra.mxu0 %v9566_v30  ;;  %7720 = vmatprep.subr.mxu1 %v2957_v0 }
 0x219   :  { %7698 = vmatprep.subr.mxu0 %v9584_v53  ;;  %7721 = vmatpush3.msra.mxu1 %v2957_v0 }
 0x21a   :  { %7699 = vmatpush3.msra.mxu0 %v9584_v53  ;;  %7750 = vmatprep.subr.mxu1 %v9491_v36 }
 0x21b   :  { %7728 = vmatprep.subr.mxu0 %v9497_v45 }
 0x250   :  { %v7478_v13 = vpop.f32.mrf.mxu1 }
 0x252   :  { %v1704_v56 = vpop.f32.mrf.mxu1 }
 0x255   :  { %v7481_v19 = vpop.f32.mrf.mxu1 }
 0x257   :  { %v1716_v2 = vpop.f32.mrf.mxu1 }
 0x258   :  { %v7456_v21 = vpop.f32.mrf.mxu0 }
 0x259   :  { %v1574_v57 = vadd.f32 %v7456_v21, %v6438_v47 }
 0x25a   :  { %v1563_v44 = vpop.f32.mrf.mxu0 }
 0x25b   :  { %v1564_v60 = vadd.f32 %v6438_v47, %v1563_v44  ;;  %v1711_v38 = vadd.f32 %v7478_v13, %v1574_v57 }
 0x25d   :  { %v1705_v46 = vadd.f32 %v1704_v56, %v1564_v60 }
 0x25e   :  { %v7459_v39 = vpop.f32.mrf.mxu0 }
 0x25f   :  { %v1594_v42 = vadd.f32 %v7459_v39, %v6438_v47 }
 0x260   :  { %v1583_v6 = vpop.f32.mrf.mxu0 }
 0x261   :  { %v1584_v58 = vadd.f32 %v6438_v47, %v1583_v6  ;;  %v1723_v27 = vadd.f32 %v7481_v19, %v1594_v42 }
 0x262   :  { %v7522_v24 = vpop.f32.mrf.mxu1 }
 0x263   :  { %v1717_v12 = vadd.f32 %v1716_v2, %v1584_v58 }
 0x264   :  { %v1912_v62 = vpop.f32.mrf.mxu1 }
 0x267   :  { %v7525_v16 = vpop.f32.mrf.mxu1 }
 0x269   :  { %v1928_v43 = vpop.f32.mrf.mxu1 }
 0x26c   :  { %v7500_v35 = vpop.f32.mrf.mxu0 }
 0x26d   :  { %v1818_v14 = vadd.f32 %v7500_v35, %v1711_v38 }
 0x26e   :  { %v1810_v33 = vpop.f32.mrf.mxu0 }
 0x26f   :  { %v1811_v10 = vadd.f32 %v1810_v33, %v1705_v46  ;;  %v1921_v0 = vadd.f32 %v7522_v24, %v1818_v14 }
 0x271   :  { %v7503_v18 = vpop.f32.mrf.mxu0  ;;  %v1913_v19 = vadd.f32 %v1912_v62, %v1811_v10 }
 0x272   :  { %v1832_v32 = vadd.f32 %v7503_v18, %v1723_v27  ;;  %v6439_v27 = vld [vmem:[%s10642_s3 + $0x1] ss:$0 sm:$0xff] }
 0x273   :  { %v1824_v28 = vpop.f32.mrf.mxu0 }
 0x274   :  { %v1825_v55 = vadd.f32 %v1824_v28, %v1717_v12  ;;  %v1937_v8 = vadd.f32 %v7525_v16, %v1832_v32 }
 0x276   :  { %v7566_v26 = vpop.f32.mrf.mxu1  ;;  %v1929_v39 = vadd.f32 %v1928_v43, %v1825_v55 }
 0x278   :  { %v2128_v4 = vpop.f32.mrf.mxu1 }
 0x27a   :  { %v7569_v34 = vpop.f32.mrf.mxu1 }
 0x27c   :  { %v2140_v42 = vpop.f32.mrf.mxu1 }
 0x27e   :  { %v7544_v41 = vpop.f32.mrf.mxu0 }
 0x27f   :  { %v2038_v44 = vadd.f32 %v7544_v41, %v1921_v0 }
 0x280   :  { %v2031_v1 = vpop.f32.mrf.mxu0 }
 0x281   :  { %v2032_v2 = vadd.f32 %v2031_v1, %v1913_v19  ;;  %v2135_v56 = vadd.f32 %v7566_v26, %v2038_v44  ;;  %v8346_v26 = vmov 1966171168  }
 0x282   :  { %v7547_v40 = vpop.f32.mrf.mxu0  ;;  %v2707_v12 = vunpack.c.l.s4 %v8346_v26 }
 0x283   :  { %v2050_v21 = vadd.f32 %v7547_v40, %v1937_v8  ;;  %v2129_v35 = vadd.f32 %v2128_v4, %v2032_v2 }
 0x284   :  { %v2043_v6 = vpop.f32.mrf.mxu0  ;;  %v2708_v14 = vunpack.c.0.s8 %v2707_v12 }
 0x285   :  { %v2147_v47 = vadd.f32 %v7569_v34, %v2050_v21  ;;  %v2044_v13 = vadd.f32 %v2043_v6, %v1929_v39 }
 0x286   :  { %v2711_v10 = vsub.s32 %v2708_v14, %v10686_v29 }
 0x287   :  { %v2141_v18 = vadd.f32 %v2140_v42, %v2044_v13  ;;  %4154 = vrot.lane.b32.xlu1 %v2147_v47, %s8345_s22 }
 0x289   :  { %4152 = vrot.lane.b32.xlu0 %v2141_v18, %s8345_s22 }
 0x28b   :  { %4150 = vrot.lane.b32.xlu1 %v2135_v56, %s8345_s22 }
 0x28d   :  { %4148 = vrot.lane.b32.xlu0 %v2129_v35, %s8345_s22 }
 0x2a1   :  { %v2358_v16 = vpop.f32.mrf.mxu1 }
 0x2a3   :  { %v7607_v33 = vpop.f32.mrf.mxu1 }
 0x2a9   :  { %v2247_v24 = vpop.f32.mrf.mxu0 }
 0x2aa   :  { %v2248_v28 = vadd.f32 %v6439_v27, %v2247_v24 }
 0x2ab   :  { %v7588_v57 = vpop.f32.mrf.mxu0 }
 0x2ac   :  { %v2359_v32 = vadd.f32 %v2358_v16, %v2248_v28 }
 0x2b1   :  { %v2527_v43 = vpop.f32.mrf.mxu1 }
 0x2b3   :  { %v7645_v58 = vpop.f32.mrf.mxu1 }
 0x2ba   :  { %v2446_v60 = vpop.f32.mrf.mxu0 }
 0x2bb   :  { %v2447_v41 = vadd.f32 %v2446_v60, %v2359_v32 }
 0x2bc   :  { %v7626_v62 = vpop.f32.mrf.mxu0 }
 0x2bd   :  { %v2528_v46 = vadd.f32 %v2527_v43, %v2447_v41 }
 0x2c3   :  { %v2701_v38 = vpop.f32.mrf.mxu1 }
 0x2c5   :  { %v7683_v4 = vpop.f32.mrf.mxu1 }
 0x2cb   :  { %v2622_v55 = vpop.f32.mrf.mxu0 }
 0x2cc   :  { %v2623_v1 = vadd.f32 %v2622_v55, %v2528_v46 }
 0x2cd   :  { %v7664_v8 = vpop.f32.mrf.mxu0 }
 0x2ce   :  { %v2702_v34 = vadd.f32 %v2701_v38, %v2623_v1 }
 0x2d0   :  { %v2712_v40 = vrot.slane %v2702_v34, %v2711_v10 }
 0x2d2   :  { %v2713_v0 = vcombine.high %v2712_v40, %v2712_v40  ;;  %v2720_v21 = vrot.slane %v2712_v40, %v2711_v10 }
 0x2d4   :  { %v2727_v39 = vrot.slane %v2713_v0, %v2711_v10  ;;  %v2728_v6 = vcombine.high %v2720_v21, %v2720_v21  ;;  %v2733_v44 = vrot.slane %v2720_v21, %v10685_v9  ;;  %v3450_v0 = vpop.permute.xlu1 %3449 }
 0x2d6   :  { %v2729_v19 = vcombine.high %v2727_v39, %v2727_v39  ;;  %v2737_v13 = vrot.slane %v2727_v39, %v10685_v9  ;;  %v2741_v42 = vrot.slane %v2728_v6, %v10685_v9  ;;  %v2750_v2 = vmul.f32 %v2733_v44, %v2129_v35 }
 0x2d8   :  { %v2763_v16 = vsel %vm1471_vm9, %v2750_v2, 0  ;;  %v2751_v33 = vmul.f32 %v2737_v13, %v2135_v56  ;;  %v2752_v24 = vmul.f32 %v2741_v42, %v2141_v18  ;;  %v2745_v29 = vrot.slane %v2729_v19, %v10685_v9 }
 0x2d9   :  { %v9622_v57 = vand.u32 4294901760, %v2763_v16 }
 0x2da   :  { %v2766_v43 = vsel %vm1471_vm9, %v2751_v33, 0  ;;  %v2769_v58 = vsel %vm1471_vm9, %v2752_v24, 0  ;;  %v2753_v60 = vmul.f32 %v2745_v29, %v2147_v47 }
 0x2db   :  { %7722 = vmatprep.mubr.f32.mxu1 %v9622_v57  ;;  %v9627_v62 = vand.u32 4294901760, %v2766_v43  ;;  %v9629_v27 = vand.u32 4294901760, %v2769_v58  ;;  %v2848_v35 = vsub.f32 %v2763_v16, %v9622_v57 }
 0x2dc   :  { %v2772_v56 = vsel %vm1471_vm9, %v2753_v60, 0 }
 0x2dd   :  { %v9634_v18 = vsub.f32 %v2766_v43, %v9627_v62  ;;  %7723 = vmatmul.mubr.f32.vlgmr.msra.gmra.mxu1 %v9627_v62  ;;  %v9637_v9 = vand.u32 4294901760, %v2772_v56  ;;  %v2849_v28 = vand.u32 4294901760, %v2848_v35  ;;  %v9640_v47 = vsub.f32 %v2769_v58, %v9629_v27 }
 0x2de   :  { %7751 = vmatpush3.msra.mxu1 %v9491_v36  ;;  %7725 = vmatprep.mubr.f32.mxu1 %v9629_v27 }
 0x2df   :  { %7752 = vmatprep.subr.mxu1 %v9499_v63  ;;  %v2850_v38 = vsub.f32 %v2848_v35, %v2849_v28  ;;  %v2859_v32 = vand.u32 4294901760, %v9634_v18  ;;  %v2869_v26 = vand.u32 4294901760, %v9640_v47  ;;  %v9648_v12 = vsub.f32 %v2772_v56, %v9637_v9 }
 0x2e0   :  { %7753 = vmatpush3.msra.mxu1 %v9499_v63 }
 0x2e1   :  { %7754 = vmatprep.subr.mxu1 %v9512_v15  ;;  %7726 = vmatmul.mubr.f32.gmra.mxu1 %v9637_v9  ;;  %v2851_v4 = vand.u32 4294901760, %v2850_v38  ;;  %v2860_v41 = vsub.f32 %v9634_v18, %v2859_v32  ;;  %v2870_v14 = vsub.f32 %v9640_v47, %v2869_v26  ;;  %v2879_v46 = vand.u32 4294901760, %v9648_v12 }
 0x2e2   :  { %7755 = vmatpush3.msra.mxu1 %v9512_v15  ;;  %7766 = vmatprep.mubr.f32.mxu1 %v2849_v28 }
 0x2e3   :  { %7756 = vmatprep.subr.mxu1 %v9527_v50  ;;  %7700 = vmatprep.mubr.f32.mxu0 %v2851_v4  ;;  %v2861_v55 = vand.u32 4294901760, %v2860_v41  ;;  %v2871_v1 = vand.u32 4294901760, %v2870_v14  ;;  %v2880_v10 = vsub.f32 %v9648_v12, %v2879_v46 }
 0x2e4   :  { %7757 = vmatpush3.msra.mxu1 %v9527_v50 }
 0x2e5   :  { %7758 = vmatprep.subr.mxu1 %v9543_v3  ;;  %7701 = vmatmul.mubr.f32.vlgmr.msra.gmra.mxu0 %v2861_v55  ;;  %v2881_v8 = vand.u32 4294901760, %v2880_v10 }
 0x2e6   :  { %7729 = vmatpush3.msra.mxu0 %v9497_v45  ;;  %7759 = vmatpush3.msra.mxu1 %v9543_v3 }
 0x2e7   :  { %7703 = vmatprep.mubr.f32.mxu0 %v2871_v1  ;;  %7730 = vmatprep.subr.mxu0 %v9510_v17 }
 0x2e8   :  { %7760 = vmatprep.subr.mxu1 %v9551_v37  ;;  %7731 = vmatpush3.msra.mxu0 %v9510_v17 }
 0x2e9   :  { %7761 = vmatpush3.msra.mxu1 %v9551_v37  ;;  %7732 = vmatprep.subr.mxu0 %v9525_v49 }
 0x2ea   :  { %7762 = vmatprep.subr.mxu1 %v9566_v30  ;;  %7704 = vmatmul.mubr.f32.gmra.mxu0 %v2881_v8 }
 0x2eb   :  { %7733 = vmatpush3.msra.mxu0 %v9525_v49  ;;  %7763 = vmatpush3.msra.mxu1 %v9566_v30 }
 0x2ec   :  { %7734 = vmatprep.subr.mxu0 %v9541_v23  ;;  %7744 = vmatprep.mubr.f32.mxu0 %v2848_v35 }
 0x2ed   :  { %7764 = vmatprep.subr.mxu1 %v9584_v53  ;;  %7735 = vmatpush3.msra.mxu0 %v9541_v23 }
 0x2ee   :  { %7765 = vmatpush3.msra.mxu1 %v9584_v53  ;;  %7736 = vmatprep.subr.mxu0 %v9557_v11 }
 0x2ef   :  { %7767 = vmatmul.mubr.f32.vlgmr.msra.gmra.mxu1 %v2859_v32  ;;  %7794 = vmatprep.subr.mxu1 %v9491_v36 }
 0x2f0   :  { %7737 = vmatpush3.msra.mxu0 %v9557_v11  ;;  %7769 = vmatprep.mubr.f32.mxu1 %v2869_v26 }
 0x2f1   :  { %7795 = vmatpush3.msra.mxu1 %v9491_v36  ;;  %7738 = vmatprep.subr.mxu0 %v9564_v20  ;;  %v3553_v36 = vld [vmem:[%s10643_s5] sm:$0xf] }
 0x2f2   :  { %7796 = vmatprep.subr.mxu1 %v9499_v63  ;;  %7739 = vmatpush3.msra.mxu0 %v9564_v20  ;;  %v3567_v45 = vsel %vm110_vm1, %v3553_v36, 0 }
 0x2f3   :  { %7797 = vmatpush3.msra.mxu1 %v9499_v63  ;;  %7740 = vmatprep.subr.mxu0 %v9582_v52  ;;  %v9730_v63 = vand.u32 4294901760, %v3567_v45 }
 0x2f4   :  { %7770 = vmatmul.mubr.f32.gmra.mxu1 %v2879_v46  ;;  %7798 = vmatprep.subr.mxu1 %v9512_v15 }
 0x2f5   :  { %7741 = vmatpush3.msra.mxu0 %v9582_v52  ;;  %7799 = vmatpush3.msra.mxu1 %v9512_v15 }
 0x2f6   :  { %7810 = vmatprep.mubr.f32.mxu1 %v9622_v57  ;;  %7742 = vmatprep.subr.mxu0 %v9596_v59 }
 0x2f7   :  { %7800 = vmatprep.subr.mxu1 %v9527_v50  ;;  %7743 = vmatpush3.msra.mxu0 %v9596_v59 }
 0x2f8   :  { %7801 = vmatpush3.msra.mxu1 %v9527_v50  ;;  %7745 = vmatmul.mubr.f32.vlgmr.msra.gmra.mxu0 %v9634_v18 }
 0x2f9   :  { %7772 = vmatprep.subr.mxu0 %v9507_v51  ;;  %7802 = vmatprep.subr.mxu1 %v9543_v3 }
 0x2fa   :  { %7747 = vmatprep.mubr.f32.mxu0 %v9640_v47  ;;  %7773 = vmatpush3.msra.mxu0 %v9507_v51  ;;  %v9733_v51 = vsub.f32 %v3567_v45, %v9730_v63  ;;  %v3464_v45 = vpop.permute.xlu0 %3463 }
 0x2fb   :  { %7803 = vmatpush3.msra.mxu1 %v9543_v3  ;;  %7774 = vmatprep.subr.mxu0 %v9522_v48 }
 0x2fc   :  { %7804 = vmatprep.subr.mxu1 %v9551_v37  ;;  %7775 = vmatpush3.msra.mxu0 %v9522_v48  ;;  %v9738_v17 = vand.u32 4294901760, %v9733_v51 }
 0x2fd   :  { %7805 = vmatpush3.msra.mxu1 %v9551_v37  ;;  %7748 = vmatmul.mubr.f32.gmra.mxu0 %v9648_v12 }
 0x2fe   :  { %7776 = vmatprep.subr.mxu0 %v9537_v7  ;;  %7806 = vmatprep.subr.mxu1 %v9566_v30  ;;  %v3709_v15 = vsub.f32 %v9733_v51, %v9738_v17 }
 0x2ff   :  { %7777 = vmatpush3.msra.mxu0 %v9537_v7  ;;  %7788 = vmatprep.mubr.f32.mxu0 %v9622_v57  ;;  %v3457_v57 = vpop.permute.xlu1 %3456 }
 0x300   :  { %7807 = vmatpush3.msra.mxu1 %v9566_v30  ;;  %7778 = vmatprep.subr.mxu0 %v9554_v61  ;;  %v3710_v48 = vand.u32 4294901760, %v3709_v15 }
 0x301   :  { %7808 = vmatprep.subr.mxu1 %v9584_v53  ;;  %7779 = vmatpush3.msra.mxu0 %v9554_v61 }
 0x302   :  { %7809 = vmatpush3.msra.mxu1 %v9584_v53  ;;  %7780 = vmatprep.subr.mxu0 %v9572_v31 }
 0x303   :  { %7811 = vmatmul.mubr.f32.vlgmr.msra.gmra.mxu1 %v9627_v62  ;;  %7781 = vmatpush3.msra.mxu0 %v9572_v31  ;;  %v3471_v55 = vpop.permute.xlu1 %3470 }
 0x304   :  { %7813 = vmatprep.mubr.f32.mxu1 %v9629_v27  ;;  %7782 = vmatprep.subr.mxu0 %v9579_v25 }
 0x305   :  { %7783 = vmatpush3.msra.mxu0 %v9579_v25  ;;  %7824 = vmatprep.subr.mxu1 %v3710_v48 }
 0x306   :  { %7784 = vmatprep.subr.mxu0 %v9593_v54  ;;  %7825 = vmatpush3.msra.mxu1 %v3710_v48 }
 0x307   :  { %7814 = vmatmul.mubr.f32.gmra.mxu1 %v9637_v9  ;;  %7785 = vmatpush3.msra.mxu0 %v9593_v54 }
 0x308   :  { %7786 = vmatprep.subr.mxu0 %v9603_v22  ;;  %7840 = vmatprep.subr.mxu1 %v9730_v63 }
 0x309   :  { %7787 = vmatpush3.msra.mxu0 %v9603_v22 }
 0x30a   :  { %7789 = vmatmul.mubr.f32.vlgmr.msra.gmra.mxu0 %v9627_v62  ;;  %7816 = vmatprep.subr.mxu0 %v9730_v63 }
 0x30b   :  { %7791 = vmatprep.mubr.f32.mxu0 %v9629_v27  ;;  %7817 = vmatpush3.msra.mxu0 %v9730_v63 }
 0x30c   :  { %7832 = vmatprep.subr.mxu0 %v9733_v51 }
 0x30e   :  { %7792 = vmatmul.mubr.f32.gmra.mxu0 %v9637_v9 }
 0x39d   :  { %v7724_v49 = vpop.f32.mrf.mxu1 }
 0x39f   :  { %v2994_v50 = vpop.f32.mrf.mxu1 }
 0x3a1   :  { %v7727_v23 = vpop.f32.mrf.mxu1 }
 0x3a3   :  { %v3006_v37 = vpop.f32.mrf.mxu1 }
 0x3a5   :  { %v7702_v7 = vpop.f32.mrf.mxu0 }
 0x3a6   :  { %v3001_v53 = vadd.f32 %v7724_v49, %v7702_v7 }
 0x3a7   :  { %v2853_v3 = vpop.f32.mrf.mxu0 }
 0x3a8   :  { %v2995_v22 = vadd.f32 %v2994_v50, %v2853_v3 }
 0x3aa   :  { %v7705_v61 = vpop.f32.mrf.mxu0 }
 0x3ab   :  { %v3013_v21 = vadd.f32 %v7727_v23, %v7705_v61 }
 0x3ac   :  { %v2873_v20 = vpop.f32.mrf.mxu0 }
 0x3ad   :  { %v3007_v44 = vadd.f32 %v3006_v37, %v2873_v20 }
 0x3af   :  { %v7768_v11 = vpop.f32.mrf.mxu1 }
 0x3b1   :  { %v3202_v30 = vpop.f32.mrf.mxu1 }
 0x3b4   :  { %v7771_v25 = vpop.f32.mrf.mxu1 }
 0x3b6   :  { %v3218_v54 = vpop.f32.mrf.mxu1 }
 0x3b8   :  { %v7746_v31 = vpop.f32.mrf.mxu0 }
 0x3b9   :  { %v3108_v34 = vadd.f32 %v7746_v31, %v3001_v53 }
 0x3ba   :  { %v3100_v52 = vpop.f32.mrf.mxu0 }
 0x3bb   :  { %v3101_v39 = vadd.f32 %v3100_v52, %v2995_v22  ;;  %v3211_v13 = vadd.f32 %v7768_v11, %v3108_v34 }
 0x3bd   :  { %v7749_v59 = vpop.f32.mrf.mxu0  ;;  %v3203_v24 = vadd.f32 %v3202_v30, %v3101_v39 }
 0x3be   :  { %v3122_v19 = vadd.f32 %v7749_v59, %v3013_v21 }
 0x3bf   :  { %v3114_v6 = vpop.f32.mrf.mxu0 }
 0x3c0   :  { %v3115_v16 = vadd.f32 %v3114_v6, %v3007_v44  ;;  %v3227_v60 = vadd.f32 %v7771_v25, %v3122_v19 }
 0x3c2   :  { %v3219_v9 = vadd.f32 %v3218_v54, %v3115_v16 }
 0x3c3   :  { %v7812_v40 = vpop.f32.mrf.mxu1 }
 0x3c5   :  { %v3418_v42 = vpop.f32.mrf.mxu1 }
 0x3c7   :  { %v7815_v62 = vpop.f32.mrf.mxu1 }
 0x3c9   :  { %v3430_v12 = vpop.f32.mrf.mxu1 }
 0x3ca   :  { %v7790_v2 = vpop.f32.mrf.mxu0 }
 0x3cb   :  { %v3328_v33 = vadd.f32 %v7790_v2, %v3211_v13 }
 0x3cc   :  { %v3321_v29 = vpop.f32.mrf.mxu0 }
 0x3cd   :  { %v3425_v43 = vadd.f32 %v7812_v40, %v3328_v33  ;;  %v3322_v58 = vadd.f32 %v3321_v29, %v3203_v24 }
 0x3ce   :  { %v7793_v27 = vpop.f32.mrf.mxu0 }
 0x3cf   :  { %v3441_v35 = vmul.f32 0.25, %v3425_v43  ;;  %v3419_v56 = vadd.f32 %v3418_v42, %v3322_v58  ;;  %v3340_v18 = vadd.f32 %v7793_v27, %v3227_v60 }
 0x3d0   :  { %v3333_v28 = vpop.f32.mrf.mxu0 }
 0x3d1   :  { %v3473_v47 = vadd.f32 %v3457_v57, %v3441_v35  ;;  %v3440_v38 = vmul.f32 0.25, %v3419_v56  ;;  %v3437_v32 = vadd.f32 %v7815_v62, %v3340_v18  ;;  %v3334_v26 = vadd.f32 %v3333_v28, %v3219_v9 }
 0x3d3   :  { %v3484_v4 = vsel %vm3476_vm11, %v3473_v47, -inf  ;;  %v3472_v41 = vadd.f32 %v3450_v0, %v3440_v38  ;;  %v3443_v14 = vmul.f32 0.25, %v3437_v32  ;;  %v3431_v46 = vadd.f32 %v3430_v12, %v3334_v26 }
 0x3d4   :  { %v3485_v1 = vrot.slane %v3484_v4, 4 }
 0x3d5   :  { %v3477_v10 = vsel %vm3476_vm11, %v3472_v41, -inf  ;;  %v3475_v8 = vadd.f32 %v3471_v55, %v3443_v14  ;;  %v3442_v36 = vmul.f32 0.25, %v3431_v46 }
 0x3d6   :  { %v3486_v15 = vmax.f32 %v3484_v4, %v3485_v1  ;;  %v3478_v48 = vrot.slane %v3477_v10, 4 }
 0x3d7   :  { %v3498_v49 = vsel %vm3476_vm11, %v3475_v8, -inf  ;;  %v3474_v50 = vadd.f32 %v3464_v45, %v3442_v36 }
 0x3d8   :  { %v3487_v7 = vrot.slane %v3486_v15, 2  ;;  %v3479_v23 = vmax.f32 %v3477_v10, %v3478_v48  ;;  %v3499_v3 = vrot.slane %v3498_v49, 4 }
 0x3d9   :  { %v3491_v37 = vsel %vm3476_vm11, %v3474_v50, -inf }
 0x3da   :  { %v3488_v61 = vmax.f32 %v3486_v15, %v3487_v7  ;;  %v3480_v11 = vrot.slane %v3479_v23, 2  ;;  %v3500_v20 = vmax.f32 %v3498_v49, %v3499_v3  ;;  %v3492_v30 = vrot.slane %v3491_v37, 4 }
 0x3dc   :  { %v3489_v31 = vrot.slane %v3488_v61, 1  ;;  %v3481_v25 = vmax.f32 %v3479_v23, %v3480_v11  ;;  %v3501_v52 = vrot.slane %v3500_v20, 2  ;;  %v3493_v53 = vmax.f32 %v3491_v37, %v3492_v30 }
 0x3de   :  { %v3490_v54 = vmax.f32 %v3488_v61, %v3489_v31  ;;  %v3482_v59 = vrot.slane %v3481_v25, 1  ;;  %v3502_v22 = vmax.f32 %v3500_v20, %v3501_v52  ;;  %v3494_v34 = vrot.slane %v3493_v53, 2 }
 0x3e0   :  { %v3506_v40 = vsub.f32 %v3473_v47, %v3490_v54  ;;  %v3483_v0 = vmax.f32 %v3481_v25, %v3482_v59  ;;  %v3503_v21 = vrot.slane %v3502_v22, 1  ;;  %v3495_v39 = vmax.f32 %v3493_v53, %v3494_v34 }
 0x3e2   :  { %v3511_v6 = vmul.f32 1.442695, %v3506_v40  ;;  %v3505_v44 = vsub.f32 %v3472_v41, %v3483_v0  ;;  %v3504_v19 = vmax.f32 %v3502_v22, %v3503_v21  ;;  %v3496_v13 = vrot.slane %v3495_v39, 1 }
 0x3e4   :  { %8326 = vpow2.f32 %v3511_v6  ;;  %v3509_v42 = vmul.f32 1.442695, %v3505_v44  ;;  %v3508_v2 = vsub.f32 %v3475_v8, %v3504_v19  ;;  %v3497_v16 = vmax.f32 %v3495_v39, %v3496_v13 }
 0x3e6   :  { %8328 = vpow2.f32 %v3509_v42  ;;  %v3515_v33 = vmul.f32 1.442695, %v3508_v2  ;;  %v3507_v24 = vsub.f32 %v3474_v50, %v3497_v16 }
 0x3e8   :  { %8330 = vpow2.f32 %v3515_v33  ;;  %v3513_v29 = vmul.f32 1.442695, %v3507_v24 }
 0x3ea   :  { %8332 = vpow2.f32 %v3513_v29 }
 0x3f1   :  { %v8327_v57 = vpop.eup %8326 }
 0x3f2   :  { %v3524_v43 = vsel %vm3476_vm11, %v8327_v57, 0.0 }
 0x3f3   :  { %v8329_v58 = vpop.eup %8328  ;;  %v3525_v60 = vrot.slane %v3524_v43, 4 }
 0x3f4   :  { %v3517_v62 = vsel %vm3476_vm11, %v8329_v58, 0.0 }
 0x3f5   :  { %v8331_v27 = vpop.eup %8330  ;;  %v3526_v35 = vadd.f32 %v3525_v60, %v3524_v43  ;;  %v3518_v56 = vrot.slane %v3517_v62, 4 }
 0x3f6   :  { %v3538_v18 = vsel %vm3476_vm11, %v8331_v27, 0.0 }
 0x3f7   :  { %v8333_v9 = vpop.eup %8332  ;;  %v3527_v28 = vrot.slane %v3526_v35, 2  ;;  %v3519_v47 = vadd.f32 %v3518_v56, %v3517_v62  ;;  %v3539_v38 = vrot.slane %v3538_v18, 4 }
 0x3f8   :  { %v3531_v32 = vsel %vm3476_vm11, %v8333_v9, 0.0 }
 0x3f9   :  { %v3528_v26 = vadd.f32 %v3527_v28, %v3526_v35  ;;  %v3520_v12 = vrot.slane %v3519_v47, 2  ;;  %v3540_v4 = vadd.f32 %v3539_v38, %v3538_v18  ;;  %v3532_v41 = vrot.slane %v3531_v32, 4  ;;  %v4209_v35 = vld [vmem:[%s10644_s6 + $0x68] sm:$0xff]  ;;  %v4208_v28 = vld [vmem:[%s10644_s6 + $0x60] sm:$0xff] }
 0x3fb   :  { %v3529_v14 = vrot.slane %v3528_v26, 1  ;;  %v3521_v46 = vadd.f32 %v3520_v12, %v3519_v47  ;;  %v3541_v55 = vrot.slane %v3540_v4, 2  ;;  %v3533_v1 = vadd.f32 %v3532_v41, %v3531_v32  ;;  %v4207_v12 = vld [vmem:[%s10644_s6 + $0x58] sm:$0xff] }
 0x3fd   :  { %v3530_v10 = vadd.f32 %v3529_v14, %v3528_v26  ;;  %v3542_v8 = vadd.f32 %v3541_v55, %v3540_v4  ;;  %v3534_v36 = vrot.slane %v3533_v1, 2  ;;  %v3522_v45 = vrot.slane %v3521_v46, 1 }
 0x3fe   :  { %v9804_v26 = vand.u32 4294901760, %v4208_v28  ;;  %v9819_v55 = vand.u32 4294901760, %v4207_v12 }
 0x3ff   :  { %8334 = vrcp.f32 %v3530_v10  ;;  %v3535_v15 = vadd.f32 %v3534_v36, %v3533_v1  ;;  %v3523_v48 = vadd.f32 %v3522_v45, %v3521_v46  ;;  %v3543_v49 = vrot.slane %v3542_v8, 1  ;;  %v4206_v1 = vld [vmem:[%s10644_s6 + $0x50] sm:$0xff] }
 0x400   :  { %v9816_v46 = vsub.f32 %v4208_v28, %v9804_v26  ;;  %v9829_v45 = vand.u32 4294901760, %v4206_v1 }
 0x401   :  { %8336 = vrcp.f32 %v3523_v48  ;;  %v3536_v50 = vrot.slane %v3535_v15, 1  ;;  %v3544_v7 = vadd.f32 %v3543_v49, %v3542_v8  ;;  %v4205_v48 = vld [vmem:[%s10644_s6 + $0x48] sm:$0xff] }
 0x402   :  { %v4341_v36 = vand.u32 4294901760, %v9816_v46 }
 0x403   :  { %v3537_v23 = vadd.f32 %v3536_v50, %v3535_v15  ;;  %8338 = vrcp.f32 %v3544_v7  ;;  %v9833_v15 = vsub.f32 %v4207_v12, %v9819_v55  ;;  %v9843_v7 = vsub.f32 %v4206_v1, %v9829_v45  ;;  %v4153_v1 = vpop.permute.xlu0 %4152 }
 0x404   :  { %v4342_v50 = vsub.f32 %v9816_v46, %v4341_v36 }
 0x405   :  { %8340 = vrcp.f32 %v3537_v23  ;;  %v9845_v23 = vand.u32 4294901760, %v4205_v48 }
 0x40c   :  { %v8335_v3 = vpop.eup %8334 }
 0x40d   :  { %v3548_v37 = vmul.f32 %v8335_v3, %v8327_v57  ;;  %v4348_v3 = vand.u32 4294901760, %v9833_v15 }
 0x40e   :  { %v8337_v61 = vpop.eup %8336 }
 0x40f   :  { %v3546_v11 = vmul.f32 %v8337_v61, %v8329_v58  ;;  %v3558_v20 = vsel %vm3476_vm11, %v3548_v37, 0  ;;  %v4204_v37 = vld [vmem:[%s10644_s6 + $0x40] sm:$0xff]  ;;  %v4343_v61 = vand.u32 4294901760, %v4342_v50 }
 0x410   :  { %v8339_v30 = vpop.eup %8338  ;;  %v3645_v31 = vand.u32 4294901760, %v3558_v20 }
 0x411   :  { %v3555_v25 = vsel %vm3476_vm11, %v3546_v11, 0  ;;  %v3552_v52 = vmul.f32 %v8339_v30, %v8331_v27  ;;  %v4355_v11 = vand.u32 4294901760, %v9843_v7  ;;  %v9858_v30 = vand.u32 4294901760, %v4204_v37 }
 0x412   :  { %v8341_v53 = vpop.eup %8340  ;;  %v3635_v54 = vand.u32 4294901760, %v3555_v25  ;;  %v3646_v59 = vsub.f32 %v3558_v20, %v3645_v31  ;;  %v9856_v20 = vsub.f32 %v4205_v48, %v9845_v23 }
 0x413   :  { %v3550_v22 = vmul.f32 %v8341_v53, %v8333_v9  ;;  %v3564_v34 = vsel %vm3476_vm11, %v3552_v52, 0  ;;  %v9790_v9 = vand.u32 4294901760, %v4209_v35  ;;  %v9871_v53 = vsub.f32 %v4204_v37, %v9858_v30 }
 0x414   :  { %7826 = vmatprep.mubr.f32.mxu1 %v3635_v54  ;;  %v3665_v40 = vand.u32 4294901760, %v3564_v34  ;;  %v3636_v0 = vsub.f32 %v3555_v25, %v3635_v54  ;;  %v3647_v21 = vand.u32 4294901760, %v3646_v59  ;;  %v4356_v25 = vsub.f32 %v9843_v7, %v4355_v11 }
 0x415   :  { %7827 = vmatmul.mubr.f32.vlgmr.msra.gmra.mxu1 %v3645_v31  ;;  %v3561_v39 = vsel %vm3476_vm11, %v3550_v22, 0  ;;  %v9802_v32 = vsub.f32 %v4209_v35, %v9790_v9  ;;  %v4362_v52 = vand.u32 4294901760, %v9856_v20 }
 0x416   :  { %v3655_v6 = vand.u32 4294901760, %v3561_v39  ;;  %v3637_v44 = vand.u32 4294901760, %v3636_v0  ;;  %7841 = vmatpush3.msra.mxu1 %v9730_v63  ;;  %v3666_v19 = vsub.f32 %v3564_v34, %v3665_v40  ;;  %v3648_v13 = vsub.f32 %v3646_v59, %v3647_v21 }
 0x417   :  { %7856 = vmatprep.subr.mxu1 %v9730_v63  ;;  %v4334_v14 = vand.u32 4294901760, %v9802_v32  ;;  %v4363_v22 = vsub.f32 %v9856_v20, %v4362_v52  ;;  %v4369_v34 = vand.u32 4294901760, %v9871_v53 }
 0x418   :  { %7829 = vmatprep.mubr.f32.mxu1 %v3655_v6  ;;  %v3638_v42 = vsub.f32 %v3636_v0, %v3637_v44  ;;  %v3656_v2 = vsub.f32 %v3561_v39, %v3655_v6  ;;  %v3667_v16 = vand.u32 4294901760, %v3666_v19  ;;  %v3649_v29 = vand.u32 4294901760, %v3648_v13 }
 0x419   :  { %7830 = vmatmul.mubr.f32.gmra.mxu1 %v3665_v40  ;;  %v4335_v8 = vsub.f32 %v9802_v32, %v4334_v14 }
 0x41a   :  { %7842 = vmatprep.mubr.f32.mxu1 %v3637_v44  ;;  %v3639_v33 = vand.u32 4294901760, %v3638_v42  ;;  %v3657_v24 = vand.u32 4294901760, %v3656_v2  ;;  %v3668_v57 = vsub.f32 %v3666_v19, %v3667_v16 }
 0x41b   :  { %v4336_v49 = vand.u32 4294901760, %v4335_v8 }
 0x41c   :  { %7818 = vmatprep.mubr.f32.mxu0 %v3639_v33  ;;  %v3658_v43 = vsub.f32 %v3656_v2, %v3657_v24  ;;  %v3669_v60 = vand.u32 4294901760, %v3668_v57 }
 0x41d   :  { %7819 = vmatmul.mubr.f32.vlgmr.msra.gmra.mxu0 %v3649_v29  ;;  %7843 = vmatmul.mubr.f32.vlgmr.msra.gmra.mxu1 %v3647_v21 }
 0x41e   :  { %7833 = vmatpush3.msra.mxu0 %v9733_v51  ;;  %7845 = vmatprep.mubr.f32.mxu1 %v3657_v24  ;;  %v3659_v58 = vand.u32 4294901760, %v3658_v43 }
 0x41f   :  { %7848 = vmatprep.subr.mxu0 %v9738_v17  ;;  %7857 = vmatpush3.msra.mxu1 %v9730_v63  ;;  %v4211_v63 = vld [vmem:[%s10644_s6 + $0x78] sm:$0xff] }
 0x420   :  { %7821 = vmatprep.mubr.f32.mxu0 %v3659_v58  ;;  %7883 = vmatprep.subr.mxu1 %v10676_v5  ;;  %v9771_v51 = vand.u32 4294901760, %v4211_v63 }
 0x421   :  { %7822 = vmatmul.mubr.f32.gmra.mxu0 %v3669_v60  ;;  %7846 = vmatmul.mubr.f32.gmra.mxu1 %v3667_v16 }
 0x422   :  { %7834 = vmatprep.mubr.f32.mxu0 %v3636_v0  ;;  %7858 = vmatprep.mubr.f32.mxu1 %v3635_v54  ;;  %v9777_v62 = vsub.f32 %v4211_v63, %v9771_v51  ;;  %v4370_v0 = vsub.f32 %v9871_v53, %v4369_v34 }
 0x424   :  { %v4320_v56 = vand.u32 4294901760, %v9777_v62  ;;  %v4371_v21 = vand.u32 4294901760, %v4370_v0 }
 0x425   :  { %7835 = vmatmul.mubr.f32.vlgmr.msra.gmra.mxu0 %v3646_v59  ;;  %7859 = vmatmul.mubr.f32.vlgmr.msra.gmra.mxu1 %v3645_v31  ;;  %v4357_v59 = vand.u32 4294901760, %v4356_v25 }
 0x426   :  { %7849 = vmatpush3.msra.mxu0 %v9738_v17  ;;  %7837 = vmatprep.mubr.f32.mxu0 %v3656_v2  ;;  %v4210_v17 = vld [vmem:[%s10644_s6 + $0x70] sm:$0xff]  ;;  %v4321_v47 = vsub.f32 %v9777_v62, %v4320_v56 }
 0x427   :  { %7861 = vmatprep.mubr.f32.mxu1 %v3655_v6  ;;  %7864 = vmatprep.subr.mxu0 %v10676_v5  ;;  %v9779_v27 = vand.u32 4294901760, %v4210_v17 }
 0x428   :  { %v4322_v4 = vand.u32 4294901760, %v4321_v47  ;;  %v4155_v47 = vpop.permute.xlu1 %4154 }
 0x429   :  { %7838 = vmatmul.mubr.f32.gmra.mxu0 %v3666_v19  ;;  %7862 = vmatmul.mubr.f32.gmra.mxu1 %v3665_v40  ;;  %v9788_v18 = vsub.f32 %v4210_v17, %v9779_v27 }
 0x42a   :  { %7850 = vmatprep.mubr.f32.mxu0 %v3635_v54  ;;  %7899 = vmatprep.mubr.msk.f32.mxu1 %vm8344_vm8, %v10676_v5 }
 0x42b   :  { %v4327_v38 = vand.u32 4294901760, %v9788_v18  ;;  %7884 = vmatpush3.msra.mxu1 %v4322_v4 }
 0x42c   :  { %7885 = vmatprep.subr.mxu1 %v10676_v5 }
 0x42d   :  { %7851 = vmatmul.mubr.f32.vlgmr.msra.gmra.mxu0 %v3645_v31  ;;  %v4328_v41 = vsub.f32 %v9788_v18, %v4327_v38  ;;  %v4349_v31 = vsub.f32 %v9833_v15, %v4348_v3 }
 0x42e   :  { %7853 = vmatprep.mubr.f32.mxu0 %v3655_v6  ;;  %7865 = vmatpush3.msra.mxu0 %v9771_v51 }
 0x42f   :  { %7866 = vmatprep.subr.mxu0 %v10676_v5  ;;  %v4329_v10 = vand.u32 4294901760, %v4328_v41  ;;  %v4350_v54 = vand.u32 4294901760, %v4349_v31 }
 0x430   :  { %7867 = vmatpush3.msra.mxu0 %v9779_v27 }
 0x431   :  { %7854 = vmatmul.mubr.f32.gmra.mxu0 %v3665_v40  ;;  %7868 = vmatprep.subr.mxu0 %v10676_v5  ;;  %v4364_v40 = vand.u32 4294901760, %v4363_v22 }
 0x432   :  { %7880 = vmatprep.mubr.msk.f32.mxu0 %vm8344_vm8, %v10676_v5  ;;  %7869 = vmatpush3.msra.mxu0 %v9790_v9 }
 0x433   :  { %7870 = vmatprep.subr.mxu0 %v10676_v5  ;;  %7886 = vmatpush3.msra.mxu1 %v4329_v10 }
 0x434   :  { %7871 = vmatpush3.msra.mxu0 %v9804_v26  ;;  %7887 = vmatprep.subr.mxu1 %v10676_v5 }
 0x435   :  { %7872 = vmatprep.subr.mxu0 %v10676_v5  ;;  %7888 = vmatpush3.msra.mxu1 %v4336_v49 }
 0x436   :  { %7873 = vmatpush3.msra.mxu0 %v9819_v55  ;;  %7889 = vmatprep.subr.mxu1 %v10676_v5 }
 0x437   :  { %7874 = vmatprep.subr.mxu0 %v10676_v5  ;;  %7890 = vmatpush3.msra.mxu1 %v4343_v61 }
 0x438   :  { %7875 = vmatpush3.msra.mxu0 %v9829_v45  ;;  %7891 = vmatprep.subr.mxu1 %v10676_v5 }
 0x439   :  { %7876 = vmatprep.subr.mxu0 %v10676_v5  ;;  %7892 = vmatpush3.msra.mxu1 %v4350_v54  ;;  %v4151_v54 = vpop.permute.xlu1 %4150 }
 0x43a   :  { %7877 = vmatpush3.msra.mxu0 %v9845_v23  ;;  %7893 = vmatprep.subr.mxu1 %v10676_v5 }
 0x43b   :  { %7878 = vmatprep.subr.mxu0 %v10676_v5  ;;  %7894 = vmatpush3.msra.mxu1 %v4357_v59 }
 0x43c   :  { %7879 = vmatpush3.msra.mxu0 %v9858_v30  ;;  %7895 = vmatprep.subr.mxu1 %v10676_v5 }
 0x43d   :  { %7902 = vmatprep.subr.mxu0 %v10676_v5  ;;  %7896 = vmatpush3.msra.mxu1 %v4364_v40 }
 0x43e   :  { %7897 = vmatprep.subr.mxu1 %v10676_v5 }
 0x43f   :  { %7898 = vmatpush3.msra.mxu1 %v4371_v21 }
 0x440   :  { %7921 = vmatprep.subr.mxu1 %v10676_v5 }
 0x4d5   :  { %v7828_v39 = vpop.f32.mrf.mxu1 }
 0x4d7   :  { %v3747_v6 = vpop.f32.mrf.mxu1 }
 0x4d9   :  { %v7831_v44 = vpop.f32.mrf.mxu1 }
 0x4db   :  { %v3759_v19 = vpop.f32.mrf.mxu1 }
 0x4dd   :  { %v7820_v13 = vpop.f32.mrf.mxu0  ;;  %v7844_v42 = vpop.f32.mrf.mxu1 }
 0x4de   :  { %v3754_v2 = vadd.f32 %v7828_v39, %v7820_v13 }
 0x4df   :  { %v3641_v16 = vpop.f32.mrf.mxu0  ;;  %v3934_v33 = vpop.f32.mrf.mxu1 }
 0x4e0   :  { %v3748_v24 = vadd.f32 %v3747_v6, %v3641_v16 }
 0x4e1   :  { %v7823_v29 = vpop.f32.mrf.mxu0  ;;  %v7847_v57 = vpop.f32.mrf.mxu1 }
 0x4e2   :  { %v3766_v12 = vadd.f32 %v7831_v44, %v7823_v29 }
 0x4e3   :  { %v3661_v43 = vpop.f32.mrf.mxu0  ;;  %v3950_v58 = vpop.f32.mrf.mxu1 }
 0x4e4   :  { %v3760_v10 = vadd.f32 %v3759_v19, %v3661_v43 }
 0x4e5   :  { %v7836_v60 = vpop.f32.mrf.mxu0  ;;  %v7860_v35 = vpop.f32.mrf.mxu1 }
 0x4e6   :  { %v3847_v17 = vadd.f32 %v7836_v60, %v3754_v2  ;;  %v4149_v2 = vpop.permute.xlu0 %4148 }
 0x4e7   :  { %v3839_v63 = vpop.f32.mrf.mxu0  ;;  %v4122_v49 = vpop.f32.mrf.mxu1 }
 0x4e8   :  { %v3840_v4 = vadd.f32 %v3839_v63, %v3748_v24  ;;  %v3943_v48 = vadd.f32 %v7844_v42, %v3847_v17 }
 0x4e9   :  { %v7839_v28 = vpop.f32.mrf.mxu0  ;;  %v7863_v0 = vpop.f32.mrf.mxu1 }
 0x4ea   :  { %v3861_v8 = vadd.f32 %v7839_v28, %v3766_v12  ;;  %v3935_v31 = vadd.f32 %v3934_v33, %v3840_v4 }
 0x4eb   :  { %v3853_v41 = vpop.f32.mrf.mxu0  ;;  %v4134_v43 = vpop.f32.mrf.mxu1 }
 0x4ec   :  { %v3854_v37 = vadd.f32 %v3853_v41, %v3760_v10  ;;  %v3959_v40 = vadd.f32 %v7847_v57, %v3861_v8 }
 0x4ed   :  { %v7852_v50 = vpop.f32.mrf.mxu0 }
 0x4ee   :  { %v4039_v61 = vadd.f32 %v7852_v50, %v3943_v48  ;;  %v3951_v13 = vadd.f32 %v3950_v58, %v3854_v37 }
 0x4ef   :  { %v4032_v25 = vpop.f32.mrf.mxu0 }
 0x4f0   :  { %v4129_v59 = vadd.f32 %v7860_v35, %v4039_v61  ;;  %v4033_v22 = vadd.f32 %v4032_v25, %v3935_v31 }
 0x4f1   :  { %v7855_v21 = vpop.f32.mrf.mxu0 }
 0x4f2   :  { %v4161_v39 = vmul.f32 %v4151_v54, %v4129_v59  ;;  %v4123_v6 = vadd.f32 %v4122_v49, %v4033_v22  ;;  %v4051_v44 = vadd.f32 %v7855_v21, %v3959_v40 }
 0x4f3   :  { %v4044_v19 = vpop.f32.mrf.mxu0 }
 0x4f4   :  { %v4171_v42 = vsel %vm1471_vm9, %v4161_v39, 0.0  ;;  %v4160_v16 = vmul.f32 %v4149_v2, %v4123_v6  ;;  %v4141_v24 = vadd.f32 %v7863_v0, %v4051_v44  ;;  %v4045_v29 = vadd.f32 %v4044_v19, %v3951_v13 }
 0x4f5   :  { %v4172_v33 = vrot.slane %v4171_v42, 4 }
 0x4f6   :  { %v4164_v60 = vsel %vm1471_vm9, %v4160_v16, 0.0  ;;  %v4163_v63 = vmul.f32 %v4155_v47, %v4141_v24  ;;  %v4135_v17 = vadd.f32 %v4134_v43, %v4045_v29 }
 0x4f7   :  { %v4173_v57 = vadd.f32 %v4172_v33, %v4171_v42  ;;  %v4165_v35 = vrot.slane %v4164_v60, 4 }
 0x4f8   :  { %v4185_v28 = vsel %vm1471_vm9, %v4163_v63, 0.0  ;;  %v4162_v12 = vmul.f32 %v4153_v1, %v4135_v17 }
 0x4f9   :  { %v4174_v4 = vrot.slane %v4173_v57, 2  ;;  %v4166_v58 = vadd.f32 %v4165_v35, %v4164_v60  ;;  %v4186_v41 = vrot.slane %v4185_v28, 4  ;;  %v4202_v35 = vld [vmem:[%s10644_s6 + $0x30] sm:$0xff] }
 0x4fa   :  { %v4178_v10 = vsel %vm1471_vm9, %v4162_v12, 0.0  ;;  %v4201_v12 = vld [vmem:[%s10644_s6 + $0x28] sm:$0xff] }
 0x4fb   :  { %v4175_v8 = vadd.f32 %v4174_v4, %v4173_v57  ;;  %v4167_v48 = vrot.slane %v4166_v58, 2  ;;  %v4187_v49 = vadd.f32 %v4186_v41, %v4185_v28  ;;  %v4179_v50 = vrot.slane %v4178_v10, 4  ;;  %v4203_v57 = vld [vmem:[%s10644_s6 + $0x38] sm:$0xff] }
 0x4fc   :  { %v9935_v28 = vand.u32 4294901760, %v4203_v57  ;;  %v9944_v4 = vand.u32 4294901760, %v4202_v35 }
 0x4fd   :  { %v4176_v37 = vrot.slane %v4175_v8, 1  ;;  %v4168_v61 = vadd.f32 %v4167_v48, %v4166_v58  ;;  %v4188_v31 = vrot.slane %v4187_v49, 2  ;;  %v4180_v25 = vadd.f32 %v4179_v50, %v4178_v10  ;;  %v4200_v58 = vld [vmem:[%s10644_s6 + $0x20] sm:$0xff] }
 0x4fe   :  { %v9954_v41 = vsub.f32 %v4203_v57, %v9935_v28  ;;  %v9963_v10 = vsub.f32 %v4202_v35, %v9944_v4 }
 0x4ff   :  { %v4169_v47 = vrot.slane %v4168_v61, 1  ;;  %v4189_v54 = vadd.f32 %v4188_v31, %v4187_v49  ;;  %v4181_v59 = vrot.slane %v4180_v25, 2  ;;  %v4177_v22 = vadd.f32 %v4176_v37, %v4175_v8  ;;  %v4198_v49 = vld [vmem:[%s10644_s6 + $0x10] sm:$0xff] }
 0x500   :  { %v9965_v8 = vand.u32 4294901760, %v4200_v58  ;;  %v9997_v31 = vand.u32 4294901760, %v4198_v49 }
 0x501   :  { %v4170_v40 = vadd.f32 %v4169_v47, %v4168_v61  ;;  %v4190_v1 = vrot.slane %v4189_v54, 1  ;;  %v4182_v0 = vadd.f32 %v4181_v59, %v4180_v25  ;;  %v4197_v61 = vld [vmem:[%s10644_s6 + $0x8] sm:$0xff]  ;;  %v4196_v25 = vld [vmem:[%s10644_s6] sm:$0xff] }
 0x502   :  { %v9990_v37 = vsub.f32 %v4200_v58, %v9965_v8  ;;  %v10014_v47 = vand.u32 4294901760, %v4197_v61  ;;  %v5299_v58 = vld [vmem:[%s10644_s6 + $0x90] sm:$0xff] }
 0x503   :  { %v4191_v21 = vadd.f32 %v4190_v1, %v4189_v54  ;;  %v4183_v39 = vrot.slane %v4182_v0, 1  ;;  %v9893_v6 = vsel %vm4214_vm12, %v4177_v22, %v4170_v40  ;;  %v10028_v54 = vand.u32 4294901760, %v4196_v25 }
 0x504   :  { %v10041_v59 = vsub.f32 %v4197_v61, %v10014_v47  ;;  %v10214_v61 = vand.u32 4294901760, %v5299_v58 }
 0x505   :  { %v4193_v44 = vsub.f32 %v4177_v22, %v4191_v21  ;;  %v4184_v13 = vadd.f32 %v4183_v39, %v4182_v0  ;;  %v10053_v22 = vsub.f32 %v4196_v25, %v10028_v54  ;;  %v4758_v0 = vsel %vm1471_vm9, %v9893_v6, 0 }
 0x507   :  { %v4192_v2 = vsub.f32 %v4170_v40, %v4184_v13  ;;  %v4215_v19 = vsel %vm4214_vm12, %v4191_v21, %v4184_v13  ;;  %v4195_v29 = vand.u32 2147483647, %v4193_v44 }
 0x508   :  { %v4216_v42 = vsel %vm1471_vm9, %v4215_v19, 0 }
 0x509   :  { %v9897_v16 = vand.u32 4294901760, %v4216_v42  ;;  %v4194_v24 = vand.u32 2147483647, %v4192_v2 }
 0x50b   :  { %v4292_v43 = vsub.f32 %v4216_v42, %v9897_v16  ;;  %7900 = vmatmul.mubr.f32.vlgmr.msra.gmra.mxu1 %v9897_v16  ;;  %v9902_v33 = vsel %vm4214_vm12, %v4195_v29, %v4194_v24  ;;  %v5304_v42 = vld [vmem:[%s10644_s6 + $0xb8] sm:$0xff]  ;;  %v5302_v29 = vld [vmem:[%s10644_s6 + $0xa8] sm:$0xff] }
 0x50c   :  { %7922 = vmatpush3.msra.mxu1 %v9771_v51  ;;  %7937 = vmatprep.mubr.msk.f32.mxu1 %vm8344_vm8, %v10676_v5  ;;  %v10151_v24 = vand.u32 4294901760, %v5304_v42 }
 0x50d   :  { %7923 = vmatprep.subr.mxu1 %v10676_v5  ;;  %v4293_v60 = vand.u32 4294901760, %v4292_v43 }
 0x50e   :  { %7924 = vmatpush3.msra.mxu1 %v9779_v27 }
 0x50f   :  { %7925 = vmatprep.subr.mxu1 %v10676_v5  ;;  %v4294_v63 = vsub.f32 %v4292_v43, %v4293_v60 }
 0x510   :  { %7926 = vmatpush3.msra.mxu1 %v9790_v9 }
 0x511   :  { %7927 = vmatprep.subr.mxu1 %v10676_v5  ;;  %v4295_v17 = vand.u32 4294901760, %v4294_v63  ;;  %v10170_v63 = vsub.f32 %v5304_v42, %v10151_v24 }
 0x512   :  { %7928 = vmatpush3.msra.mxu1 %v9804_v26 }
 0x513   :  { %7929 = vmatprep.subr.mxu1 %v10676_v5  ;;  %7881 = vmatmul.mubr.f32.vlgmr.msra.gmra.mxu0 %v4295_v17  ;;  %v10172_v17 = vand.u32 4294901760, %v5302_v29 }
 0x514   :  { %7903 = vmatpush3.msra.mxu0 %v9777_v62  ;;  %7930 = vmatpush3.msra.mxu1 %v9819_v55 }
 0x515   :  { %7904 = vmatprep.subr.mxu0 %v10676_v5  ;;  %7931 = vmatprep.subr.mxu1 %v10676_v5 }
 0x516   :  { %7905 = vmatpush3.msra.mxu0 %v9788_v18  ;;  %7932 = vmatpush3.msra.mxu1 %v9829_v45 }
 0x517   :  { %7906 = vmatprep.subr.mxu0 %v10676_v5  ;;  %7933 = vmatprep.subr.mxu1 %v10676_v5 }
 0x518   :  { %7907 = vmatpush3.msra.mxu0 %v9802_v32  ;;  %7934 = vmatpush3.msra.mxu1 %v9845_v23 }
 0x519   :  { %7908 = vmatprep.subr.mxu0 %v10676_v5  ;;  %7935 = vmatprep.subr.mxu1 %v10676_v5 }
 0x51a   :  { %7909 = vmatpush3.msra.mxu0 %v9816_v46  ;;  %7936 = vmatpush3.msra.mxu1 %v9858_v30 }
 0x51b   :  { %7910 = vmatprep.subr.mxu0 %v10676_v5  ;;  %7938 = vmatmul.mubr.f32.vlgmr.msra.gmra.mxu1 %v4293_v60  ;;  %v5301_v60 = vld [vmem:[%s10644_s6 + $0xa0] sm:$0xff] }
 0x51c   :  { %7959 = vmatprep.subr.mxu1 %v10676_v5  ;;  %7911 = vmatpush3.msra.mxu0 %v9833_v15  ;;  %v4904_v15 = vand.u32 4294901760, %v10041_v59  ;;  %v10181_v35 = vand.u32 4294901760, %v5301_v60 }
 0x51d   :  { %7960 = vmatpush3.msra.mxu1 %v9771_v51  ;;  %7912 = vmatprep.subr.mxu0 %v10676_v5  ;;  %v9956_v51 = vand.u32 4294901760, %v4201_v12 }
 0x51e   :  { %7961 = vmatprep.subr.mxu1 %v10676_v5  ;;  %7913 = vmatpush3.msra.mxu0 %v9843_v7 }
 0x51f   :  { %7962 = vmatpush3.msra.mxu1 %v9779_v27  ;;  %7914 = vmatprep.subr.mxu0 %v10676_v5  ;;  %v4199_v27 = vld [vmem:[%s10644_s6 + $0x18] sm:$0xff]  ;;  %v9977_v48 = vsub.f32 %v4201_v12, %v9956_v51  ;;  %v5412_v12 = vand.u32 4294901760, %v10170_v63 }
 0x520   :  { %7963 = vmatprep.subr.mxu1 %v10676_v5  ;;  %7915 = vmatpush3.msra.mxu0 %v9856_v20  ;;  %v9983_v50 = vand.u32 4294901760, %v4199_v27  ;;  %v4905_v20 = vsub.f32 %v10041_v59, %v4904_v15 }
 0x521   :  { %7964 = vmatpush3.msra.mxu1 %v9790_v9  ;;  %7916 = vmatprep.subr.mxu0 %v10676_v5  ;;  %v4862_v9 = vand.u32 4294901760, %v9954_v41 }
 0x522   :  { %7965 = vmatprep.subr.mxu1 %v10676_v5  ;;  %7917 = vmatpush3.msra.mxu0 %v9871_v53  ;;  %v10087_v53 = vand.u32 4294901760, %v4758_v0 }
 0x523   :  { %7918 = vmatprep.mubr.msk.f32.mxu0 %vm8344_vm8, %v10676_v5  ;;  %7966 = vmatpush3.msra.mxu1 %v9804_v26  ;;  %v4869_v26 = vand.u32 4294901760, %v9963_v10  ;;  %v4863_v62 = vsub.f32 %v9954_v41, %v4862_v9 }
 0x524   :  { %7919 = vmatmul.mubr.f32.vlgmr.msra.gmra.mxu0 %v4292_v43  ;;  %7940 = vmatprep.subr.mxu0 %v10676_v5  ;;  %v10096_v44 = vsub.f32 %v4758_v0, %v10087_v53 }
 0x525   :  { %7967 = vmatprep.subr.mxu1 %v10676_v5  ;;  %7941 = vmatpush3.msra.mxu0 %v4320_v56  ;;  %v4876_v56 = vand.u32 4294901760, %v9977_v48  ;;  %v4870_v18 = vsub.f32 %v9963_v10, %v4869_v26  ;;  %v4864_v32 = vand.u32 4294901760, %v4863_v62  ;;  %v5297_v62 = vld [vmem:[%s10644_s6 + $0x80] sm:$0xff] }
 0x526   :  { %7968 = vmatpush3.msra.mxu1 %v9819_v55  ;;  %7942 = vmatprep.subr.mxu0 %v10676_v5  ;;  %v10012_v55 = vsub.f32 %v4199_v27, %v9983_v50  ;;  %v4835_v13 = vand.u32 4294901760, %v10096_v44  ;;  %v10207_v27 = vsub.f32 %v5301_v60, %v10181_v35  ;;  %v5861_v60 = vld [vmem:[%s10645_s8 + $0x20] sm:$0xff] }
 0x527   :  { %7969 = vmatprep.subr.mxu1 %v10676_v5  ;;  %7943 = vmatpush3.msra.mxu0 %v4327_v38  ;;  %v4883_v38 = vand.u32 4294901760, %v9990_v37  ;;  %v4871_v46 = vand.u32 4294901760, %v4870_v18  ;;  %v10245_v18 = vand.u32 4294901760, %v5297_v62 }
 0x528   :  { %7970 = vmatpush3.msra.mxu1 %v9829_v45  ;;  %7944 = vmatprep.subr.mxu0 %v10676_v5  ;;  %v10026_v45 = vsub.f32 %v4198_v49, %v9997_v31  ;;  %v4836_v2 = vsub.f32 %v10096_v44, %v4835_v13  ;;  %v5298_v49 = vld [vmem:[%s10644_s6 + $0x88] sm:$0xff] }
 0x529   :  { %7971 = vmatprep.subr.mxu1 %v10676_v5  ;;  %7945 = vmatpush3.msra.mxu0 %v4334_v14  ;;  %v4877_v14 = vsub.f32 %v9977_v48, %v4876_v56  ;;  %v10231_v25 = vand.u32 4294901760, %v5298_v49 }
 0x52a   :  { %7972 = vmatpush3.msra.mxu1 %v9845_v23  ;;  %7946 = vmatprep.subr.mxu0 %v10676_v5  ;;  %v4890_v23 = vand.u32 4294901760, %v10012_v55  ;;  %v4837_v19 = vand.u32 4294901760, %v4836_v2  ;;  %v5863_v2 = vld [vmem:[%s10645_s8 + $0x30] sm:$0xff] }
 0x52b   :  { %7973 = vmatprep.subr.mxu1 %v10676_v5  ;;  %7947 = vmatpush3.msra.mxu0 %v4341_v36  ;;  %v4884_v36 = vsub.f32 %v9990_v37, %v4883_v38  ;;  %v4878_v40 = vand.u32 4294901760, %v4877_v14  ;;  %v10270_v14 = vsub.f32 %v5297_v62, %v10245_v18  ;;  %v10435_v42 = vand.u32 4294901760, %v5863_v2 }
 0x52c   :  { %7974 = vmatpush3.msra.mxu1 %v9858_v30  ;;  %7975 = vmatprep.mubr.msk.f32.mxu1 %vm8344_vm8, %v10676_v5  ;;  %v4897_v30 = vand.u32 4294901760, %v10026_v45  ;;  %v4891_v1 = vsub.f32 %v10012_v55, %v4890_v23 }
 0x52d   :  { %7948 = vmatprep.subr.mxu0 %v10676_v5  ;;  %7976 = vmatmul.mubr.f32.vlgmr.msra.gmra.mxu1 %v9897_v16 }
 0x52e   :  { %7997 = vmatprep.subr.mxu1 %v10676_v5  ;;  %7949 = vmatpush3.msra.mxu0 %v4348_v3  ;;  %v4885_v3 = vand.u32 4294901760, %v4884_v36  ;;  %v4898_v7 = vsub.f32 %v10026_v45, %v4897_v30  ;;  %v4892_v21 = vand.u32 4294901760, %v4891_v1 }
 0x52f   :  { %7998 = vmatpush3.msra.mxu1 %v4864_v32  ;;  %7950 = vmatprep.subr.mxu0 %v10676_v5  ;;  %v10258_v32 = vsub.f32 %v5298_v49, %v10231_v25 }
 0x530   :  { %7999 = vmatprep.subr.mxu1 %v10676_v5  ;;  %7951 = vmatpush3.msra.mxu0 %v4355_v11  ;;  %v4911_v11 = vand.u32 4294901760, %v10053_v22 }
 0x531   :  { %8000 = vmatpush3.msra.mxu1 %v4871_v46  ;;  %7952 = vmatprep.subr.mxu0 %v10676_v5 }
 0x532   :  { %8001 = vmatprep.subr.mxu1 %v10676_v5  ;;  %7953 = vmatpush3.msra.mxu0 %v4362_v52  ;;  %v4899_v52 = vand.u32 4294901760, %v4898_v7  ;;  %v4912_v39 = vsub.f32 %v10053_v22, %v4911_v11 }
 0x533   :  { %8002 = vmatpush3.msra.mxu1 %v4878_v40  ;;  %7954 = vmatprep.subr.mxu0 %v10676_v5  ;;  %v5308_v40 = vsel %vm1471_vm9, %v9902_v33, 0 }
 0x534   :  { %8003 = vmatprep.subr.mxu1 %v10676_v5  ;;  %7955 = vmatpush3.msra.mxu0 %v4369_v34  ;;  %v4906_v34 = vand.u32 4294901760, %v4905_v20  ;;  %v4913_v6 = vand.u32 4294901760, %v4912_v39 }
 0x535   :  { %7956 = vmatprep.mubr.msk.f32.mxu0 %vm8344_vm8, %v10676_v5  ;;  %8004 = vmatpush3.msra.mxu1 %v4885_v3 }
 0x536   :  { %7957 = vmatmul.mubr.f32.vlgmr.msra.gmra.mxu0 %v9897_v16  ;;  %7978 = vmatprep.subr.mxu0 %v10676_v5  ;;  %v5303_v16 = vld [vmem:[%s10644_s6 + $0xb0] sm:$0xff] }
 0x537   :  { %8005 = vmatprep.subr.mxu1 %v10676_v5  ;;  %7979 = vmatpush3.msra.mxu0 %v9935_v28  ;;  %v10160_v43 = vand.u32 4294901760, %v5303_v16 }
 0x538   :  { %8006 = vmatpush3.msra.mxu1 %v4892_v21  ;;  %7980 = vmatprep.subr.mxu0 %v10676_v5 }
 0x539   :  { %8007 = vmatprep.subr.mxu1 %v10676_v5  ;;  %7981 = vmatpush3.msra.mxu0 %v9944_v4  ;;  %v10179_v57 = vsub.f32 %v5303_v16, %v10160_v43  ;;  %v5862_v16 = vld [vmem:[%s10645_s8 + $0x28] sm:$0xff] }
 0x53a   :  { %8008 = vmatpush3.msra.mxu1 %v4899_v52  ;;  %7982 = vmatprep.subr.mxu0 %v10676_v5 }
 0x53b   :  { %8009 = vmatprep.subr.mxu1 %v10676_v5  ;;  %7983 = vmatpush3.msra.mxu0 %v9956_v51 }
 0x53c   :  { %8010 = vmatpush3.msra.mxu1 %v4906_v34  ;;  %7984 = vmatprep.subr.mxu0 %v10676_v5 }
 0x53d   :  { %8011 = vmatprep.subr.mxu1 %v10676_v5  ;;  %7985 = vmatpush3.msra.mxu0 %v9965_v8 }
 0x53e   :  { %8012 = vmatpush3.msra.mxu1 %v4913_v6  ;;  %8013 = vmatprep.mubr.msk.f32.mxu1 %vm8344_vm8, %v10676_v5  ;;  %v5864_v6 = vld [vmem:[%s10645_s8 + $0x38] sm:$0xff] }
 0x53f   :  { %7986 = vmatprep.subr.mxu0 %v10676_v5  ;;  %8014 = vmatmul.mubr.f32.vlgmr.msra.gmra.mxu1 %v10087_v53 }
 0x540   :  { %8035 = vmatprep.subr.mxu1 %v10676_v5  ;;  %7987 = vmatpush3.msra.mxu0 %v9983_v50 }
 0x541   :  { %8036 = vmatpush3.msra.mxu1 %v9935_v28  ;;  %7988 = vmatprep.subr.mxu0 %v10676_v5 }
 0x542   :  { %8037 = vmatprep.subr.mxu1 %v10676_v5  ;;  %7989 = vmatpush3.msra.mxu0 %v9997_v31 }
 0x543   :  { %8038 = vmatpush3.msra.mxu1 %v9944_v4  ;;  %7990 = vmatprep.subr.mxu0 %v10676_v5 }
 0x544   :  { %8039 = vmatprep.subr.mxu1 %v10676_v5  ;;  %7991 = vmatpush3.msra.mxu0 %v10014_v47 }
 0x545   :  { %8040 = vmatpush3.msra.mxu1 %v9956_v51  ;;  %7992 = vmatprep.subr.mxu0 %v10676_v5 }
 0x546   :  { %8041 = vmatprep.subr.mxu1 %v10676_v5  ;;  %7993 = vmatpush3.msra.mxu0 %v10028_v54 }
 0x547   :  { %7994 = vmatprep.mubr.msk.f32.mxu0 %vm8344_vm8, %v10676_v5  ;;  %8042 = vmatpush3.msra.mxu1 %v9965_v8 }
 0x548   :  { %7995 = vmatmul.mubr.f32.vlgmr.msra.gmra.mxu0 %v4837_v19  ;;  %8016 = vmatprep.subr.mxu0 %v10676_v5 }
 0x549   :  { %8043 = vmatprep.subr.mxu1 %v10676_v5  ;;  %8017 = vmatpush3.msra.mxu0 %v9954_v41  ;;  %v5413_v41 = vsub.f32 %v10170_v63, %v5412_v12 }
 0x54a   :  { %8044 = vmatpush3.msra.mxu1 %v9983_v50  ;;  %8018 = vmatprep.subr.mxu0 %v10676_v5 }
 0x54b   :  { %8045 = vmatprep.subr.mxu1 %v10676_v5  ;;  %8019 = vmatpush3.msra.mxu0 %v9963_v10 }
 0x54c   :  { %8046 = vmatpush3.msra.mxu1 %v9997_v31  ;;  %8020 = vmatprep.subr.mxu0 %v10676_v5 }
 0x54d   :  { %8047 = vmatprep.subr.mxu1 %v10676_v5  ;;  %8021 = vmatpush3.msra.mxu0 %v9977_v48  ;;  %v5414_v48 = vand.u32 4294901760, %v5413_v41 }
 0x54e   :  { %8048 = vmatpush3.msra.mxu1 %v10014_v47  ;;  %8022 = vmatprep.subr.mxu0 %v10676_v5 }
 0x54f   :  { %8049 = vmatprep.subr.mxu1 %v10676_v5  ;;  %8023 = vmatpush3.msra.mxu0 %v9990_v37 }
 0x550   :  { %8050 = vmatpush3.msra.mxu1 %v10028_v54  ;;  %8051 = vmatprep.mubr.msk.f32.mxu1 %vm8344_vm8, %v10676_v5 }
 0x551   :  { %8024 = vmatprep.subr.mxu0 %v10676_v5  ;;  %8052 = vmatmul.mubr.f32.vlgmr.msra.gmra.mxu1 %v4835_v13  ;;  %v10427_v13 = vand.u32 4294901760, %v5864_v6 }
 0x552   :  { %8073 = vmatprep.subr.mxu1 %v10676_v5  ;;  %8025 = vmatpush3.msra.mxu0 %v10012_v55  ;;  %v5454_v55 = vand.u32 4294901760, %v10258_v32 }
 0x553   :  { %8074 = vmatpush3.msra.mxu1 %v9935_v28  ;;  %8026 = vmatprep.subr.mxu0 %v10676_v5  ;;  %v5300_v28 = vld [vmem:[%s10644_s6 + $0x98] sm:$0xff]  ;;  %v10433_v19 = vsub.f32 %v5864_v6, %v10427_v13 }
 0x554   :  { %8075 = vmatprep.subr.mxu1 %v10676_v5  ;;  %8027 = vmatpush3.msra.mxu0 %v10026_v45 }
 0x555   :  { %8076 = vmatpush3.msra.mxu1 %v9944_v4  ;;  %8028 = vmatprep.subr.mxu0 %v10676_v5  ;;  %v10193_v4 = vsub.f32 %v5302_v29, %v10172_v17  ;;  %v10444_v29 = vsub.f32 %v5863_v2, %v10435_v42 }
 0x556   :  { %8077 = vmatprep.subr.mxu1 %v10676_v5  ;;  %8029 = vmatpush3.msra.mxu0 %v10041_v59  ;;  %v5455_v59 = vsub.f32 %v10258_v32, %v5454_v55 }
 0x557   :  { %8078 = vmatpush3.msra.mxu1 %v9956_v51  ;;  %8030 = vmatprep.subr.mxu0 %v10676_v5  ;;  %v10200_v51 = vand.u32 4294901760, %v5300_v28 }
 0x558   :  { %8079 = vmatprep.subr.mxu1 %v10676_v5  ;;  %8031 = vmatpush3.msra.mxu0 %v10053_v22  ;;  %v10304_v22 = vand.u32 4294901760, %v5308_v40  ;;  %v5456_v3 = vand.u32 4294901760, %v5455_v59 }
 0x559   :  { %8032 = vmatprep.mubr.msk.f32.mxu0 %vm8344_vm8, %v10676_v5  ;;  %8080 = vmatpush3.msra.mxu1 %v9965_v8  ;;  %v5419_v8 = vand.u32 4294901760, %v10179_v57 }
 0x55a   :  { %8033 = vmatmul.mubr.f32.vlgmr.msra.gmra.mxu0 %v10096_v44  ;;  %8054 = vmatprep.subr.mxu0 %v10676_v5 }
 0x55b   :  { %8081 = vmatprep.subr.mxu1 %v10676_v5  ;;  %8055 = vmatpush3.msra.mxu0 %v4862_v9  ;;  %v5426_v9 = vand.u32 4294901760, %v10193_v4  ;;  %v5420_v10 = vsub.f32 %v10179_v57, %v5419_v8 }
 0x55c   :  { %8082 = vmatpush3.msra.mxu1 %v9983_v50  ;;  %8056 = vmatprep.subr.mxu0 %v10676_v5  ;;  %v10229_v50 = vsub.f32 %v5300_v28, %v10200_v51  ;;  %v10460_v28 = vand.u32 4294901760, %v5861_v60 }
 0x55d   :  { %8083 = vmatprep.subr.mxu1 %v10676_v5  ;;  %8057 = vmatpush3.msra.mxu0 %v4869_v26  ;;  %v5433_v26 = vand.u32 4294901760, %v10207_v27  ;;  %v5421_v37 = vand.u32 4294901760, %v5420_v10  ;;  %v5858_v10 = vld [vmem:[%s10645_s8 + $0x8] sm:$0xff] }
 0x55e   :  { %8084 = vmatpush3.msra.mxu1 %v9997_v31  ;;  %8058 = vmatprep.subr.mxu0 %v10676_v5  ;;  %v10243_v31 = vsub.f32 %v5299_v58, %v10214_v61 }
 0x55f   :  { %8085 = vmatprep.subr.mxu1 %v10676_v5  ;;  %8059 = vmatpush3.msra.mxu0 %v4876_v56  ;;  %v5427_v56 = vsub.f32 %v10193_v4, %v5426_v9 }
 0x560   :  { %8086 = vmatpush3.msra.mxu1 %v10014_v47  ;;  %8060 = vmatprep.subr.mxu0 %v10676_v5  ;;  %v5440_v47 = vand.u32 4294901760, %v10229_v50 }
 0x561   :  { %8087 = vmatprep.subr.mxu1 %v10676_v5  ;;  %8061 = vmatpush3.msra.mxu0 %v4883_v38  ;;  %v5434_v38 = vsub.f32 %v10207_v27, %v5433_v26  ;;  %v5428_v46 = vand.u32 4294901760, %v5427_v56 }
 0x562   :  { %8088 = vmatpush3.msra.mxu1 %v10028_v54  ;;  %8089 = vmatprep.mubr.msk.f32.mxu1 %vm8344_vm8, %v10676_v5  ;;  %v5447_v54 = vand.u32 4294901760, %v10243_v31  ;;  %v5441_v36 = vsub.f32 %v10229_v50, %v5440_v47 }
 0x563   :  { %8062 = vmatprep.subr.mxu0 %v10676_v5  ;;  %8090 = vmatmul.mubr.f32.vlgmr.msra.gmra.mxu1 %v10087_v53 }
 0x564   :  { %8111 = vmatprep.subr.mxu1 %v10676_v5  ;;  %8063 = vmatpush3.msra.mxu0 %v4890_v23  ;;  %v5435_v23 = vand.u32 4294901760, %v5434_v38  ;;  %v5448_v45 = vsub.f32 %v10243_v31, %v5447_v54  ;;  %v5442_v1 = vand.u32 4294901760, %v5441_v36 }
 0x565   :  { %8112 = vmatpush3.msra.mxu1 %v5414_v48  ;;  %8064 = vmatprep.subr.mxu0 %v10676_v5  ;;  %v10501_v48 = vand.u32 4294901760, %v5858_v10 }
 0x566   :  { %8113 = vmatprep.subr.mxu1 %v10676_v5  ;;  %8065 = vmatpush3.msra.mxu0 %v4897_v30  ;;  %v5461_v30 = vand.u32 4294901760, %v10270_v14 }
 0x567   :  { %8114 = vmatpush3.msra.mxu1 %v5421_v37  ;;  %8066 = vmatprep.subr.mxu0 %v10676_v5  ;;  %v10512_v38 = vsub.f32 %v5858_v10, %v10501_v48 }
 0x568   :  { %8115 = vmatprep.subr.mxu1 %v10676_v5  ;;  %8067 = vmatpush3.msra.mxu0 %v4904_v15  ;;  %v5449_v15 = vand.u32 4294901760, %v5448_v45  ;;  %v5462_v33 = vsub.f32 %v10270_v14, %v5461_v30 }
 0x569   :  { %8116 = vmatpush3.msra.mxu1 %v5428_v46  ;;  %8068 = vmatprep.subr.mxu0 %v10676_v5 }
 0x56a   :  { %8117 = vmatprep.subr.mxu1 %v10676_v5  ;;  %8069 = vmatpush3.msra.mxu0 %v4911_v11  ;;  %v5463_v7 = vand.u32 4294901760, %v5462_v33  ;;  %v10313_v11 = vsub.f32 %v5308_v40, %v10304_v22 }
 0x56b   :  { %8070 = vmatprep.mubr.msk.f32.mxu0 %vm8344_vm8, %v10676_v5  ;;  %8118 = vmatpush3.msra.mxu1 %v5435_v23  ;;  %v6019_v23 = vand.u32 4294901760, %v10512_v38 }
 0x56c   :  { %8071 = vmatmul.mubr.f32.vlgmr.msra.gmra.mxu0 %v10087_v53  ;;  %8092 = vmatprep.subr.mxu0 %v10676_v5  ;;  %v5385_v0 = vand.u32 4294901760, %v10313_v11 }
 0x56d   :  { %8119 = vmatprep.subr.mxu1 %v10676_v5  ;;  %8093 = vmatpush3.msra.mxu0 %v10151_v24 }
 0x56e   :  { %8120 = vmatpush3.msra.mxu1 %v5442_v1  ;;  %8094 = vmatprep.subr.mxu0 %v10676_v5  ;;  %v5386_v21 = vsub.f32 %v10313_v11, %v5385_v0 }
 0x56f   :  { %8121 = vmatprep.subr.mxu1 %v10676_v5  ;;  %8095 = vmatpush3.msra.mxu0 %v10160_v43 }
 0x570   :  { %8122 = vmatpush3.msra.mxu1 %v5449_v15  ;;  %8096 = vmatprep.subr.mxu0 %v10676_v5  ;;  %v5387_v20 = vand.u32 4294901760, %v5386_v21  ;;  %v6020_v15 = vsub.f32 %v10512_v38, %v6019_v23 }
 0x571   :  { %8123 = vmatprep.subr.mxu1 %v10676_v5  ;;  %8097 = vmatpush3.msra.mxu0 %v10172_v17 }
 0x572   :  { %8124 = vmatpush3.msra.mxu1 %v5456_v3  ;;  %8098 = vmatprep.subr.mxu0 %v10676_v5 }
 0x573   :  { %8125 = vmatprep.subr.mxu1 %v10676_v5  ;;  %8099 = vmatpush3.msra.mxu0 %v10181_v35 }
 0x574   :  { %8126 = vmatpush3.msra.mxu1 %v5463_v7  ;;  %8127 = vmatprep.mubr.msk.f32.mxu1 %vm8344_vm8, %v10676_v5 }
 0x575   :  { %8100 = vmatprep.subr.mxu0 %v10676_v5  ;;  %8128 = vmatmul.mubr.f32.vlgmr.msra.gmra.mxu1 %v10304_v22 }
 0x576   :  { %8149 = vmatprep.subr.mxu1 %v10676_v5  ;;  %8101 = vmatpush3.msra.mxu0 %v10200_v51 }
 0x577   :  { %8150 = vmatpush3.msra.mxu1 %v10151_v24  ;;  %8102 = vmatprep.subr.mxu0 %v10676_v5 }
 0x578   :  { %8151 = vmatprep.subr.mxu1 %v10676_v5  ;;  %8103 = vmatpush3.msra.mxu0 %v10214_v61 }
 0x579   :  { %8152 = vmatpush3.msra.mxu1 %v10160_v43  ;;  %8104 = vmatprep.subr.mxu0 %v10676_v5 }
 0x57a   :  { %8153 = vmatprep.subr.mxu1 %v10676_v5  ;;  %8105 = vmatpush3.msra.mxu0 %v10231_v25 }
 0x57b   :  { %8154 = vmatpush3.msra.mxu1 %v10172_v17  ;;  %8106 = vmatprep.subr.mxu0 %v10676_v5 }
 0x57c   :  { %8155 = vmatprep.subr.mxu1 %v10676_v5  ;;  %8107 = vmatpush3.msra.mxu0 %v10245_v18 }
 0x57d   :  { %8108 = vmatprep.mubr.msk.f32.mxu0 %vm8344_vm8, %v10676_v5  ;;  %8156 = vmatpush3.msra.mxu1 %v10181_v35 }
 0x57e   :  { %8109 = vmatmul.mubr.f32.vlgmr.msra.gmra.mxu0 %v5387_v20  ;;  %8130 = vmatprep.subr.mxu0 %v10676_v5 }
 0x57f   :  { %8157 = vmatprep.subr.mxu1 %v10676_v5  ;;  %8131 = vmatpush3.msra.mxu0 %v10170_v63 }
 0x580   :  { %8158 = vmatpush3.msra.mxu1 %v10200_v51  ;;  %8132 = vmatprep.subr.mxu0 %v10676_v5 }
 0x581   :  { %8159 = vmatprep.subr.mxu1 %v10676_v5  ;;  %8133 = vmatpush3.msra.mxu0 %v10179_v57  ;;  %v5984_v57 = vand.u32 4294901760, %v10444_v29 }
 0x582   :  { %8160 = vmatpush3.msra.mxu1 %v10214_v61  ;;  %8134 = vmatprep.subr.mxu0 %v10676_v5 }
 0x583   :  { %8161 = vmatprep.subr.mxu1 %v10676_v5  ;;  %8135 = vmatpush3.msra.mxu0 %v10193_v4 }
 0x584   :  { %8162 = vmatpush3.msra.mxu1 %v10231_v25  ;;  %8136 = vmatprep.subr.mxu0 %v10676_v5 }
 0x585   :  { %8163 = vmatprep.subr.mxu1 %v10676_v5  ;;  %8137 = vmatpush3.msra.mxu0 %v10207_v27  ;;  %v10472_v27 = vsub.f32 %v5861_v60, %v10460_v28 }
 0x586   :  { %8164 = vmatpush3.msra.mxu1 %v10245_v18  ;;  %8165 = vmatprep.mubr.msk.f32.mxu1 %vm8344_vm8, %v10676_v5 }
 0x587   :  { %8138 = vmatprep.subr.mxu0 %v10676_v5  ;;  %8166 = vmatmul.mubr.f32.vlgmr.msra.gmra.mxu1 %v5385_v0  ;;  %v5998_v62 = vand.u32 4294901760, %v10472_v27 }
 0x588   :  { %8187 = vmatprep.subr.mxu1 %v10676_v5  ;;  %8139 = vmatpush3.msra.mxu0 %v10229_v50 }
 0x589   :  { %8188 = vmatpush3.msra.mxu1 %v10151_v24  ;;  %8140 = vmatprep.subr.mxu0 %v10676_v5  ;;  %v5977_v24 = vand.u32 4294901760, %v10433_v19 }
 0x58a   :  { %8189 = vmatprep.subr.mxu1 %v10676_v5  ;;  %8141 = vmatpush3.msra.mxu0 %v10243_v31  ;;  %v5999_v31 = vsub.f32 %v10472_v27, %v5998_v62 }
 0x58b   :  { %8190 = vmatpush3.msra.mxu1 %v10160_v43  ;;  %8142 = vmatprep.subr.mxu0 %v10676_v5  ;;  %v10446_v43 = vand.u32 4294901760, %v5862_v16 }
 0x58c   :  { %8191 = vmatprep.subr.mxu1 %v10676_v5  ;;  %8143 = vmatpush3.msra.mxu0 %v10258_v32  ;;  %v6000_v32 = vand.u32 4294901760, %v5999_v31 }
 0x58d   :  { %8192 = vmatpush3.msra.mxu1 %v10172_v17  ;;  %8144 = vmatprep.subr.mxu0 %v10676_v5  ;;  %v5978_v17 = vsub.f32 %v10433_v19, %v5977_v24 }
 0x58e   :  { %8193 = vmatprep.subr.mxu1 %v10676_v5  ;;  %8145 = vmatpush3.msra.mxu0 %v10270_v14 }
 0x58f   :  { %8146 = vmatprep.mubr.msk.f32.mxu0 %vm8344_vm8, %v10676_v5  ;;  %8194 = vmatpush3.msra.mxu1 %v10181_v35  ;;  %v10458_v35 = vsub.f32 %v5862_v16, %v10446_v43  ;;  %v5979_v58 = vand.u32 4294901760, %v5978_v17 }
 0x590   :  { %8147 = vmatmul.mubr.f32.vlgmr.msra.gmra.mxu0 %v10313_v11  ;;  %8168 = vmatprep.subr.mxu0 %v10676_v5 }
 0x591   :  { %8195 = vmatprep.subr.mxu1 %v10676_v5  ;;  %8169 = vmatpush3.msra.mxu0 %v5412_v12  ;;  %v5860_v12 = vld [vmem:[%s10645_s8 + $0x18] sm:$0xff] }
 0x592   :  { %8196 = vmatpush3.msra.mxu1 %v10200_v51  ;;  %8170 = vmatprep.subr.mxu0 %v10676_v5  ;;  %v5985_v51 = vsub.f32 %v10444_v29, %v5984_v57  ;;  %v10475_v49 = vand.u32 4294901760, %v5860_v12 }
 0x593   :  { %8197 = vmatprep.subr.mxu1 %v10676_v5  ;;  %8171 = vmatpush3.msra.mxu0 %v5419_v8  ;;  %v5991_v8 = vand.u32 4294901760, %v10458_v35 }
 0x594   :  { %8198 = vmatpush3.msra.mxu1 %v10214_v61  ;;  %8172 = vmatprep.subr.mxu0 %v10676_v5  ;;  %v5859_v61 = vld [vmem:[%s10645_s8 + $0x10] sm:$0xff]  ;;  %v5986_v41 = vand.u32 4294901760, %v5985_v51 }
 0x595   :  { %8199 = vmatprep.subr.mxu1 %v10676_v5  ;;  %8173 = vmatpush3.msra.mxu0 %v5426_v9  ;;  %v5992_v9 = vsub.f32 %v10458_v35, %v5991_v8  ;;  %v10485_v50 = vand.u32 4294901760, %v5859_v61 }
 0x596   :  { %8200 = vmatpush3.msra.mxu1 %v10231_v25  ;;  %8174 = vmatprep.subr.mxu0 %v10676_v5  ;;  %v10489_v25 = vsub.f32 %v5860_v12, %v10475_v49 }
 0x597   :  { %8201 = vmatprep.subr.mxu1 %v10676_v5  ;;  %8175 = vmatpush3.msra.mxu0 %v5433_v26  ;;  %v5993_v26 = vand.u32 4294901760, %v5992_v9 }
 0x598   :  { %8202 = vmatpush3.msra.mxu1 %v10245_v18  ;;  %8203 = vmatprep.mubr.msk.f32.mxu1 %vm8344_vm8, %v10676_v5  ;;  %v10499_v18 = vsub.f32 %v5859_v61, %v10485_v50  ;;  %v6005_v56 = vand.u32 4294901760, %v10489_v25 }
 0x599   :  { %8176 = vmatprep.subr.mxu0 %v10676_v5  ;;  %8204 = vmatmul.mubr.f32.vlgmr.msra.gmra.mxu1 %v10304_v22 }
 0x59a   :  { %8177 = vmatpush3.msra.mxu0 %v5440_v47  ;;  %8184 = vmatprep.mubr.msk.f32.mxu0 %vm8344_vm8, %v10676_v5  ;;  %v5857_v47 = vld [vmem:[%s10645_s8] sm:$0xff]  ;;  %v6012_v37 = vand.u32 4294901760, %v10499_v18  ;;  %v6006_v46 = vsub.f32 %v10489_v25, %v6005_v56 }
 0x59b   :  { %8178 = vmatprep.subr.mxu0 %v10676_v5  ;;  %8225 = vmatprep.subr.mxu1 %v10676_v5 }
 0x59c   :  { %8179 = vmatpush3.msra.mxu0 %v5447_v54  ;;  %8241 = vmatprep.mubr.msk.f32.mxu1 %vm8344_vm8, %v10676_v5  ;;  %v10514_v54 = vand.u32 4294901760, %v5857_v47  ;;  %v6007_v40 = vand.u32 4294901760, %v6006_v46 }
 0x59d   :  { %8180 = vmatprep.subr.mxu0 %v10676_v5  ;;  %8226 = vmatpush3.msra.mxu1 %v5979_v58 }
 0x59e   :  { %8181 = vmatpush3.msra.mxu0 %v5454_v55  ;;  %8227 = vmatprep.subr.mxu1 %v10676_v5  ;;  %v6013_v55 = vsub.f32 %v10499_v18, %v6012_v37  ;;  %v10527_v45 = vsub.f32 %v5857_v47, %v10514_v54 }
 0x59f   :  { %8182 = vmatprep.subr.mxu0 %v10676_v5  ;;  %8228 = vmatpush3.msra.mxu1 %v5986_v41 }
 0x5a0   :  { %8183 = vmatpush3.msra.mxu0 %v5461_v30  ;;  %8229 = vmatprep.subr.mxu1 %v10676_v5  ;;  %v6014_v59 = vand.u32 4294901760, %v6013_v55  ;;  %v6026_v33 = vand.u32 4294901760, %v10527_v45 }
 0x5a1   :  { %8185 = vmatmul.mubr.f32.vlgmr.msra.gmra.mxu0 %v10304_v22  ;;  %8206 = vmatprep.subr.mxu0 %v10676_v5  ;;  %v6021_v22 = vand.u32 4294901760, %v6020_v15 }
 0x5a2   :  { %8222 = vmatprep.mubr.msk.f32.mxu0 %vm8344_vm8, %v10676_v5  ;;  %8207 = vmatpush3.msra.mxu0 %v10427_v13  ;;  %v6027_v3 = vsub.f32 %v10527_v45, %v6026_v33 }
 0x5a3   :  { %8208 = vmatprep.subr.mxu0 %v10676_v5  ;;  %8230 = vmatpush3.msra.mxu1 %v5993_v26 }
 0x5a4   :  { %8209 = vmatpush3.msra.mxu0 %v10435_v42  ;;  %8231 = vmatprep.subr.mxu1 %v10676_v5  ;;  %v6028_v7 = vand.u32 4294901760, %v6027_v3 }
 0x5a5   :  { %8210 = vmatprep.subr.mxu0 %v10676_v5  ;;  %8232 = vmatpush3.msra.mxu1 %v6000_v32 }
 0x5a6   :  { %8211 = vmatpush3.msra.mxu0 %v10446_v43  ;;  %8233 = vmatprep.subr.mxu1 %v10676_v5 }
 0x5a7   :  { %8212 = vmatprep.subr.mxu0 %v10676_v5  ;;  %8234 = vmatpush3.msra.mxu1 %v6007_v40 }
 0x5a8   :  { %8213 = vmatpush3.msra.mxu0 %v10460_v28  ;;  %8235 = vmatprep.subr.mxu1 %v10676_v5 }
 0x5a9   :  { %8214 = vmatprep.subr.mxu0 %v10676_v5  ;;  %8236 = vmatpush3.msra.mxu1 %v6014_v59 }
 0x5aa   :  { %8215 = vmatpush3.msra.mxu0 %v10475_v49  ;;  %8237 = vmatprep.subr.mxu1 %v10676_v5 }
 0x5ab   :  { %8216 = vmatprep.subr.mxu0 %v10676_v5  ;;  %8238 = vmatpush3.msra.mxu1 %v6021_v22 }
 0x5ac   :  { %8217 = vmatpush3.msra.mxu0 %v10485_v50  ;;  %8239 = vmatprep.subr.mxu1 %v10676_v5 }
 0x5ad   :  { %8218 = vmatprep.subr.mxu0 %v10676_v5  ;;  %8240 = vmatpush3.msra.mxu1 %v6028_v7 }
 0x5ae   :  { %8219 = vmatpush3.msra.mxu0 %v10501_v48  ;;  %8263 = vmatprep.subr.mxu1 %v10676_v5 }
 0x5af   :  { %8220 = vmatprep.subr.mxu0 %v10676_v5 }
 0x5b0   :  { %8221 = vmatpush3.msra.mxu0 %v10514_v54 }
 0x5b1   :  { %8244 = vmatprep.subr.mxu0 %v10676_v5 }
 0x5cb   :  { %v4408_v52 = vpop.f32.mrf.mxu1 }
 0x5cd   :  { %v7901_v39 = vpop.f32.mrf.mxu1 }
 0x5d3   :  { %v4297_v53 = vpop.f32.mrf.mxu0 }
 0x5d4   :  { %v4409_v34 = vadd.f32 %v4408_v52, %v4297_v53 }
 0x5d5   :  { %v7882_v44 = vpop.f32.mrf.mxu0 }
 0x5db   :  { %v4577_v63 = vpop.f32.mrf.mxu1 }
 0x5dd   :  { %v7939_v4 = vpop.f32.mrf.mxu1 }
 0x5e4   :  { %v4496_v14 = vpop.f32.mrf.mxu0 }
 0x5e5   :  { %v4497_v36 = vadd.f32 %v4496_v14, %v4409_v34 }
 0x5e6   :  { %v7920_v30 = vpop.f32.mrf.mxu0 }
 0x5e7   :  { %v4578_v1 = vadd.f32 %v4577_v63, %v4497_v36 }
 0x5ed   :  { %v4751_v11 = vpop.f32.mrf.mxu1 }
 0x5ef   :  { %v7977_v0 = vpop.f32.mrf.mxu1 }
 0x5f6   :  { %v4672_v21 = vpop.f32.mrf.mxu0 }
 0x5f7   :  { %v4673_v20 = vadd.f32 %v4672_v21, %v4578_v1  ;;  %v6440_v21 = vld [vmem:[%s10646_s7] ss:$0 sm:$0xff] }
 0x5f8   :  { %v7958_v52 = vpop.f32.mrf.mxu0 }
 0x5f9   :  { %v4752_v39 = vadd.f32 %v4751_v11, %v4673_v20 }
 0x5ff   :  { %v4950_v53 = vpop.f32.mrf.mxu1 }
 0x601   :  { %v8015_v34 = vpop.f32.mrf.mxu1 }
 0x608   :  { %v4839_v6 = vpop.f32.mrf.mxu0 }
 0x609   :  { %v4840_v44 = vadd.f32 %v4839_v6, %v4752_v39 }
 0x60a   :  { %v7996_v2 = vpop.f32.mrf.mxu0 }
 0x60b   :  { %v4951_v16 = vadd.f32 %v4950_v53, %v4840_v44 }
 0x611   :  { %v5119_v60 = vpop.f32.mrf.mxu1 }
 0x613   :  { %v8053_v63 = vpop.f32.mrf.mxu1 }
 0x61a   :  { %v5038_v17 = vpop.f32.mrf.mxu0 }
 0x61b   :  { %v5039_v12 = vadd.f32 %v5038_v17, %v4951_v16 }
 0x61c   :  { %v8034_v4 = vpop.f32.mrf.mxu0 }
 0x61d   :  { %v5120_v58 = vadd.f32 %v5119_v60, %v5039_v12 }
 0x623   :  { %v5293_v51 = vpop.f32.mrf.mxu1 }
 0x625   :  { %v8091_v61 = vpop.f32.mrf.mxu1 }
 0x62c   :  { %v5214_v41 = vpop.f32.mrf.mxu0 }
 0x62d   :  { %v5215_v9 = vadd.f32 %v5214_v41, %v5120_v58 }
 0x62e   :  { %v8072_v10 = vpop.f32.mrf.mxu0 }
 0x62f   :  { %v5294_v26 = vadd.f32 %v5293_v51, %v5215_v9 }
 0x635   :  { %v5500_v31 = vpop.f32.mrf.mxu1 }
 0x637   :  { %v8129_v47 = vpop.f32.mrf.mxu1 }
 0x63e   :  { %v5389_v32 = vpop.f32.mrf.mxu0 }
 0x63f   :  { %v5501_v1 = vadd.f32 %v5500_v31, %v5389_v32 }
 0x640   :  { %v8110_v14 = vpop.f32.mrf.mxu0 }
 0x647   :  { %v5669_v46 = vpop.f32.mrf.mxu1 }
 0x649   :  { %v8167_v36 = vpop.f32.mrf.mxu1 }
 0x650   :  { %v5588_v55 = vpop.f32.mrf.mxu0 }
 0x651   :  { %v5589_v15 = vadd.f32 %v5588_v55, %v5501_v1 }
 0x652   :  { %v8148_v30 = vpop.f32.mrf.mxu0 }
 0x653   :  { %v5670_v22 = vadd.f32 %v5669_v46, %v5589_v15 }
 0x659   :  { %v5843_v40 = vpop.f32.mrf.mxu1 }
 0x65b   :  { %v8205_v59 = vpop.f32.mrf.mxu1 }
 0x661   :  { %v5764_v3 = vpop.f32.mrf.mxu0 }
 0x662   :  { %v5765_v7 = vadd.f32 %v5764_v3, %v5670_v22 }
 0x663   :  { %v8186_v11 = vpop.f32.mrf.mxu0 }
 0x664   :  { %v5844_v0 = vadd.f32 %v5843_v40, %v5765_v7 }
 0x666   :  { %v5847_v20 = vadd.f32 %v5844_v0, %v5294_v26 }
 0x668   :  { %v5855_v52 = vadd.f32 %v6440_v21, %v5847_v20 }
 0x66a   :  { %v5856_v39 = vmax.f32 %v5855_v52, 0.0 }
 0x66c   :  { %v5873_v53 = vsel %vm1471_vm9, %v5856_v39, 0 }
 0x66d   :  { %v10548_v34 = vand.u32 4294901760, %v5873_v53 }
 0x66f   :  { %v5949_v6 = vsub.f32 %v5873_v53, %v10548_v34  ;;  %8242 = vmatmul.mubr.f32.vlgmr.msra.gmra.mxu1 %v10548_v34 }
 0x670   :  { %8264 = vmatpush3.msra.mxu1 %v10427_v13  ;;  %8279 = vmatprep.mubr.msk.f32.mxu1 %vm8344_vm8, %v10676_v5 }
 0x671   :  { %8265 = vmatprep.subr.mxu1 %v10676_v5  ;;  %v5950_v44 = vand.u32 4294901760, %v5949_v6 }
 0x672   :  { %8266 = vmatpush3.msra.mxu1 %v10435_v42 }
 0x673   :  { %8267 = vmatprep.subr.mxu1 %v10676_v5  ;;  %v5951_v2 = vsub.f32 %v5949_v6, %v5950_v44 }
 0x674   :  { %8268 = vmatpush3.msra.mxu1 %v10446_v43 }
 0x675   :  { %8269 = vmatprep.subr.mxu1 %v10676_v5  ;;  %v5952_v16 = vand.u32 4294901760, %v5951_v2 }
 0x676   :  { %8270 = vmatpush3.msra.mxu1 %v10460_v28 }
 0x677   :  { %8271 = vmatprep.subr.mxu1 %v10676_v5  ;;  %8223 = vmatmul.mubr.f32.vlgmr.msra.gmra.mxu0 %v5952_v16 }
 0x678   :  { %8245 = vmatpush3.msra.mxu0 %v10433_v19  ;;  %8272 = vmatpush3.msra.mxu1 %v10475_v49 }
 0x679   :  { %8246 = vmatprep.subr.mxu0 %v10676_v5  ;;  %8273 = vmatprep.subr.mxu1 %v10676_v5 }
 0x67a   :  { %8247 = vmatpush3.msra.mxu0 %v10444_v29  ;;  %8274 = vmatpush3.msra.mxu1 %v10485_v50 }
 0x67b   :  { %8248 = vmatprep.subr.mxu0 %v10676_v5  ;;  %8275 = vmatprep.subr.mxu1 %v10676_v5 }
 0x67c   :  { %8249 = vmatpush3.msra.mxu0 %v10458_v35  ;;  %8276 = vmatpush3.msra.mxu1 %v10501_v48 }
 0x67d   :  { %8250 = vmatprep.subr.mxu0 %v10676_v5  ;;  %8277 = vmatprep.subr.mxu1 %v10676_v5 }
 0x67e   :  { %8251 = vmatpush3.msra.mxu0 %v10472_v27  ;;  %8278 = vmatpush3.msra.mxu1 %v10514_v54 }
 0x67f   :  { %8252 = vmatprep.subr.mxu0 %v10676_v5  ;;  %8280 = vmatmul.mubr.f32.vlgmr.msra.gmra.mxu1 %v5950_v44 }
 0x680   :  { %8301 = vmatprep.subr.mxu1 %v10676_v5  ;;  %8253 = vmatpush3.msra.mxu0 %v10489_v25 }
 0x681   :  { %8302 = vmatpush3.msra.mxu1 %v10427_v13  ;;  %8254 = vmatprep.subr.mxu0 %v10676_v5 }
 0x682   :  { %8303 = vmatprep.subr.mxu1 %v10676_v5  ;;  %8255 = vmatpush3.msra.mxu0 %v10499_v18 }
 0x683   :  { %8304 = vmatpush3.msra.mxu1 %v10435_v42  ;;  %8256 = vmatprep.subr.mxu0 %v10676_v5 }
 0x684   :  { %8305 = vmatprep.subr.mxu1 %v10676_v5  ;;  %8257 = vmatpush3.msra.mxu0 %v10512_v38 }
 0x685   :  { %8306 = vmatpush3.msra.mxu1 %v10446_v43  ;;  %8258 = vmatprep.subr.mxu0 %v10676_v5 }
 0x686   :  { %8307 = vmatprep.subr.mxu1 %v10676_v5  ;;  %8259 = vmatpush3.msra.mxu0 %v10527_v45 }
 0x687   :  { %8260 = vmatprep.mubr.msk.f32.mxu0 %vm8344_vm8, %v10676_v5  ;;  %8308 = vmatpush3.msra.mxu1 %v10460_v28  ;;  %v6441_v28 = vld [vmem:[%s10647_s9] ss:$0 sm:$0xff] }
 0x688   :  { %8261 = vmatmul.mubr.f32.vlgmr.msra.gmra.mxu0 %v5949_v6  ;;  %8282 = vmatprep.subr.mxu0 %v10676_v5 }
 0x689   :  { %8309 = vmatprep.subr.mxu1 %v10676_v5  ;;  %8283 = vmatpush3.msra.mxu0 %v5977_v24 }
 0x68a   :  { %8310 = vmatpush3.msra.mxu1 %v10475_v49  ;;  %8284 = vmatprep.subr.mxu0 %v10676_v5 }
 0x68b   :  { %8311 = vmatprep.subr.mxu1 %v10676_v5  ;;  %8285 = vmatpush3.msra.mxu0 %v5984_v57 }
 0x68c   :  { %8312 = vmatpush3.msra.mxu1 %v10485_v50  ;;  %8286 = vmatprep.subr.mxu0 %v10676_v5 }
 0x68d   :  { %8313 = vmatprep.subr.mxu1 %v10676_v5  ;;  %8287 = vmatpush3.msra.mxu0 %v5991_v8 }
 0x68e   :  { %8314 = vmatpush3.msra.mxu1 %v10501_v48  ;;  %8288 = vmatprep.subr.mxu0 %v10676_v5 }
 0x68f   :  { %8315 = vmatprep.subr.mxu1 %v10676_v5  ;;  %8289 = vmatpush3.msra.mxu0 %v5998_v62 }
 0x690   :  { %8316 = vmatpush3.msra.mxu1 %v10514_v54  ;;  %8317 = vmatprep.mubr.msk.f32.mxu1 %vm8344_vm8, %v10676_v5 }
 0x691   :  { %8290 = vmatprep.subr.mxu0 %v10676_v5  ;;  %8318 = vmatmul.mubr.f32.vlgmr.msra.gmra.mxu1 %v10548_v34 }
 0x692   :  { %8291 = vmatpush3.msra.mxu0 %v6005_v56  ;;  %8298 = vmatprep.mubr.msk.f32.mxu0 %vm8344_vm8, %v10676_v5 }
 0x693   :  { %8292 = vmatprep.subr.mxu0 %v10676_v5 }
 0x694   :  { %8293 = vmatpush3.msra.mxu0 %v6012_v37 }
 0x695   :  { %8294 = vmatprep.subr.mxu0 %v10676_v5 }
 0x696   :  { %8295 = vmatpush3.msra.mxu0 %v6019_v23 }
 0x697   :  { %8296 = vmatprep.subr.mxu0 %v10676_v5 }
 0x698   :  { %8297 = vmatpush3.msra.mxu0 %v6026_v33 }
 0x699   :  { %8299 = vmatmul.mubr.f32.vlgmr.msra.gmra.mxu0 %v10548_v34 }
 0x72f   :  { %v6065_v13 = vpop.f32.mrf.mxu1 }
 0x731   :  { %v8243_v19 = vpop.f32.mrf.mxu1 }
 0x737   :  { %v5954_v42 = vpop.f32.mrf.mxu0 }
 0x738   :  { %v5955_v8 = vadd.f32 %v6441_v28, %v5954_v42 }
 0x739   :  { %v8224_v24 = vpop.f32.mrf.mxu0 }
 0x73a   :  { %v6066_v5 = vadd.f32 %v6065_v13, %v5955_v8 }
 0x73f   :  { %v6234_v29 = vpop.f32.mrf.mxu1 }
 0x741   :  { %v8281_v43 = vpop.f32.mrf.mxu1 }
 0x748   :  { %v6153_v57 = vpop.f32.mrf.mxu0 }
 0x749   :  { %v6154_v62 = vadd.f32 %v6153_v57, %v6066_v5 }
 0x74a   :  { %v8262_v35 = vpop.f32.mrf.mxu0 }
 0x74b   :  { %v6235_v50 = vadd.f32 %v6234_v29, %v6154_v62 }
 0x751   :  { %v6408_v27 = vpop.f32.mrf.mxu1 }
 0x753   :  { %v8319_v49 = vpop.f32.mrf.mxu1 }
 0x759   :  { %v6329_v25 = vpop.f32.mrf.mxu0 }
 0x75a   :  { %v6330_v18 = vadd.f32 %v6329_v25, %v6235_v50 }
 0x75b   :  { %v8300_v48 = vpop.f32.mrf.mxu0 }
 0x75c   :  { %v6409_v56 = vadd.f32 %v6408_v27, %v6330_v18 }
 0x75e   :  { %6413 = vst.msk [vmem:[%s10648_s10] sm:$0x3] %vm6412_vm13, %v6409_v56 }

</bundles_post_ra>
